<compile_context>
chip_gen: v7x
topology: tpu7x:2x2x1
jax: 0.10.0
libtpu: 0.0.40
codegen_flags: <defaults>
</compile_context>

<pallas_src>
import jax
import jax.numpy as jnp
from jax.experimental import pallas as pl
from jax.experimental.pallas import tpu as pltpu


# ----------------------------- Pallas kernel -------------------------------

def _linear_relu_kernel(x_ref, w_ref, b_ref, o_ref):
    """One (M, tn) output tile: o = relu(x @ w + b).

    x_ref: (M, K)      bf16 activations (full K per step, no reduction axis)
    w_ref: (1, K, tn)  bf16 pre-blocked weight tile (contiguous in HBM)
    b_ref: (1, tn)     f32 bias
    o_ref: (M, tn)     f32 output
    """
    acc = jnp.dot(x_ref[...], w_ref[0], preferred_element_type=jnp.float32)
    o_ref[...] = jnp.maximum(acc + b_ref[...], 0.0)


# ------------------------------ JAX wrapper --------------------------------

def linear_relu(x_bf16, w_blocked_bf16, b_f32):
    """relu(x @ W + b) as a single pallas_call.

    x_bf16:         (M, K)             bf16
    w_blocked_bf16: (n_blocks, K, tn)  bf16, pre-blocked along N at init time
    b_f32:          (1, N)             f32
    """
    M, K = x_bf16.shape
    n_blocks, Kw, tn = w_blocked_bf16.shape
    assert Kw == K
    N = n_blocks * tn
    assert b_f32.shape == (1, N)
    assert tn % 128 == 0

    return pl.pallas_call(
        _linear_relu_kernel,
        out_shape=jax.ShapeDtypeStruct((M, N), jnp.float32),
        grid=(n_blocks,),
        in_specs=[
            pl.BlockSpec((M, K), lambda j: (0, 0)),
            pl.BlockSpec((1, K, tn), lambda j: (j, 0, 0)),   # contiguous tile
            pl.BlockSpec((1, tn), lambda j: (0, j)),
        ],
        out_specs=pl.BlockSpec((M, tn), lambda j: (0, j)),
        compiler_params=pltpu.CompilerParams(
            dimension_semantics=("parallel",),        # megacore split on v7x
            vmem_limit_bytes=32 * 1024 * 1024,        # pin; ~8 MiB actually used
        ),
    )(x_bf16, w_blocked_bf16, b_f32)


# --------------------------- parameters & forward --------------------------

def init_params(key, input_dim, output_dim, *, n_blocks=2):
    """nn.Linear-style init U(-1/sqrt(in), 1/sqrt(in)), with the weight
    pre-transposed to (K, N), cast to bf16, and pre-blocked as
    (n_blocks, K, N // n_blocks) ONCE — so the per-call path does no layout
    work or casting."""
    assert output_dim % n_blocks == 0 and (output_dim // n_blocks) % 128 == 0
    kw, kb = jax.random.split(key)
    bound = 1.0 / jnp.sqrt(jnp.float32(input_dim))
    w = jax.random.uniform(kw, (output_dim, input_dim), jnp.float32,
                           -bound, bound)            # PyTorch layout: (out, in)
    b = jax.random.uniform(kb, (output_dim,), jnp.float32, -bound, bound)

    tn = output_dim // n_blocks
    w_t = jnp.transpose(w)                                        # (K, N)
    w_blocked = (w_t.reshape(input_dim, n_blocks, tn)             # (K, nb, tn)
                 .transpose(1, 0, 2)                              # (nb, K, tn)
                 .astype(jnp.bfloat16))
    return {
        "w": w,                                   # reference (out, in) f32
        "b": b,                                   # reference (out,)    f32
        "w_blocked": w_blocked,                   # kernel weight, bf16
        "b_row": b.astype(jnp.float32).reshape(1, -1),   # kernel bias, (1, N)
    }


def videonn_forward(params, x):
    """Matches VideoNN.forward: relu(denseL1(x)). No per-call weight
    transpose/cast — just the one fused pallas_call."""
    return linear_relu(x.astype(jnp.bfloat16), params["w_blocked"],
                       params["b_row"])


if __name__ == "__main__":
    key = jax.random.PRNGKey(0)
    kp, kx = jax.random.split(key)

    BATCH, INPUT_DIM, OUTPUT_DIM = 2, 4096, 1024   # module defaults, small batch
    # TODO(synk): batch frames so M >= 128/256 to move off the GEMV/HBM roofline.
    params = init_params(kp, INPUT_DIM, OUTPUT_DIM)
    x = jax.random.normal(kx, (BATCH, INPUT_DIM), jnp.float32)

    out = jax.jit(videonn_forward)(params, x)
    out = jax.block_until_ready(out)

    assert out.shape == (BATCH, OUTPUT_DIM), out.shape
    assert bool(jnp.all(jnp.isfinite(out)))
    assert bool(jnp.all(out >= 0.0))               # ReLU post-condition

    # Loose check vs. fp32 reference (bf16 MXU inputs => ~1e-2 relative).
    ref = jnp.maximum(x @ params["w"].T + params["b"], 0.0)
    assert bool(jnp.allclose(out, ref, rtol=5e-2, atol=1e-1))

    print("KERNEL_OK")
</pallas_src>

<mosaic_0001>
module attributes {stable_mosaic.version = 11 : i64} {
  func.func @_linear_relu_kernel(%arg0: i32, %arg1: memref<2x4096xbf16, #tpu.memory_space<vmem>>, %arg2: memref<1x4096x512xbf16, #tpu.memory_space<vmem>>, %arg3: memref<1x512xf32, #tpu.memory_space<vmem>>, %arg4: memref<2x512xf32, #tpu.memory_space<vmem>>) attributes {dimension_semantics = [#tpu.dimension_semantics<parallel>], iteration_bounds = array<i64: 2>, scalar_prefetch = 0 : i64, scratch_operands = 0 : i64, tpu.core_type = #tpu.core_type<tc>, window_params = [{pipeline_mode = #tpu.pipeline_mode<synchronous>, transform_indices = @transform_0, window_bounds = array<i64: 2, 4096>}, {transform_indices = @transform_1, window_bounds = array<i64: 1, 4096, 512>}, {transform_indices = @transform_2, window_bounds = array<i64: 1, 512>}, {transform_indices = @transform_3, window_bounds = array<i64: 2, 512>}]} {
    %c0 = arith.constant 0 : index
    %c0_0 = arith.constant 0 : index
    %0 = vector.load %arg1[%c0, %c0_0] : memref<2x4096xbf16, #tpu.memory_space<vmem>>, vector<2x4096xbf16>
    %c0_1 = arith.constant 0 : index
    %c0_2 = arith.constant 0 : index
    %c0_3 = arith.constant 0 : index
    %1 = vector.load %arg2[%c0_1, %c0_2, %c0_3] : memref<1x4096x512xbf16, #tpu.memory_space<vmem>>, vector<1x4096x512xbf16>
    %2 = vector.shape_cast %1 : vector<1x4096x512xbf16> to vector<4096x512xbf16>
    %cst = arith.constant dense<0.000000e+00> : vector<2x512xf32>
    %3 = tpu.matmul %0, %2, %cst {dimension_numbers = #tpu.dot_dimension_numbers<[1], [0], [0], [1], [0, 0, 1, 1], [], []>} : vector<2x4096xbf16>, vector<4096x512xbf16>, vector<2x512xf32> -> vector<2x512xf32>
    %c0_4 = arith.constant 0 : index
    %c0_5 = arith.constant 0 : index
    %4 = vector.load %arg3[%c0_4, %c0_5] : memref<1x512xf32, #tpu.memory_space<vmem>>, vector<1x512xf32>
    %5 = vector.broadcast %4 : vector<1x512xf32> to vector<2x512xf32>
    %6 = arith.addf %3, %5 : vector<2x512xf32>
    %cst_6 = arith.constant 0.000000e+00 : f32
    %7 = vector.broadcast %cst_6 : f32 to vector<2x512xf32>
    %8 = arith.maximumf %6, %7 : vector<2x512xf32>
    %c0_7 = arith.constant 0 : index
    %c0_8 = arith.constant 0 : index
    %9 = vector.load %arg4[%c0_7, %c0_8] : memref<2x512xf32, #tpu.memory_space<vmem>>, vector<2x512xf32>
    tpu.vector_store %arg4[%c0_7, %c0_8], %8 {strides = array<i32>} : memref<2x512xf32, #tpu.memory_space<vmem>>, vector<2x512xf32>,
    return
  }
  func.func @transform_0(%arg0: i32) -> (i32, i32) {
    %c0_i32 = arith.constant 0 : i32
    %c0_i32_0 = arith.constant 0 : i32
    %c0_i32_1 = arith.constant 0 : i32
    return %c0_i32, %c0_i32_0 : i32, i32
  }
  func.func @transform_1(%arg0: i32) -> (i32, i32, i32) {
    %c0_i32 = arith.constant 0 : i32
    %c0_i32_0 = arith.constant 0 : i32
    %c0_i32_1 = arith.constant 0 : i32
    return %arg0, %c0_i32, %c0_i32_0 : i32, i32, i32
  }
  func.func @transform_2(%arg0: i32) -> (i32, i32) {
    %c0_i32 = arith.constant 0 : i32
    %c0_i32_0 = arith.constant 0 : i32
    return %c0_i32, %arg0 : i32, i32
  }
  func.func @transform_3(%arg0: i32) -> (i32, i32) {
    %c0_i32 = arith.constant 0 : i32
    %c0_i32_0 = arith.constant 0 : i32
    return %c0_i32, %arg0 : i32, i32
  }
}

</mosaic_0001>

<bundles_post_ra>
// kernel: videonn_forward.1
= control target key start
LH: loop header
LB: loop body
LE: loop exit
PB: predicated region body
PF: predicated region fallthrough
CT: control target
= control target key end

     0   :  { %8 = vsyncpa [#allocation3], 0  ;;  %s12423_s0 = inlined_call_operand.vmem [shape: bf16[2,4096], index: 0, kind: input, shape index: {}]   ;;  %s12424_s1 = inlined_call_operand.hbm [shape: bf16[2,4096,512], index: 1, kind: input, shape index: {}]   ;;  %s12425_s2 = inlined_call_operand.hbm [shape: f32[1,1024], index: 2, kind: input, shape index: {}]   ;;  %s12426_s3 = inlined_call_operand.hbm [shape: f32[2,1024], index: 3, kind: output, shape index: {}]  }
   0x1   :  { %10 = vsyncpa [#allocation3 + $0x1], 0 }
   0x2   :  { %11 = vsyncpa [#allocation6], 0 }
   0x3   :  { %13 = vsyncpa [#allocation6 + $0x1], 0 }
   0x4   :  { %14 = vsyncpa [#allocation4], 0 }
   0x5   :  { %16 = vsyncpa [#allocation4 + $0x1], 0  ;;  %s11003_s12 = smov 0   ;;  %s11005_s13 = smov 0  }
   0x6   :  { %s11007_s14 = smov 0   ;;  %s11009_s15 = smov 0  }
   0x7 LB: > { %s11024_s16 = sadd.s32 4294967295, %s10974_s15   ;;  %s8078_s17 = sadd.s32 4294967294, %s10974_s15   ;;  %s10974_s15 = sphi %s11009_s15, %s12443_s15   ;;  %s10970_s14 = sphi %s11007_s14, %s12442_s14   ;;  %s10966_s13 = sphi %s11005_s13, %s12441_s13   ;;  %s10962_s12 = sphi %s11003_s12, %s12440_s12  }
   0x8   : > { %s11028_s18 = sadd.s32 1, %s10974_s15   ;;  %s50_s19 = sadd.s32 1, %s10970_s14 }
   0x9   : > { %s47_s20 = ssub.s32 %s10974_s15, %s11028_s18  ;;  %p57_p0 = scmp.ne.s32.totalorder %s10970_s14, %s10966_s13 }
   0xa   : > { %p48_p1 = scmp.eq.s32.totalorder %s47_s20, 0  ;;  %p58_p2 = scmp.eq.s32.totalorder %s10974_s15, 0 }
   0xb   : > { %p63_p3 = scmp.ne.s32.totalorder %s10966_s13, %s10962_s12  ;;  %p64_p4 = scmp.eq.s32.totalorder %s11024_s16, 0 }
   0xc   : > { %s11040_s21 = scalar_select %p48_p1, %s10970_s14, %s50_s19  }
   0xd   : > { %p11042_p5 = por %p58_p2, %p57_p0  ;;  %p11046_p6 = por %p64_p4, %p63_p3 }
   0xe   : > { %p113_p7 = scmp.eq.s32.totalorder %s11024_s16, 1  ;;  %p119_p8 = scmp.eq.s32.totalorder %s8078_s17, 1 }
   0xf   : > { %s12430_s23 = scalar_select %p11046_p6, 1, 0 }
  0x10   : > { %p9264_p10 = scmp.lt.s32.totalorder %s10974_s15, 2  ;;  %p11053_p11 = por %p113_p7, %p57_p0 }
  0x11   : > { %p11057_p12 = por %p119_p8, %p63_p3  ;;  %s11062_s26 = sand.u32 1, %s10970_s14  }
  0x12   : > { %s12431_s24 = scalar_select %p11053_p11, 1, 0 }
  0x13   : > { %s12432_s25 = scalar_select %p11057_p12, 1, 0 }
  0x14   : > { %s9120_s27 = sshll.u32 %s10974_s15, 17  ;;  %s8081_s28 = sshll.u32 %s11062_s26, 13 }
  0x15   : > { %s11069_s4 = scalar_lea.hbm %s12424_s1, %s9120_s27  ;;  %s146_s5 = scalar_lea.vmem [#allocation2], %s8081_s28 }
  0x16   : > { %s153_s6 = sshll.u32 %s146_s5, 4  ;;  %p11073_p13 = pnand %p9264_p10, %p11042_p5  ;;  %s11077_s6 = int_to_ptr.vmem [resolvable:$true] %s153_s6 }
  0x17   : > { %s143_s8 = scalar_lea.sflag [#allocation3], %s11062_s26  ;;  %s10844_s9 = scalar_lea.hbm %s11069_s4, 131072 }
  0x18   : > { %p10845_p0 = scmp.ne.s32.totalorder %s11069_s4, %s10844_s9  ;;  %p10846_p1 = pneg %p11073_p13 }
  0x19   : > { %s10849_s17 = scalar_lea.hbm %s12424_s1, 262144  ;;  %p10850_p4 = scmp.lt.u32.totalorder %s11069_s4, %s12424_s1 }
  0x1a   : > { %p10847_p2 = pnand %p10846_p1, %p10845_p0  ;;  %p10851_p5 = scmp.lt.u32.totalorder %s10849_s17, %s10844_s9 }
  0x1b   : > { %p10853_p8 = scmp.lt.u32.totalorder %s10844_s9, %s11069_s4 }
  0x1c   : > { %p10848_p3 = pneg %p10847_p2  ;;  %p10852_p7 = por %p10851_p5, %p10850_p4 }
  0x1e   : > { %p10854_p10 = por %p10853_p8, %p10852_p7 }
  0x20   : > { %p10855_p9 = pnand %p10854_p10, %p10848_p3 }
  0x22   : > { %10858 = shalt.err (!%p10855_p9)
}
  0x23   : > { %s10859_s22 = scalar_lea.vmem %s11077_s6, 131072  ;;  %s10976_s27 = smov [#allocation2]  }
  0x24   : > { %p10860_p0 = scmp.ne.s32.totalorder %s11077_s6, %s10859_s22  ;;  %s10864_s28 = sshll.u32 %s10976_s27, 4  ;;  %s10865_s28 = int_to_ptr.vmem [resolvable:$false] %s10864_s28 }
  0x25   : > { %s10866_s29 = scalar_lea.vmem %s10865_s28, 262144  ;;  %p10867_p11 = scmp.lt.s32.totalorder %s11077_s6, %s10865_s28 }
  0x26   : > { %p10862_p2 = pnand %p10860_p0, %p10846_p1  ;;  %p10868_p4 = scmp.lt.s32.totalorder %s10866_s29, %s10859_s22 }
  0x28   : > { %p10863_p12 = pneg %p10862_p2  ;;  %p10869_p5 = por %p10868_p4, %p10867_p11 }
  0x2a   : > { %p10870_p7 = pnand %p10869_p5, %p10863_p12 }
  0x2c   : > { %10873 = shalt.err (!%p10870_p7)
}
  0x2d   : > { %s10977_s30 = smov 256   ;;  %s10978_s5 = smov 16  }
  0x2e   : > { %9256 = dma.hbm_to_vmem [thread:$0]  (!%p11073_p13), %s11069_s4, 131072, %s11077_s6, %s143_s8, %s10977_s30, %s10977_s30, %s10978_s5  }
  0x2f   : > { %p8087_p9 = scmp.ge.s32.totalorder %s10974_s15, 1  ;;  %p180_p3 = scmp.lt.s32.totalorder %s10974_s15, 3 }
  0x30   : > { %s8084_s9 = sshll.u32 %s11062_s26, 2  ;;  %s9121_s11 = sshll.u32 %s10974_s15, 6 }
  0x31   : > { %p11110_p11 = pnand %p8087_p9, %p180_p3  ;;  %s167_s17 = scalar_lea.vmem [#allocation5], %s8084_s9 }
  0x32   : > { %s175_s19 = sshll.u32 %s167_s17, 4  ;;  %s11118_s27 = scalar_lea.hbm %s12425_s2, %s9121_s11  ;;  %s176_s19 = int_to_ptr.vmem [resolvable:$true] %s175_s19 }
  0x33   : > { %s12434_s10 = scalar_select %p11110_p11, 1, 0 }
  0x34   : > { %s164_s4 = scalar_lea.sflag [#allocation6], %s11062_s26  ;;  %s10874_s6 = scalar_lea.hbm %s11118_s27, 64 }
  0x35   : > { %p10875_p12 = scmp.ne.s32.totalorder %s11118_s27, %s10874_s6  ;;  %s10879_s29 = scalar_lea.hbm %s12425_s2, 128 }
  0x36   : > { %p10880_p0 = scmp.lt.u32.totalorder %s11118_s27, %s12425_s2  ;;  %p10881_p2 = scmp.lt.u32.totalorder %s10879_s29, %s10874_s6 }
  0x37   : > { %p10877_p8 = pnand %p10875_p12, %p10846_p1  ;;  %p10883_p5 = scmp.lt.u32.totalorder %s10874_s6, %s11118_s27 }
  0x38   : > { %p10882_p4 = por %p10881_p2, %p10880_p0 }
  0x39   : > { %p10878_p10 = pneg %p10877_p8 }
  0x3a   : > { %p10884_p7 = por %p10883_p5, %p10882_p4 }
  0x3c   : > { %p10885_p9 = pnand %p10884_p7, %p10878_p10 }
  0x3e   : > { %10888 = shalt.err (!%p10885_p9)
}
  0x3f   : > { %s10889_s26 = scalar_lea.vmem %s176_s19, 64  ;;  %s10979_s9 = smov [#allocation5]  }
  0x40   : > { %p10890_p3 = scmp.ne.s32.totalorder %s176_s19, %s10889_s26  ;;  %s10894_s11 = sshll.u32 %s10979_s9, 4  ;;  %s10895_s11 = int_to_ptr.vmem [resolvable:$false] %s10894_s11 }
  0x41   : > { %s10896_s17 = scalar_lea.vmem %s10895_s11, 128  ;;  %p10897_p6 = scmp.lt.s32.totalorder %s176_s19, %s10895_s11 }
  0x42   : > { %p10892_p12 = pnand %p10890_p3, %p10846_p1  ;;  %p10898_p11 = scmp.lt.s32.totalorder %s10896_s17, %s10889_s26 }
  0x44   : > { %p10893_p8 = pneg %p10892_p12  ;;  %p10899_p0 = por %p10898_p11, %p10897_p6 }
  0x46   : > { %p10900_p2 = pnand %p10899_p0, %p10893_p8 }
  0x48   : > { %10903 = shalt.err (!%p10900_p2)
}
  0x49   : > { %9259 = dma.hbm_to_vmem [thread:$0]  (!%p11073_p13), %s11118_s27, 64, %s176_s19, %s164_s4  }
  0x4a   : > { %p12435_p10 = scmp.ne.s32.totalorder %s12434_s10, 0 }
  0x4b   : > { %s11143_s20 = sand.u32 (!%p12435_p10), 1, %s10966_s13   ;;  %p12436_p6 = scmp.ne.s32.totalorder (!%p12435_p10), %s12430_s23, 0 }
  0x4c   : > { %184 = sbr.rel (%p12435_p10) target bundleno = 1349 (0x545), region = 32  ;;  %s8088_s22 = sshll.u32 (!%p12435_p10), %s11143_s20, 13 }
  0x4d   : > { %s187_s6 = scalar_lea.sflag (!%p12435_p10), [#allocation3], %s11143_s20  ;;  %s11147_s8 = scalar_lea.vmem (!%p12435_p10), [#allocation2], %s8088_s22 }
  0x53   : > { %10949 = dma.done.wait (%p12436_p6), %s187_s6, 131072  }
  0x54   : > { %10951 = vsyncadd (%p12436_p6), %s187_s6, 4294836224  ;;  %s8089_s7 = sshll.u32 %s11143_s20, 2  ;;  %s196_s10 = scalar_lea.sflag [#allocation6], %s11143_s20 }
  0x55   : > { %s11155_s19 = scalar_lea.vmem [#allocation5], %s8089_s7 }
  0x56   : > { %10953 = dma.done.wait (%p12436_p6), %s196_s10, 64  }
  0x57   : > { %10955 = vsyncadd (%p12436_p6), %s196_s10, 4294967232  ;;  %v9302_v0 = vld [vmem:[%s11147_s8 + $0x4] ss:$16 sps:$4 sm:$0xff]   ;;  %v9304_v1 = vld [vmem:[%s11147_s8 + $0xc] ss:$16 sps:$4 sm:$0xff]   ;;  %v1259_v36 = vlaneseq  ;;  %s8090_s17 = sshll.u32 %s11143_s20, 3 }
  0x58   : > { %6631 = vmatprep.subr.bf16.mxu0 %v9302_v0  ;;  %v9306_v2 = vld [vmem:[%s11147_s8] ss:$16 sps:$4 sm:$0xff]   ;;  %v9307_v3 = vld [vmem:[%s11147_s8 + $0x8] ss:$16 sps:$4 sm:$0xff]   ;;  %7287 = vmatprep.subr.bf16.mxu1 %v9304_v1  ;;  %v9308_v4 = vld [vmem:[%s11147_s8 + $0x24] ss:$16 sps:$4 sm:$0xff]  }
  0x59   : > { %6632 = vmatpush1.bf16.msra.mxu0 %v9306_v2  ;;  %7288 = vmatpush1.bf16.msra.mxu1 %v9307_v3  ;;  %v9310_v5 = vld [vmem:[%s11147_s8 + $0x2c] ss:$16 sps:$4 sm:$0xff]   ;;  %v9312_v6 = vld [vmem:[%s11147_s8 + $0x20] ss:$16 sps:$4 sm:$0xff]   ;;  %v9313_v7 = vld [vmem:[%s11147_s8 + $0x28] ss:$16 sps:$4 sm:$0xff]  }
  0x5a   : > { %6633 = vmatprep.subr.bf16.mxu0 %v9308_v4  ;;  %7289 = vmatprep.subr.bf16.mxu1 %v9310_v5  ;;  %v9314_v8 = vld [vmem:[%s11147_s8 + $0x44] ss:$16 sps:$4 sm:$0xff]   ;;  %v9316_v9 = vld [vmem:[%s11147_s8 + $0x4c] ss:$16 sps:$4 sm:$0xff]   ;;  %v9318_v10 = vld [vmem:[%s11147_s8 + $0x40] ss:$16 sps:$4 sm:$0xff]  }
  0x5b   : > { %v9319_v11 = vld [vmem:[%s11147_s8 + $0x48] ss:$16 sps:$4 sm:$0xff]   ;;  %v9320_v12 = vld [vmem:[%s11147_s8 + $0x64] ss:$16 sps:$4 sm:$0xff]   ;;  %v9322_v13 = vld [vmem:[%s11147_s8 + $0x6c] ss:$16 sps:$4 sm:$0xff]  }
  0x5c   : > { %v9324_v14 = vld [vmem:[%s11147_s8 + $0x60] ss:$16 sps:$4 sm:$0xff]   ;;  %v9325_v15 = vld [vmem:[%s11147_s8 + $0x68] ss:$16 sps:$4 sm:$0xff]   ;;  %v9326_v16 = vld [vmem:[%s11147_s8 + $0x84] ss:$16 sps:$4 sm:$0xff]  }
  0x5d   : > { %6634 = vmatpush1.bf16.msra.mxu0 %v9312_v6  ;;  %7290 = vmatpush1.bf16.msra.mxu1 %v9313_v7  ;;  %v9328_v17 = vld [vmem:[%s11147_s8 + $0x8c] ss:$16 sps:$4 sm:$0xff]   ;;  %v9330_v18 = vld [vmem:[%s11147_s8 + $0x80] ss:$16 sps:$4 sm:$0xff]   ;;  %v9331_v19 = vld [vmem:[%s11147_s8 + $0x88] ss:$16 sps:$4 sm:$0xff]  }
  0x5e   : > { %6635 = vmatprep.subr.bf16.mxu0 %v9314_v8  ;;  %7291 = vmatprep.subr.bf16.mxu1 %v9316_v9  ;;  %v9332_v20 = vld [vmem:[%s11147_s8 + $0xa4] ss:$16 sps:$4 sm:$0xff]   ;;  %v9334_v21 = vld [vmem:[%s11147_s8 + $0xac] ss:$16 sps:$4 sm:$0xff]   ;;  %v9336_v22 = vld [vmem:[%s11147_s8 + $0xa0] ss:$16 sps:$4 sm:$0xff]  }
  0x5f   : > { %v9337_v23 = vld [vmem:[%s11147_s8 + $0xa8] ss:$16 sps:$4 sm:$0xff]   ;;  %v9338_v24 = vld [vmem:[%s11147_s8 + $0xc4] ss:$16 sps:$4 sm:$0xff]   ;;  %v9340_v25 = vld [vmem:[%s11147_s8 + $0xcc] ss:$16 sps:$4 sm:$0xff]  }
  0x60   : > { %v9342_v26 = vld [vmem:[%s11147_s8 + $0xc0] ss:$16 sps:$4 sm:$0xff]   ;;  %v9343_v27 = vld [vmem:[%s11147_s8 + $0xc8] ss:$16 sps:$4 sm:$0xff]   ;;  %v9344_v28 = vld [vmem:[%s11147_s8 + $0xe4] ss:$16 sps:$4 sm:$0xff]  }
  0x61   : > { %6636 = vmatpush1.bf16.msra.mxu0 %v9318_v10  ;;  %7292 = vmatpush1.bf16.msra.mxu1 %v9319_v11  ;;  %v9346_v29 = vld [vmem:[%s11147_s8 + $0xec] ss:$16 sps:$4 sm:$0xff]   ;;  %v9348_v30 = vld [vmem:[%s11147_s8 + $0xe0] ss:$16 sps:$4 sm:$0xff]   ;;  %v9349_v31 = vld [vmem:[%s11147_s8 + $0xe8] ss:$16 sps:$4 sm:$0xff]  }
  0x62   : > { %6637 = vmatprep.subr.bf16.mxu0 %v9320_v12  ;;  %7293 = vmatprep.subr.bf16.mxu1 %v9322_v13  ;;  %v9350_v32 = vld [vmem:[%s11147_s8 + $0x104] ss:$16 sps:$4 sm:$0xff]   ;;  %v9352_v33 = vld [vmem:[%s11147_s8 + $0x10c] ss:$16 sps:$4 sm:$0xff]   ;;  %v9354_v34 = vld [vmem:[%s11147_s8 + $0x100] ss:$16 sps:$4 sm:$0xff]  }
  0x63   : > { %v9355_v35 = vld [vmem:[%s11147_s8 + $0x108] ss:$16 sps:$4 sm:$0xff]   ;;  %v10980_v37 = vmov 1966171168   ;;  %v9356_v39 = vld [vmem:[%s11147_s8 + $0x124] ss:$16 sps:$4 sm:$0xff]  }
  0x64   : > { %v1285_v38 = vunpack.c.l.s4 %v10980_v37  ;;  %v9358_v40 = vld [vmem:[%s11147_s8 + $0x12c] ss:$16 sps:$4 sm:$0xff]   ;;  %v9360_v41 = vld [vmem:[%s11147_s8 + $0x120] ss:$16 sps:$4 sm:$0xff]   ;;  %v11200_v42 = vshrl.u32 %v1259_v36, 7  ;;  %s9122_s22 = sshll.u32 %s11024_s16, 7 }
  0x65   : > { %6638 = vmatpush1.bf16.msra.mxu0 %v9324_v14  ;;  %7294 = vmatpush1.bf16.msra.mxu1 %v9325_v15  ;;  %v9361_v44 = vld [vmem:[%s11147_s8 + $0x128] ss:$16 sps:$4 sm:$0xff]   ;;  %v9362_v45 = vld [vmem:[%s11147_s8 + $0x144] ss:$16 sps:$4 sm:$0xff]   ;;  %v9364_v46 = vld [vmem:[%s11147_s8 + $0x14c] ss:$16 sps:$4 sm:$0xff]  }
  0x66   : > { %6639 = vmatprep.subr.bf16.mxu0 %v9326_v16  ;;  %7295 = vmatprep.subr.bf16.mxu1 %v9328_v17  ;;  %v1286_v43 = vunpack.c.0.s8 %v1285_v38  ;;  %v9366_v47 = vld [vmem:[%s11147_s8 + $0x140] ss:$16 sps:$4 sm:$0xff]   ;;  %v9367_v48 = vld [vmem:[%s11147_s8 + $0x148] ss:$16 sps:$4 sm:$0xff]   ;;  %v9368_v50 = vld [vmem:[%s11147_s8 + $0x164] ss:$16 sps:$4 sm:$0xff]  }
  0x67   : > { %v9370_v51 = vld [vmem:[%s11147_s8 + $0x16c] ss:$16 sps:$4 sm:$0xff]   ;;  %v11215_v52 = vld [vmem:[%s12423_s0] sm:$0xff]  ;;  %v9373_v55 = vld [vmem:[%s11147_s8 + $0x168] ss:$16 sps:$4 sm:$0xff]   ;;  %s226_s6 = scalar_lea.vmem [#allocation7], %s8090_s17 }
  0x68   : > { %v11208_v49 = vsub.s32 %v1286_v43, %v11200_v42  ;;  %v9372_v53 = vld [vmem:[%s11147_s8 + $0x160] ss:$16 sps:$4 sm:$0xff]   ;;  %v9374_v56 = vld [vmem:[%s11147_s8 + $0x184] ss:$16 sps:$4 sm:$0xff]   ;;  %v9376_v57 = vld [vmem:[%s11147_s8 + $0x18c] ss:$16 sps:$4 sm:$0xff]  }
  0x69   : > { %6640 = vmatpush1.bf16.msra.mxu0 %v9330_v18  ;;  %7296 = vmatpush1.bf16.msra.mxu1 %v9331_v19  ;;  %v9378_v59 = vld [vmem:[%s11147_s8 + $0x180] ss:$16 sps:$4 sm:$0xff]   ;;  %v9379_v61 = vld [vmem:[%s11147_s8 + $0x188] ss:$16 sps:$4 sm:$0xff]   ;;  %v9380_v62 = vld [vmem:[%s11147_s8 + $0x1a4] ss:$16 sps:$4 sm:$0xff]  }
  0x6a   : > { %6641 = vmatprep.subr.bf16.mxu0 %v9332_v20  ;;  %7297 = vmatprep.subr.bf16.mxu1 %v9334_v21  ;;  %v1290_v54 = vrot.slane %v11215_v52, %v11208_v49  ;;  %v9382_v63 = vld [vmem:[%s11147_s8 + $0x1ac] ss:$16 sps:$4 sm:$0xff]   ;;  %v9384_v0 = vld [vmem:[%s11147_s8 + $0x1a0] ss:$16 sps:$4 sm:$0xff]   ;;  %v9385_v1 = vld [vmem:[%s11147_s8 + $0x1a8] ss:$16 sps:$4 sm:$0xff]  }
  0x6b   : > { %v9386_v2 = vld [vmem:[%s11147_s8 + $0x1c4] ss:$16 sps:$4 sm:$0xff]   ;;  %v9388_v3 = vld [vmem:[%s11147_s8 + $0x1cc] ss:$16 sps:$4 sm:$0xff]   ;;  %v9390_v4 = vld [vmem:[%s11147_s8 + $0x1c0] ss:$16 sps:$4 sm:$0xff]  }
  0x6c   : > { %v1298_v58 = vcombine.high %v1290_v54, %v1290_v54  ;;  %v9391_v5 = vld [vmem:[%s11147_s8 + $0x1c8] ss:$16 sps:$4 sm:$0xff]   ;;  %v9392_v6 = vld [vmem:[%s11147_s8 + $0x1e4] ss:$16 sps:$4 sm:$0xff]   ;;  %v9394_v7 = vld [vmem:[%s11147_s8 + $0x1ec] ss:$16 sps:$4 sm:$0xff]   ;;  %v11242_v13 = vrot.slane %v1290_v54, %v11208_v49 }
  0x6d   : > { %6642 = vmatpush1.bf16.msra.mxu0 %v9336_v22  ;;  %7298 = vmatpush1.bf16.msra.mxu1 %v9337_v23  ;;  %v9396_v8 = vld [vmem:[%s11147_s8 + $0x1e0] ss:$16 sps:$4 sm:$0xff]   ;;  %v9397_v9 = vld [vmem:[%s11147_s8 + $0x1e8] ss:$16 sps:$4 sm:$0xff]   ;;  %v9400_v10 = vld [vmem:[%s11147_s8 + $0x204] ss:$16 sps:$4 sm:$0xff]  }
  0x6e   : > { %6643 = vmatprep.subr.bf16.mxu0 %v9338_v24  ;;  %7299 = vmatprep.subr.bf16.mxu1 %v9340_v25  ;;  %v1320_v60 = vrot.slane %v1298_v58, %v11208_v49  ;;  %v9403_v11 = vld [vmem:[%s11147_s8 + $0x20c] ss:$16 sps:$4 sm:$0xff]   ;;  %v9398_v12 = vld [vmem:[%s11147_s8 + $0x200] ss:$16 sps:$4 sm:$0xff]   ;;  %v9401_v14 = vld [vmem:[%s11147_s8 + $0x208] ss:$16 sps:$4 sm:$0xff]  }
  0x6f   : > { %v9406_v15 = vld [vmem:[%s11147_s8 + $0x224] ss:$16 sps:$4 sm:$0xff]   ;;  %v9409_v16 = vld [vmem:[%s11147_s8 + $0x22c] ss:$16 sps:$4 sm:$0xff]   ;;  %v9404_v18 = vld [vmem:[%s11147_s8 + $0x220] ss:$16 sps:$4 sm:$0xff]  }
  0x70   : > { %6663 = vmatprep.mubr.bf16.mxu0 %v1320_v60  ;;  %7319 = vmatprep.mubr.bf16.mxu1 %v1320_v60  ;;  %v1330_v17 = vcombine.high %v1320_v60, %v1320_v60  ;;  %v9407_v19 = vld [vmem:[%s11147_s8 + $0x228] ss:$16 sps:$4 sm:$0xff]   ;;  %v9412_v20 = vld [vmem:[%s11147_s8 + $0x244] ss:$16 sps:$4 sm:$0xff]   ;;  %v9415_v21 = vld [vmem:[%s11147_s8 + $0x24c] ss:$16 sps:$4 sm:$0xff]  }
  0x71   : > { %6644 = vmatpush1.bf16.msra.mxu0 %v9342_v26  ;;  %7300 = vmatpush1.bf16.msra.mxu1 %v9343_v27  ;;  %v9410_v22 = vld [vmem:[%s11147_s8 + $0x240] ss:$16 sps:$4 sm:$0xff]   ;;  %v9413_v23 = vld [vmem:[%s11147_s8 + $0x248] ss:$16 sps:$4 sm:$0xff]   ;;  %v9418_v24 = vld [vmem:[%s11147_s8 + $0x264] ss:$16 sps:$4 sm:$0xff]  }
  0x72   : > { %6645 = vmatprep.subr.bf16.mxu0 %v9344_v28  ;;  %7301 = vmatprep.subr.bf16.mxu1 %v9346_v29  ;;  %v9421_v25 = vld [vmem:[%s11147_s8 + $0x26c] ss:$16 sps:$4 sm:$0xff]   ;;  %v9416_v26 = vld [vmem:[%s11147_s8 + $0x260] ss:$16 sps:$4 sm:$0xff]   ;;  %v9419_v27 = vld [vmem:[%s11147_s8 + $0x268] ss:$16 sps:$4 sm:$0xff]  }
  0x73   : > { %v9424_v28 = vld [vmem:[%s11147_s8 + $0x284] ss:$16 sps:$4 sm:$0xff]   ;;  %v9427_v29 = vld [vmem:[%s11147_s8 + $0x28c] ss:$16 sps:$4 sm:$0xff]   ;;  %v9434_v38 = vld [vmem:[%s11147_s8 + $0x2c0] ss:$16 sps:$4 sm:$0xff]  }
  0x74   : > { %v9436_v36 = vld [vmem:[%s11147_s8 + $0x2c4] ss:$16 sps:$4 sm:$0xff]   ;;  %v9439_v37 = vld [vmem:[%s11147_s8 + $0x2cc] ss:$16 sps:$4 sm:$0xff]   ;;  %v9440_v43 = vld [vmem:[%s11147_s8 + $0x2e0] ss:$16 sps:$4 sm:$0xff]  }
  0x75   : > { %6646 = vmatpush1.bf16.msra.mxu0 %v9348_v30  ;;  %7302 = vmatpush1.bf16.msra.mxu1 %v9349_v31  ;;  %v9422_v30 = vld [vmem:[%s11147_s8 + $0x280] ss:$16 sps:$4 sm:$0xff]   ;;  %v9425_v31 = vld [vmem:[%s11147_s8 + $0x288] ss:$16 sps:$4 sm:$0xff]   ;;  %v9469_v60 = vld [vmem:[%s11147_s8 + $0x36c] ss:$16 sps:$4 sm:$0xff]  }
  0x76   : > { %6647 = vmatprep.subr.bf16.mxu0 %v9350_v32  ;;  %7303 = vmatprep.subr.bf16.mxu1 %v9352_v33  ;;  %v9430_v32 = vld [vmem:[%s11147_s8 + $0x2a4] ss:$16 sps:$4 sm:$0xff]   ;;  %v9433_v33 = vld [vmem:[%s11147_s8 + $0x2ac] ss:$16 sps:$4 sm:$0xff]   ;;  %v9455_v54 = vld [vmem:[%s11147_s8 + $0x328] ss:$16 sps:$4 sm:$0xff]  }
  0x77   : > { %v9461_v58 = vld [vmem:[%s11147_s8 + $0x348] ss:$16 sps:$4 sm:$0xff]   ;;  %s7971_s23 = scalar_lea.sflag [#allocation4], %s11143_s20  ;;  %p12437_p1 = scmp.ne.s32.totalorder %s12431_s24, 0 }
  0x78   : > { %s10982_s16 = smov [#allocation7]  }
  0x79   : > { %6648 = vmatpush1.bf16.msra.mxu0 %v9354_v34  ;;  %7304 = vmatpush1.bf16.msra.mxu1 %v9355_v35  ;;  %v9428_v34 = vld [vmem:[%s11147_s8 + $0x2a0] ss:$16 sps:$4 sm:$0xff]   ;;  %v9431_v35 = vld [vmem:[%s11147_s8 + $0x2a8] ss:$16 sps:$4 sm:$0xff]   ;;  %s10908_s4 = sshll.u32 %s10982_s16, 4  ;;  %s10909_s4 = int_to_ptr.vmem [resolvable:$false] %s10908_s4 }
  0x7a   : > { %6649 = vmatprep.subr.bf16.mxu0 %v9356_v39  ;;  %7305 = vmatprep.subr.bf16.mxu1 %v9358_v40  ;;  %v9437_v39 = vld [vmem:[%s11147_s8 + $0x2c8] ss:$16 sps:$4 sm:$0xff]   ;;  %v9442_v40 = vld [vmem:[%s11147_s8 + $0x2e4] ss:$16 sps:$4 sm:$0xff]   ;;  %s10910_s28 = scalar_lea.vmem %s10909_s4, 256 }
  0x7d   : > { %6650 = vmatpush1.bf16.msra.mxu0 %v9360_v41  ;;  %7306 = vmatpush1.bf16.msra.mxu1 %v9361_v44  ;;  %v9445_v41 = vld [vmem:[%s11147_s8 + $0x2ec] ss:$16 sps:$4 sm:$0xff]   ;;  %v9443_v44 = vld [vmem:[%s11147_s8 + $0x2e8] ss:$16 sps:$4 sm:$0xff]  }
  0x7e   : > { %6651 = vmatprep.subr.bf16.mxu0 %v9362_v45  ;;  %7307 = vmatprep.subr.bf16.mxu1 %v9364_v46  ;;  %v9448_v45 = vld [vmem:[%s11147_s8 + $0x304] ss:$16 sps:$4 sm:$0xff]   ;;  %v9451_v46 = vld [vmem:[%s11147_s8 + $0x30c] ss:$16 sps:$4 sm:$0xff]  }
  0x81   : > { %6652 = vmatpush1.bf16.msra.mxu0 %v9366_v47  ;;  %7308 = vmatpush1.bf16.msra.mxu1 %v9367_v48  ;;  %v9446_v47 = vld [vmem:[%s11147_s8 + $0x300] ss:$16 sps:$4 sm:$0xff]   ;;  %v9449_v48 = vld [vmem:[%s11147_s8 + $0x308] ss:$16 sps:$4 sm:$0xff]  }
  0x82   : > { %6653 = vmatprep.subr.bf16.mxu0 %v9368_v50  ;;  %7309 = vmatprep.subr.bf16.mxu1 %v9370_v51  ;;  %v9454_v50 = vld [vmem:[%s11147_s8 + $0x324] ss:$16 sps:$4 sm:$0xff]   ;;  %v9457_v51 = vld [vmem:[%s11147_s8 + $0x32c] ss:$16 sps:$4 sm:$0xff]  }
  0x85   : > { %6654 = vmatpush1.bf16.msra.mxu0 %v9372_v53  ;;  %7310 = vmatpush1.bf16.msra.mxu1 %v9373_v55  ;;  %v9452_v53 = vld [vmem:[%s11147_s8 + $0x320] ss:$16 sps:$4 sm:$0xff]   ;;  %v9460_v55 = vld [vmem:[%s11147_s8 + $0x344] ss:$16 sps:$4 sm:$0xff]  }
  0x86   : > { %6655 = vmatprep.subr.bf16.mxu0 %v9374_v56  ;;  %7311 = vmatprep.subr.bf16.mxu1 %v9376_v57  ;;  %v9463_v56 = vld [vmem:[%s11147_s8 + $0x34c] ss:$16 sps:$4 sm:$0xff]   ;;  %v9458_v57 = vld [vmem:[%s11147_s8 + $0x340] ss:$16 sps:$4 sm:$0xff]  }
  0x89   : > { %6656 = vmatpush1.bf16.msra.mxu0 %v9378_v59  ;;  %7312 = vmatpush1.bf16.msra.mxu1 %v9379_v61  ;;  %v9466_v59 = vld [vmem:[%s11147_s8 + $0x364] ss:$16 sps:$4 sm:$0xff]   ;;  %v9464_v61 = vld [vmem:[%s11147_s8 + $0x360] ss:$16 sps:$4 sm:$0xff]  }
  0x8a   : > { %6657 = vmatprep.subr.bf16.mxu0 %v9380_v62  ;;  %7313 = vmatprep.subr.bf16.mxu1 %v9382_v63  ;;  %v9467_v62 = vld [vmem:[%s11147_s8 + $0x368] ss:$16 sps:$4 sm:$0xff]   ;;  %v9472_v63 = vld [vmem:[%s11147_s8 + $0x384] ss:$16 sps:$4 sm:$0xff]  }
  0x8d   : > { %6658 = vmatpush1.bf16.msra.mxu0 %v9384_v0  ;;  %7314 = vmatpush1.bf16.msra.mxu1 %v9385_v1  ;;  %v9475_v0 = vld [vmem:[%s11147_s8 + $0x38c] ss:$16 sps:$4 sm:$0xff]   ;;  %v9470_v1 = vld [vmem:[%s11147_s8 + $0x380] ss:$16 sps:$4 sm:$0xff]  }
  0x8e   : > { %6659 = vmatprep.subr.bf16.mxu0 %v9386_v2  ;;  %7315 = vmatprep.subr.bf16.mxu1 %v9388_v3  ;;  %v9473_v2 = vld [vmem:[%s11147_s8 + $0x388] ss:$16 sps:$4 sm:$0xff]   ;;  %v9478_v3 = vld [vmem:[%s11147_s8 + $0x3a4] ss:$16 sps:$4 sm:$0xff]  }
  0x91   : > { %6660 = vmatpush1.bf16.msra.mxu0 %v9390_v4  ;;  %7316 = vmatpush1.bf16.msra.mxu1 %v9391_v5  ;;  %v9481_v4 = vld [vmem:[%s11147_s8 + $0x3ac] ss:$16 sps:$4 sm:$0xff]   ;;  %v9476_v5 = vld [vmem:[%s11147_s8 + $0x3a0] ss:$16 sps:$4 sm:$0xff]  }
  0x92   : > { %6661 = vmatprep.subr.bf16.mxu0 %v9392_v6  ;;  %7317 = vmatprep.subr.bf16.mxu1 %v9394_v7  ;;  %v9479_v6 = vld [vmem:[%s11147_s8 + $0x3a8] ss:$16 sps:$4 sm:$0xff]   ;;  %v9484_v7 = vld [vmem:[%s11147_s8 + $0x3c4] ss:$16 sps:$4 sm:$0xff]  }
  0x95   : > { %6662 = vmatpush1.bf16.msra.mxu0 %v9396_v8  ;;  %7318 = vmatpush1.bf16.msra.mxu1 %v9397_v9  ;;  %v9487_v8 = vld [vmem:[%s11147_s8 + $0x3cc] ss:$16 sps:$4 sm:$0xff]   ;;  %v1283_v9 = vcombine.high %v11215_v52, %v11215_v52  ;;  %v9491_v52 = vld [vmem:[%s11147_s8 + $0x3e8] ss:$16 sps:$4 sm:$0xff]  }
  0x96   : > { %6672 = vmatprep.subr.bf16.mxu0 %v9400_v10  ;;  %7328 = vmatprep.subr.bf16.mxu1 %v9403_v11  ;;  %v9482_v10 = vld [vmem:[%s11147_s8 + $0x3c0] ss:$16 sps:$4 sm:$0xff]   ;;  %v9485_v11 = vld [vmem:[%s11147_s8 + $0x3c8] ss:$16 sps:$4 sm:$0xff]  }
  0x98   : > { %6664 = vmatmul.mubr.bf16.vlgmr.msra.gmra.mrb[0].mxu0 %v11242_v13  ;;  %7320 = vmatmul.mubr.bf16.vlgmr.msra.gmra.mrb[0].mxu1 %v11242_v13 }
  0x99   : > { %6673 = vmatpush1.bf16.msra.mxu0 %v9398_v12  ;;  %7329 = vmatpush1.bf16.msra.mxu1 %v9401_v14  ;;  %v9490_v12 = vld [vmem:[%s11147_s8 + $0x3e4] ss:$16 sps:$4 sm:$0xff]   ;;  %v9493_v14 = vld [vmem:[%s11147_s8 + $0x3ec] ss:$16 sps:$4 sm:$0xff]  }
  0x9a   : > { %6674 = vmatprep.subr.bf16.mxu0 %v9406_v15  ;;  %7330 = vmatprep.subr.bf16.mxu1 %v9409_v16  ;;  %v11308_v15 = vrot.slane %v1283_v9, %v11208_v49  ;;  %v9488_v16 = vld [vmem:[%s11147_s8 + $0x3e0] ss:$16 sps:$4 sm:$0xff]   ;;  %v9569_v9 = vld [vmem:[%s11147_s8 + $0x588] ss:$16 sps:$4 sm:$0xff]  }
  0x9b   : > { %6704 = vmatprep.mubr.bf16.mxu0 %v1330_v17  ;;  %7360 = vmatprep.mubr.bf16.mxu1 %v1330_v17  ;;  %v9496_v17 = vld [vmem:[%s11147_s8 + $0x404] ss:$16 sps:$4 sm:$0xff]  }
  0x9d   : > { %6675 = vmatpush1.bf16.msra.mxu0 %v9404_v18  ;;  %7331 = vmatpush1.bf16.msra.mxu1 %v9407_v19  ;;  %v9499_v18 = vld [vmem:[%s11147_s8 + $0x40c] ss:$16 sps:$4 sm:$0xff]   ;;  %v1299_v19 = vcombine.high %v11308_v15, %v11308_v15 }
  0x9e   : > { %6676 = vmatprep.subr.bf16.mxu0 %v9412_v20  ;;  %7332 = vmatprep.subr.bf16.mxu1 %v9415_v21  ;;  %v9494_v20 = vld [vmem:[%s11147_s8 + $0x400] ss:$16 sps:$4 sm:$0xff]   ;;  %v1328_v21 = vcombine.high %v11242_v13, %v11242_v13  ;;  %v9503_v13 = vld [vmem:[%s11147_s8 + $0x428] ss:$16 sps:$4 sm:$0xff]  }
  0xa1   : > { %6677 = vmatpush1.bf16.msra.mxu0 %v9410_v22  ;;  %7333 = vmatpush1.bf16.msra.mxu1 %v9413_v23  ;;  %v9497_v22 = vld [vmem:[%s11147_s8 + $0x408] ss:$16 sps:$4 sm:$0xff]   ;;  %v9502_v23 = vld [vmem:[%s11147_s8 + $0x424] ss:$16 sps:$4 sm:$0xff]  }
  0xa2   : > { %6678 = vmatprep.subr.bf16.mxu0 %v9418_v24  ;;  %7334 = vmatprep.subr.bf16.mxu1 %v9421_v25  ;;  %v9505_v24 = vld [vmem:[%s11147_s8 + $0x42c] ss:$16 sps:$4 sm:$0xff]   ;;  %v11323_v25 = vrot.slane %v1299_v19, %v11208_v49  ;;  %v9586_v19 = vld [vmem:[%s11147_s8 + $0x5e4] ss:$16 sps:$4 sm:$0xff]  }
  0xa5   : > { %6679 = vmatpush1.bf16.msra.mxu0 %v9416_v26  ;;  %7335 = vmatpush1.bf16.msra.mxu1 %v9419_v27  ;;  %v9500_v26 = vld [vmem:[%s11147_s8 + $0x420] ss:$16 sps:$4 sm:$0xff]   ;;  %v9508_v27 = vld [vmem:[%s11147_s8 + $0x444] ss:$16 sps:$4 sm:$0xff]  }
  0xa6   : > { %6680 = vmatprep.subr.bf16.mxu0 %v9424_v28  ;;  %7336 = vmatprep.subr.bf16.mxu1 %v9427_v29  ;;  %v9511_v28 = vld [vmem:[%s11147_s8 + $0x44c] ss:$16 sps:$4 sm:$0xff]   ;;  %v9506_v29 = vld [vmem:[%s11147_s8 + $0x440] ss:$16 sps:$4 sm:$0xff]  }
  0xa9   : > { %6681 = vmatpush1.bf16.msra.mxu0 %v9422_v30  ;;  %7337 = vmatpush1.bf16.msra.mxu1 %v9425_v31  ;;  %v9509_v30 = vld [vmem:[%s11147_s8 + $0x448] ss:$16 sps:$4 sm:$0xff]   ;;  %v9514_v31 = vld [vmem:[%s11147_s8 + $0x464] ss:$16 sps:$4 sm:$0xff]  }
  0xaa   : > { %6682 = vmatprep.subr.bf16.mxu0 %v9430_v32  ;;  %7338 = vmatprep.subr.bf16.mxu1 %v9433_v33  ;;  %v9517_v32 = vld [vmem:[%s11147_s8 + $0x46c] ss:$16 sps:$4 sm:$0xff]   ;;  %v9512_v33 = vld [vmem:[%s11147_s8 + $0x460] ss:$16 sps:$4 sm:$0xff]  }
  0xad   : > { %6683 = vmatpush1.bf16.msra.mxu0 %v9428_v34  ;;  %7339 = vmatpush1.bf16.msra.mxu1 %v9431_v35  ;;  %v9515_v34 = vld [vmem:[%s11147_s8 + $0x468] ss:$16 sps:$4 sm:$0xff]   ;;  %v9520_v35 = vld [vmem:[%s11147_s8 + $0x484] ss:$16 sps:$4 sm:$0xff]  }
  0xae   : > { %6684 = vmatprep.subr.bf16.mxu0 %v9436_v36  ;;  %7340 = vmatprep.subr.bf16.mxu1 %v9439_v37  ;;  %v9523_v36 = vld [vmem:[%s11147_s8 + $0x48c] ss:$16 sps:$4 sm:$0xff]   ;;  %v9518_v37 = vld [vmem:[%s11147_s8 + $0x480] ss:$16 sps:$4 sm:$0xff]  }
  0xb1   : > { %6685 = vmatpush1.bf16.msra.mxu0 %v9434_v38  ;;  %7341 = vmatpush1.bf16.msra.mxu1 %v9437_v39  ;;  %v9521_v38 = vld [vmem:[%s11147_s8 + $0x488] ss:$16 sps:$4 sm:$0xff]   ;;  %v9526_v39 = vld [vmem:[%s11147_s8 + $0x4a4] ss:$16 sps:$4 sm:$0xff]  }
  0xb2   : > { %6686 = vmatprep.subr.bf16.mxu0 %v9442_v40  ;;  %7342 = vmatprep.subr.bf16.mxu1 %v9445_v41  ;;  %v9529_v40 = vld [vmem:[%s11147_s8 + $0x4ac] ss:$16 sps:$4 sm:$0xff]   ;;  %v9524_v41 = vld [vmem:[%s11147_s8 + $0x4a0] ss:$16 sps:$4 sm:$0xff]  }
  0xb5   : > { %6687 = vmatpush1.bf16.msra.mxu0 %v9440_v43  ;;  %7343 = vmatpush1.bf16.msra.mxu1 %v9443_v44  ;;  %v9527_v43 = vld [vmem:[%s11147_s8 + $0x4a8] ss:$16 sps:$4 sm:$0xff]   ;;  %v9532_v44 = vld [vmem:[%s11147_s8 + $0x4c4] ss:$16 sps:$4 sm:$0xff]  }
  0xb6   : > { %6688 = vmatprep.subr.bf16.mxu0 %v9448_v45  ;;  %7344 = vmatprep.subr.bf16.mxu1 %v9451_v46  ;;  %v9535_v45 = vld [vmem:[%s11147_s8 + $0x4cc] ss:$16 sps:$4 sm:$0xff]   ;;  %v9530_v46 = vld [vmem:[%s11147_s8 + $0x4c0] ss:$16 sps:$4 sm:$0xff]  }
  0xb9   : > { %6689 = vmatpush1.bf16.msra.mxu0 %v9446_v47  ;;  %7345 = vmatpush1.bf16.msra.mxu1 %v9449_v48  ;;  %v9533_v47 = vld [vmem:[%s11147_s8 + $0x4c8] ss:$16 sps:$4 sm:$0xff]   ;;  %v9538_v48 = vld [vmem:[%s11147_s8 + $0x4e4] ss:$16 sps:$4 sm:$0xff]  }
  0xba   : > { %6690 = vmatprep.subr.bf16.mxu0 %v9454_v50  ;;  %7346 = vmatprep.subr.bf16.mxu1 %v9457_v51  ;;  %v9541_v50 = vld [vmem:[%s11147_s8 + $0x4ec] ss:$16 sps:$4 sm:$0xff]   ;;  %v9536_v51 = vld [vmem:[%s11147_s8 + $0x4e0] ss:$16 sps:$4 sm:$0xff]  }
  0xbd   : > { %6691 = vmatpush1.bf16.msra.mxu0 %v9452_v53  ;;  %7347 = vmatpush1.bf16.msra.mxu1 %v9455_v54  ;;  %v9539_v53 = vld [vmem:[%s11147_s8 + $0x4e8] ss:$16 sps:$4 sm:$0xff]   ;;  %v9544_v54 = vld [vmem:[%s11147_s8 + $0x504] ss:$16 sps:$4 sm:$0xff]  }
  0xbe   : > { %6692 = vmatprep.subr.bf16.mxu0 %v9460_v55  ;;  %7348 = vmatprep.subr.bf16.mxu1 %v9463_v56  ;;  %v9547_v55 = vld [vmem:[%s11147_s8 + $0x50c] ss:$16 sps:$4 sm:$0xff]   ;;  %v9542_v56 = vld [vmem:[%s11147_s8 + $0x500] ss:$16 sps:$4 sm:$0xff]  }
  0xc1   : > { %6693 = vmatpush1.bf16.msra.mxu0 %v9458_v57  ;;  %7349 = vmatpush1.bf16.msra.mxu1 %v9461_v58  ;;  %v9545_v57 = vld [vmem:[%s11147_s8 + $0x508] ss:$16 sps:$4 sm:$0xff]   ;;  %v9550_v58 = vld [vmem:[%s11147_s8 + $0x524] ss:$16 sps:$4 sm:$0xff]  }
  0xc2   : > { %6694 = vmatprep.subr.bf16.mxu0 %v9466_v59  ;;  %7350 = vmatprep.subr.bf16.mxu1 %v9469_v60  ;;  %v9553_v59 = vld [vmem:[%s11147_s8 + $0x52c] ss:$16 sps:$4 sm:$0xff]   ;;  %v9548_v60 = vld [vmem:[%s11147_s8 + $0x520] ss:$16 sps:$4 sm:$0xff]  }
  0xc5   : > { %6695 = vmatpush1.bf16.msra.mxu0 %v9464_v61  ;;  %7351 = vmatpush1.bf16.msra.mxu1 %v9467_v62  ;;  %v9551_v61 = vld [vmem:[%s11147_s8 + $0x528] ss:$16 sps:$4 sm:$0xff]   ;;  %v9556_v62 = vld [vmem:[%s11147_s8 + $0x544] ss:$16 sps:$4 sm:$0xff]  }
  0xc6   : > { %6696 = vmatprep.subr.bf16.mxu0 %v9472_v63  ;;  %7352 = vmatprep.subr.bf16.mxu1 %v9475_v0  ;;  %v9559_v63 = vld [vmem:[%s11147_s8 + $0x54c] ss:$16 sps:$4 sm:$0xff]   ;;  %v9554_v0 = vld [vmem:[%s11147_s8 + $0x540] ss:$16 sps:$4 sm:$0xff]  }
  0xc9   : > { %6697 = vmatpush1.bf16.msra.mxu0 %v9470_v1  ;;  %7353 = vmatpush1.bf16.msra.mxu1 %v9473_v2  ;;  %v9557_v1 = vld [vmem:[%s11147_s8 + $0x548] ss:$16 sps:$4 sm:$0xff]   ;;  %v9562_v2 = vld [vmem:[%s11147_s8 + $0x564] ss:$16 sps:$4 sm:$0xff]  }
  0xca   : > { %6698 = vmatprep.subr.bf16.mxu0 %v9478_v3  ;;  %7354 = vmatprep.subr.bf16.mxu1 %v9481_v4  ;;  %v9565_v3 = vld [vmem:[%s11147_s8 + $0x56c] ss:$16 sps:$4 sm:$0xff]   ;;  %v9560_v4 = vld [vmem:[%s11147_s8 + $0x560] ss:$16 sps:$4 sm:$0xff]  }
  0xcd   : > { %6699 = vmatpush1.bf16.msra.mxu0 %v9476_v5  ;;  %7355 = vmatpush1.bf16.msra.mxu1 %v9479_v6  ;;  %v9563_v5 = vld [vmem:[%s11147_s8 + $0x568] ss:$16 sps:$4 sm:$0xff]   ;;  %v9568_v6 = vld [vmem:[%s11147_s8 + $0x584] ss:$16 sps:$4 sm:$0xff]  }
  0xce   : > { %6700 = vmatprep.subr.bf16.mxu0 %v9484_v7  ;;  %7356 = vmatprep.subr.bf16.mxu1 %v9487_v8  ;;  %v9571_v7 = vld [vmem:[%s11147_s8 + $0x58c] ss:$16 sps:$4 sm:$0xff]   ;;  %v9566_v8 = vld [vmem:[%s11147_s8 + $0x580] ss:$16 sps:$4 sm:$0xff]  }
  0xd1   : > { %6701 = vmatpush1.bf16.msra.mxu0 %v9482_v10  ;;  %7357 = vmatpush1.bf16.msra.mxu1 %v9485_v11  ;;  %v9574_v10 = vld [vmem:[%s11147_s8 + $0x5a4] ss:$16 sps:$4 sm:$0xff]   ;;  %v9577_v11 = vld [vmem:[%s11147_s8 + $0x5ac] ss:$16 sps:$4 sm:$0xff]  }
  0xd2   : > { %6702 = vmatprep.subr.bf16.mxu0 %v9490_v12  ;;  %7358 = vmatprep.subr.bf16.mxu1 %v9493_v14  ;;  %v9572_v12 = vld [vmem:[%s11147_s8 + $0x5a0] ss:$16 sps:$4 sm:$0xff]   ;;  %v9575_v14 = vld [vmem:[%s11147_s8 + $0x5a8] ss:$16 sps:$4 sm:$0xff]  }
  0xd5   : > { %6703 = vmatpush1.bf16.msra.mxu0 %v9488_v16  ;;  %7359 = vmatpush1.bf16.msra.mxu1 %v9491_v52  ;;  %v9580_v16 = vld [vmem:[%s11147_s8 + $0x5c4] ss:$16 sps:$4 sm:$0xff]   ;;  %v9583_v52 = vld [vmem:[%s11147_s8 + $0x5cc] ss:$16 sps:$4 sm:$0xff]  }
  0xd6   : > { %6713 = vmatprep.subr.bf16.mxu0 %v9496_v17  ;;  %7369 = vmatprep.subr.bf16.mxu1 %v9499_v18  ;;  %v9578_v17 = vld [vmem:[%s11147_s8 + $0x5c0] ss:$16 sps:$4 sm:$0xff]   ;;  %v9581_v18 = vld [vmem:[%s11147_s8 + $0x5c8] ss:$16 sps:$4 sm:$0xff]  }
  0xd8   : > { %6705 = vmatmul.mubr.bf16.vlgmr.msra.gmra.mrb[0].mxu0 %v1328_v21  ;;  %7361 = vmatmul.mubr.bf16.vlgmr.msra.gmra.mrb[0].mxu1 %v1328_v21  ;;  %v9584_v21 = vld [vmem:[%s11147_s8 + $0x5e0] ss:$16 sps:$4 sm:$0xff]  }
  0xd9   : > { %6714 = vmatpush1.bf16.msra.mxu0 %v9494_v20  ;;  %7370 = vmatpush1.bf16.msra.mxu1 %v9497_v22  ;;  %v9589_v20 = vld [vmem:[%s11147_s8 + $0x5ec] ss:$16 sps:$4 sm:$0xff]   ;;  %v9587_v22 = vld [vmem:[%s11147_s8 + $0x5e8] ss:$16 sps:$4 sm:$0xff]  }
  0xda   : > { %6715 = vmatprep.subr.bf16.mxu0 %v9502_v23  ;;  %7371 = vmatprep.subr.bf16.mxu1 %v9505_v24  ;;  %v9593_v23 = vld [vmem:[%s11147_s8 + $0x604] ss:$16 sps:$4 sm:$0xff]   ;;  %v9596_v24 = vld [vmem:[%s11147_s8 + $0x60c] ss:$16 sps:$4 sm:$0xff]  }
  0xdb   : > { %6745 = vmatprep.mubr.bf16.mxu0 %v11323_v25  ;;  %7401 = vmatprep.mubr.bf16.mxu1 %v11323_v25 }
  0xdd   : > { %6716 = vmatpush1.bf16.msra.mxu0 %v9500_v26  ;;  %7372 = vmatpush1.bf16.msra.mxu1 %v9503_v13  ;;  %v9591_v26 = vld [vmem:[%s11147_s8 + $0x600] ss:$16 sps:$4 sm:$0xff]   ;;  %v11390_v13 = vrot.slane %v11308_v15, %v11208_v49 }
  0xde   : > { %6717 = vmatprep.subr.bf16.mxu0 %v9508_v27  ;;  %7373 = vmatprep.subr.bf16.mxu1 %v9511_v28  ;;  %v9594_v27 = vld [vmem:[%s11147_s8 + $0x608] ss:$16 sps:$4 sm:$0xff]   ;;  %v9599_v28 = vld [vmem:[%s11147_s8 + $0x624] ss:$16 sps:$4 sm:$0xff]   ;;  %v9597_v15 = vld [vmem:[%s11147_s8 + $0x620] ss:$16 sps:$4 sm:$0xff]  }
  0xe1   : > { %6718 = vmatpush1.bf16.msra.mxu0 %v9506_v29  ;;  %7374 = vmatpush1.bf16.msra.mxu1 %v9509_v30  ;;  %v9602_v29 = vld [vmem:[%s11147_s8 + $0x62c] ss:$16 sps:$4 sm:$0xff]   ;;  %v1331_v30 = vcombine.high %v11323_v25, %v11323_v25  ;;  %v9603_v25 = vld [vmem:[%s11147_s8 + $0x640] ss:$16 sps:$4 sm:$0xff]  }
  0xe2   : > { %6719 = vmatprep.subr.bf16.mxu0 %v9514_v31  ;;  %7375 = vmatprep.subr.bf16.mxu1 %v9517_v32  ;;  %v9600_v31 = vld [vmem:[%s11147_s8 + $0x628] ss:$16 sps:$4 sm:$0xff]   ;;  %v9605_v32 = vld [vmem:[%s11147_s8 + $0x644] ss:$16 sps:$4 sm:$0xff]  }
  0xe5   : > { %6720 = vmatpush1.bf16.msra.mxu0 %v9512_v33  ;;  %7376 = vmatpush1.bf16.msra.mxu1 %v9515_v34  ;;  %v9608_v33 = vld [vmem:[%s11147_s8 + $0x64c] ss:$16 sps:$4 sm:$0xff]   ;;  %v9606_v34 = vld [vmem:[%s11147_s8 + $0x648] ss:$16 sps:$4 sm:$0xff]  }
  0xe6   : > { %6721 = vmatprep.subr.bf16.mxu0 %v9520_v35  ;;  %7377 = vmatprep.subr.bf16.mxu1 %v9523_v36  ;;  %v9611_v35 = vld [vmem:[%s11147_s8 + $0x664] ss:$16 sps:$4 sm:$0xff]   ;;  %v9614_v36 = vld [vmem:[%s11147_s8 + $0x66c] ss:$16 sps:$4 sm:$0xff]  }
  0xe9   : > { %6722 = vmatpush1.bf16.msra.mxu0 %v9518_v37  ;;  %7378 = vmatpush1.bf16.msra.mxu1 %v9521_v38  ;;  %v9609_v37 = vld [vmem:[%s11147_s8 + $0x660] ss:$16 sps:$4 sm:$0xff]   ;;  %v9612_v38 = vld [vmem:[%s11147_s8 + $0x668] ss:$16 sps:$4 sm:$0xff]  }
  0xea   : > { %6723 = vmatprep.subr.bf16.mxu0 %v9526_v39  ;;  %7379 = vmatprep.subr.bf16.mxu1 %v9529_v40  ;;  %v9617_v39 = vld [vmem:[%s11147_s8 + $0x684] ss:$16 sps:$4 sm:$0xff]   ;;  %v9620_v40 = vld [vmem:[%s11147_s8 + $0x68c] ss:$16 sps:$4 sm:$0xff]  }
  0xed   : > { %6724 = vmatpush1.bf16.msra.mxu0 %v9524_v41  ;;  %7380 = vmatpush1.bf16.msra.mxu1 %v9527_v43  ;;  %v9615_v41 = vld [vmem:[%s11147_s8 + $0x680] ss:$16 sps:$4 sm:$0xff]   ;;  %v9618_v43 = vld [vmem:[%s11147_s8 + $0x688] ss:$16 sps:$4 sm:$0xff]  }
  0xee   : > { %6725 = vmatprep.subr.bf16.mxu0 %v9532_v44  ;;  %7381 = vmatprep.subr.bf16.mxu1 %v9535_v45  ;;  %v9623_v44 = vld [vmem:[%s11147_s8 + $0x6a4] ss:$16 sps:$4 sm:$0xff]   ;;  %v9626_v45 = vld [vmem:[%s11147_s8 + $0x6ac] ss:$16 sps:$4 sm:$0xff]  }
  0xf1   : > { %6726 = vmatpush1.bf16.msra.mxu0 %v9530_v46  ;;  %7382 = vmatpush1.bf16.msra.mxu1 %v9533_v47  ;;  %v9621_v46 = vld [vmem:[%s11147_s8 + $0x6a0] ss:$16 sps:$4 sm:$0xff]   ;;  %v9624_v47 = vld [vmem:[%s11147_s8 + $0x6a8] ss:$16 sps:$4 sm:$0xff]  }
  0xf2   : > { %6727 = vmatprep.subr.bf16.mxu0 %v9538_v48  ;;  %7383 = vmatprep.subr.bf16.mxu1 %v9541_v50  ;;  %v9629_v48 = vld [vmem:[%s11147_s8 + $0x6c4] ss:$16 sps:$4 sm:$0xff]   ;;  %v9632_v50 = vld [vmem:[%s11147_s8 + $0x6cc] ss:$16 sps:$4 sm:$0xff]  }
  0xf5   : > { %6728 = vmatpush1.bf16.msra.mxu0 %v9536_v51  ;;  %7384 = vmatpush1.bf16.msra.mxu1 %v9539_v53  ;;  %v9627_v51 = vld [vmem:[%s11147_s8 + $0x6c0] ss:$16 sps:$4 sm:$0xff]   ;;  %v9630_v53 = vld [vmem:[%s11147_s8 + $0x6c8] ss:$16 sps:$4 sm:$0xff]  }
  0xf6   : > { %6729 = vmatprep.subr.bf16.mxu0 %v9544_v54  ;;  %7385 = vmatprep.subr.bf16.mxu1 %v9547_v55  ;;  %v9635_v54 = vld [vmem:[%s11147_s8 + $0x6e4] ss:$16 sps:$4 sm:$0xff]   ;;  %v9638_v55 = vld [vmem:[%s11147_s8 + $0x6ec] ss:$16 sps:$4 sm:$0xff]  }
  0xf9   : > { %6730 = vmatpush1.bf16.msra.mxu0 %v9542_v56  ;;  %7386 = vmatpush1.bf16.msra.mxu1 %v9545_v57  ;;  %v9633_v56 = vld [vmem:[%s11147_s8 + $0x6e0] ss:$16 sps:$4 sm:$0xff]   ;;  %v9636_v57 = vld [vmem:[%s11147_s8 + $0x6e8] ss:$16 sps:$4 sm:$0xff]  }
  0xfa   : > { %6731 = vmatprep.subr.bf16.mxu0 %v9550_v58  ;;  %7387 = vmatprep.subr.bf16.mxu1 %v9553_v59  ;;  %v9641_v58 = vld [vmem:[%s11147_s8 + $0x704] ss:$16 sps:$4 sm:$0xff]   ;;  %v9644_v59 = vld [vmem:[%s11147_s8 + $0x70c] ss:$16 sps:$4 sm:$0xff]  }
  0xfd   : > { %6732 = vmatpush1.bf16.msra.mxu0 %v9548_v60  ;;  %7388 = vmatpush1.bf16.msra.mxu1 %v9551_v61  ;;  %v9639_v60 = vld [vmem:[%s11147_s8 + $0x700] ss:$16 sps:$4 sm:$0xff]   ;;  %v9642_v61 = vld [vmem:[%s11147_s8 + $0x708] ss:$16 sps:$4 sm:$0xff]  }
  0xfe   : > { %6733 = vmatprep.subr.bf16.mxu0 %v9556_v62  ;;  %7389 = vmatprep.subr.bf16.mxu1 %v9559_v63  ;;  %v9647_v62 = vld [vmem:[%s11147_s8 + $0x724] ss:$16 sps:$4 sm:$0xff]   ;;  %v9650_v63 = vld [vmem:[%s11147_s8 + $0x72c] ss:$16 sps:$4 sm:$0xff]  }
 0x101   : > { %6734 = vmatpush1.bf16.msra.mxu0 %v9554_v0  ;;  %7390 = vmatpush1.bf16.msra.mxu1 %v9557_v1  ;;  %v9645_v0 = vld [vmem:[%s11147_s8 + $0x720] ss:$16 sps:$4 sm:$0xff]   ;;  %v9648_v1 = vld [vmem:[%s11147_s8 + $0x728] ss:$16 sps:$4 sm:$0xff]  }
 0x102   : > { %6735 = vmatprep.subr.bf16.mxu0 %v9562_v2  ;;  %7391 = vmatprep.subr.bf16.mxu1 %v9565_v3  ;;  %v9653_v2 = vld [vmem:[%s11147_s8 + $0x744] ss:$16 sps:$4 sm:$0xff]   ;;  %v9656_v3 = vld [vmem:[%s11147_s8 + $0x74c] ss:$16 sps:$4 sm:$0xff]  }
 0x105   : > { %6736 = vmatpush1.bf16.msra.mxu0 %v9560_v4  ;;  %7392 = vmatpush1.bf16.msra.mxu1 %v9563_v5  ;;  %v9651_v4 = vld [vmem:[%s11147_s8 + $0x740] ss:$16 sps:$4 sm:$0xff]   ;;  %v9654_v5 = vld [vmem:[%s11147_s8 + $0x748] ss:$16 sps:$4 sm:$0xff]  }
 0x106   : > { %6737 = vmatprep.subr.bf16.mxu0 %v9568_v6  ;;  %7393 = vmatprep.subr.bf16.mxu1 %v9571_v7  ;;  %v9659_v6 = vld [vmem:[%s11147_s8 + $0x764] ss:$16 sps:$4 sm:$0xff]   ;;  %v9662_v7 = vld [vmem:[%s11147_s8 + $0x76c] ss:$16 sps:$4 sm:$0xff]  }
 0x109   : > { %6738 = vmatpush1.bf16.msra.mxu0 %v9566_v8  ;;  %7394 = vmatpush1.bf16.msra.mxu1 %v9569_v9  ;;  %v9657_v8 = vld [vmem:[%s11147_s8 + $0x760] ss:$16 sps:$4 sm:$0xff]   ;;  %v9660_v9 = vld [vmem:[%s11147_s8 + $0x768] ss:$16 sps:$4 sm:$0xff]  }
 0x10a   : > { %6739 = vmatprep.subr.bf16.mxu0 %v9574_v10  ;;  %7395 = vmatprep.subr.bf16.mxu1 %v9577_v11  ;;  %v9665_v10 = vld [vmem:[%s11147_s8 + $0x784] ss:$16 sps:$4 sm:$0xff]   ;;  %v9668_v11 = vld [vmem:[%s11147_s8 + $0x78c] ss:$16 sps:$4 sm:$0xff]  }
 0x10d   : > { %6740 = vmatpush1.bf16.msra.mxu0 %v9572_v12  ;;  %7396 = vmatpush1.bf16.msra.mxu1 %v9575_v14  ;;  %v9663_v12 = vld [vmem:[%s11147_s8 + $0x780] ss:$16 sps:$4 sm:$0xff]   ;;  %v9666_v14 = vld [vmem:[%s11147_s8 + $0x788] ss:$16 sps:$4 sm:$0xff]  }
 0x10e   : > { %6741 = vmatprep.subr.bf16.mxu0 %v9580_v16  ;;  %7397 = vmatprep.subr.bf16.mxu1 %v9583_v52  ;;  %v9671_v16 = vld [vmem:[%s11147_s8 + $0x7a4] ss:$16 sps:$4 sm:$0xff]   ;;  %v9674_v52 = vld [vmem:[%s11147_s8 + $0x7ac] ss:$16 sps:$4 sm:$0xff]  }
 0x111   : > { %6742 = vmatpush1.bf16.msra.mxu0 %v9578_v17  ;;  %7398 = vmatpush1.bf16.msra.mxu1 %v9581_v18  ;;  %v9669_v17 = vld [vmem:[%s11147_s8 + $0x7a0] ss:$16 sps:$4 sm:$0xff]   ;;  %v9672_v18 = vld [vmem:[%s11147_s8 + $0x7a8] ss:$16 sps:$4 sm:$0xff]  }
 0x112   : > { %6743 = vmatprep.subr.bf16.mxu0 %v9586_v19  ;;  %7399 = vmatprep.subr.bf16.mxu1 %v9589_v20  ;;  %v9677_v19 = vld [vmem:[%s11147_s8 + $0x7c4] ss:$16 sps:$4 sm:$0xff]   ;;  %v9680_v20 = vld [vmem:[%s11147_s8 + $0x7cc] ss:$16 sps:$4 sm:$0xff]  }
 0x115   : > { %6744 = vmatpush1.bf16.msra.mxu0 %v9584_v21  ;;  %7400 = vmatpush1.bf16.msra.mxu1 %v9587_v22  ;;  %v11454_v21 = vld.sshfl [vmem:[%s12423_s0 + $0x8] sm:$0xff pattern:$0x75316420]  ;;  %v9675_v22 = vld [vmem:[%s11147_s8 + $0x7c0] ss:$16 sps:$4 sm:$0xff]  }
 0x116   : > { %6754 = vmatprep.subr.bf16.mxu0 %v9593_v23  ;;  %7410 = vmatprep.subr.bf16.mxu1 %v9596_v24  ;;  %v9678_v23 = vld [vmem:[%s11147_s8 + $0x7c8] ss:$16 sps:$4 sm:$0xff]   ;;  %v9683_v24 = vld [vmem:[%s11147_s8 + $0x7e4] ss:$16 sps:$4 sm:$0xff]  }
 0x118   : > { %6746 = vmatmul.mubr.bf16.vlgmr.msra.gmra.mrb[0].mxu0 %v11390_v13  ;;  %7402 = vmatmul.mubr.bf16.vlgmr.msra.gmra.mrb[0].mxu1 %v11390_v13 }
 0x119   : > { %6755 = vmatpush1.bf16.msra.mxu0 %v9591_v26  ;;  %7411 = vmatpush1.bf16.msra.mxu1 %v9594_v27  ;;  %v9686_v26 = vld [vmem:[%s11147_s8 + $0x7ec] ss:$16 sps:$4 sm:$0xff]   ;;  %v9681_v27 = vld [vmem:[%s11147_s8 + $0x7e0] ss:$16 sps:$4 sm:$0xff]  }
 0x11a   : > { %6756 = vmatprep.subr.bf16.mxu0 %v9599_v28  ;;  %7412 = vmatprep.subr.bf16.mxu1 %v9602_v29  ;;  %v9684_v28 = vld [vmem:[%s11147_s8 + $0x7e8] ss:$16 sps:$4 sm:$0xff]   ;;  %v9689_v29 = vld [vmem:[%s11147_s8 + $0x804] ss:$16 sps:$4 sm:$0xff]  }
 0x11b   : > { %6786 = vmatprep.mubr.bf16.mxu0 %v1331_v30  ;;  %7442 = vmatprep.mubr.bf16.mxu1 %v1331_v30  ;;  %v9692_v30 = vld [vmem:[%s11147_s8 + $0x80c] ss:$16 sps:$4 sm:$0xff]  }
 0x11d   : > { %6757 = vmatpush1.bf16.msra.mxu0 %v9597_v15  ;;  %7413 = vmatpush1.bf16.msra.mxu1 %v9600_v31  ;;  %v1347_v15 = vcombine.high %v11454_v21, %v11454_v21  ;;  %v1329_v31 = vcombine.high %v11390_v13, %v11390_v13  ;;  %v9693_v13 = vld [vmem:[%s11147_s8 + $0x820] ss:$16 sps:$4 sm:$0xff]  }
 0x11e   : > { %6758 = vmatprep.subr.bf16.mxu0 %v9605_v32  ;;  %7414 = vmatprep.subr.bf16.mxu1 %v9608_v33  ;;  %v9687_v32 = vld [vmem:[%s11147_s8 + $0x800] ss:$16 sps:$4 sm:$0xff]   ;;  %v9690_v33 = vld [vmem:[%s11147_s8 + $0x808] ss:$16 sps:$4 sm:$0xff]  }
 0x121   : > { %6759 = vmatpush1.bf16.msra.mxu0 %v9603_v25  ;;  %7415 = vmatpush1.bf16.msra.mxu1 %v9606_v34  ;;  %v9695_v25 = vld [vmem:[%s11147_s8 + $0x824] ss:$16 sps:$4 sm:$0xff]   ;;  %v9698_v34 = vld [vmem:[%s11147_s8 + $0x82c] ss:$16 sps:$4 sm:$0xff]  }
 0x122   : > { %6760 = vmatprep.subr.bf16.mxu0 %v9611_v35  ;;  %7416 = vmatprep.subr.bf16.mxu1 %v9614_v36  ;;  %v11473_v35 = vrot.slane %v1347_v15, %v11208_v49  ;;  %v9696_v36 = vld [vmem:[%s11147_s8 + $0x828] ss:$16 sps:$4 sm:$0xff]   ;;  %v9779_v15 = vld [vmem:[%s11147_s8 + $0x9e4] ss:$16 sps:$4 sm:$0xff]  }
 0x125   : > { %6761 = vmatpush1.bf16.msra.mxu0 %v9609_v37  ;;  %7417 = vmatpush1.bf16.msra.mxu1 %v9612_v38  ;;  %v9701_v37 = vld [vmem:[%s11147_s8 + $0x844] ss:$16 sps:$4 sm:$0xff]   ;;  %v9704_v38 = vld [vmem:[%s11147_s8 + $0x84c] ss:$16 sps:$4 sm:$0xff]  }
 0x126   : > { %6762 = vmatprep.subr.bf16.mxu0 %v9617_v39  ;;  %7418 = vmatprep.subr.bf16.mxu1 %v9620_v40  ;;  %v9699_v39 = vld [vmem:[%s11147_s8 + $0x840] ss:$16 sps:$4 sm:$0xff]   ;;  %v9702_v40 = vld [vmem:[%s11147_s8 + $0x848] ss:$16 sps:$4 sm:$0xff]  }
 0x129   : > { %6763 = vmatpush1.bf16.msra.mxu0 %v9615_v41  ;;  %7419 = vmatpush1.bf16.msra.mxu1 %v9618_v43  ;;  %v9707_v41 = vld [vmem:[%s11147_s8 + $0x864] ss:$16 sps:$4 sm:$0xff]   ;;  %v9710_v43 = vld [vmem:[%s11147_s8 + $0x86c] ss:$16 sps:$4 sm:$0xff]  }
 0x12a   : > { %6764 = vmatprep.subr.bf16.mxu0 %v9623_v44  ;;  %7420 = vmatprep.subr.bf16.mxu1 %v9626_v45  ;;  %v9705_v44 = vld [vmem:[%s11147_s8 + $0x860] ss:$16 sps:$4 sm:$0xff]   ;;  %v9708_v45 = vld [vmem:[%s11147_s8 + $0x868] ss:$16 sps:$4 sm:$0xff]  }
 0x12d   : > { %6765 = vmatpush1.bf16.msra.mxu0 %v9621_v46  ;;  %7421 = vmatpush1.bf16.msra.mxu1 %v9624_v47  ;;  %v9713_v46 = vld [vmem:[%s11147_s8 + $0x884] ss:$16 sps:$4 sm:$0xff]   ;;  %v9716_v47 = vld [vmem:[%s11147_s8 + $0x88c] ss:$16 sps:$4 sm:$0xff]  }
 0x12e   : > { %6766 = vmatprep.subr.bf16.mxu0 %v9629_v48  ;;  %7422 = vmatprep.subr.bf16.mxu1 %v9632_v50  ;;  %v9711_v48 = vld [vmem:[%s11147_s8 + $0x880] ss:$16 sps:$4 sm:$0xff]   ;;  %v9714_v50 = vld [vmem:[%s11147_s8 + $0x888] ss:$16 sps:$4 sm:$0xff]  }
 0x131   : > { %6767 = vmatpush1.bf16.msra.mxu0 %v9627_v51  ;;  %7423 = vmatpush1.bf16.msra.mxu1 %v9630_v53  ;;  %v9719_v51 = vld [vmem:[%s11147_s8 + $0x8a4] ss:$16 sps:$4 sm:$0xff]   ;;  %v9722_v53 = vld [vmem:[%s11147_s8 + $0x8ac] ss:$16 sps:$4 sm:$0xff]  }
 0x132   : > { %6768 = vmatprep.subr.bf16.mxu0 %v9635_v54  ;;  %7424 = vmatprep.subr.bf16.mxu1 %v9638_v55  ;;  %v9717_v54 = vld [vmem:[%s11147_s8 + $0x8a0] ss:$16 sps:$4 sm:$0xff]   ;;  %v9720_v55 = vld [vmem:[%s11147_s8 + $0x8a8] ss:$16 sps:$4 sm:$0xff]  }
 0x135   : > { %6769 = vmatpush1.bf16.msra.mxu0 %v9633_v56  ;;  %7425 = vmatpush1.bf16.msra.mxu1 %v9636_v57  ;;  %v9725_v56 = vld [vmem:[%s11147_s8 + $0x8c4] ss:$16 sps:$4 sm:$0xff]   ;;  %v9728_v57 = vld [vmem:[%s11147_s8 + $0x8cc] ss:$16 sps:$4 sm:$0xff]  }
 0x136   : > { %6770 = vmatprep.subr.bf16.mxu0 %v9641_v58  ;;  %7426 = vmatprep.subr.bf16.mxu1 %v9644_v59  ;;  %v9723_v58 = vld [vmem:[%s11147_s8 + $0x8c0] ss:$16 sps:$4 sm:$0xff]   ;;  %v9726_v59 = vld [vmem:[%s11147_s8 + $0x8c8] ss:$16 sps:$4 sm:$0xff]  }
 0x139   : > { %6771 = vmatpush1.bf16.msra.mxu0 %v9639_v60  ;;  %7427 = vmatpush1.bf16.msra.mxu1 %v9642_v61  ;;  %v9731_v60 = vld [vmem:[%s11147_s8 + $0x8e4] ss:$16 sps:$4 sm:$0xff]   ;;  %v9734_v61 = vld [vmem:[%s11147_s8 + $0x8ec] ss:$16 sps:$4 sm:$0xff]  }
 0x13a   : > { %6772 = vmatprep.subr.bf16.mxu0 %v9647_v62  ;;  %7428 = vmatprep.subr.bf16.mxu1 %v9650_v63  ;;  %v9729_v62 = vld [vmem:[%s11147_s8 + $0x8e0] ss:$16 sps:$4 sm:$0xff]   ;;  %v9732_v63 = vld [vmem:[%s11147_s8 + $0x8e8] ss:$16 sps:$4 sm:$0xff]  }
 0x13d   : > { %6773 = vmatpush1.bf16.msra.mxu0 %v9645_v0  ;;  %7429 = vmatpush1.bf16.msra.mxu1 %v9648_v1  ;;  %v9737_v0 = vld [vmem:[%s11147_s8 + $0x904] ss:$16 sps:$4 sm:$0xff]   ;;  %v9740_v1 = vld [vmem:[%s11147_s8 + $0x90c] ss:$16 sps:$4 sm:$0xff]  }
 0x13e   : > { %6774 = vmatprep.subr.bf16.mxu0 %v9653_v2  ;;  %7430 = vmatprep.subr.bf16.mxu1 %v9656_v3  ;;  %v9735_v2 = vld [vmem:[%s11147_s8 + $0x900] ss:$16 sps:$4 sm:$0xff]   ;;  %v9738_v3 = vld [vmem:[%s11147_s8 + $0x908] ss:$16 sps:$4 sm:$0xff]  }
 0x141   : > { %6775 = vmatpush1.bf16.msra.mxu0 %v9651_v4  ;;  %7431 = vmatpush1.bf16.msra.mxu1 %v9654_v5  ;;  %v9743_v4 = vld [vmem:[%s11147_s8 + $0x924] ss:$16 sps:$4 sm:$0xff]   ;;  %v9746_v5 = vld [vmem:[%s11147_s8 + $0x92c] ss:$16 sps:$4 sm:$0xff]  }
 0x142   : > { %6776 = vmatprep.subr.bf16.mxu0 %v9659_v6  ;;  %7432 = vmatprep.subr.bf16.mxu1 %v9662_v7  ;;  %v9741_v6 = vld [vmem:[%s11147_s8 + $0x920] ss:$16 sps:$4 sm:$0xff]   ;;  %v9744_v7 = vld [vmem:[%s11147_s8 + $0x928] ss:$16 sps:$4 sm:$0xff]  }
 0x145   : > { %6777 = vmatpush1.bf16.msra.mxu0 %v9657_v8  ;;  %7433 = vmatpush1.bf16.msra.mxu1 %v9660_v9  ;;  %v9749_v8 = vld [vmem:[%s11147_s8 + $0x944] ss:$16 sps:$4 sm:$0xff]   ;;  %v9752_v9 = vld [vmem:[%s11147_s8 + $0x94c] ss:$16 sps:$4 sm:$0xff]  }
 0x146   : > { %6778 = vmatprep.subr.bf16.mxu0 %v9665_v10  ;;  %7434 = vmatprep.subr.bf16.mxu1 %v9668_v11  ;;  %v9747_v10 = vld [vmem:[%s11147_s8 + $0x940] ss:$16 sps:$4 sm:$0xff]   ;;  %v9750_v11 = vld [vmem:[%s11147_s8 + $0x948] ss:$16 sps:$4 sm:$0xff]  }
 0x149   : > { %6779 = vmatpush1.bf16.msra.mxu0 %v9663_v12  ;;  %7435 = vmatpush1.bf16.msra.mxu1 %v9666_v14  ;;  %v9755_v12 = vld [vmem:[%s11147_s8 + $0x964] ss:$16 sps:$4 sm:$0xff]   ;;  %v9758_v14 = vld [vmem:[%s11147_s8 + $0x96c] ss:$16 sps:$4 sm:$0xff]  }
 0x14a   : > { %6780 = vmatprep.subr.bf16.mxu0 %v9671_v16  ;;  %7436 = vmatprep.subr.bf16.mxu1 %v9674_v52  ;;  %v9753_v16 = vld [vmem:[%s11147_s8 + $0x960] ss:$16 sps:$4 sm:$0xff]   ;;  %v9756_v52 = vld [vmem:[%s11147_s8 + $0x968] ss:$16 sps:$4 sm:$0xff]  }
 0x14d   : > { %6781 = vmatpush1.bf16.msra.mxu0 %v9669_v17  ;;  %7437 = vmatpush1.bf16.msra.mxu1 %v9672_v18  ;;  %v9761_v17 = vld [vmem:[%s11147_s8 + $0x984] ss:$16 sps:$4 sm:$0xff]   ;;  %v9764_v18 = vld [vmem:[%s11147_s8 + $0x98c] ss:$16 sps:$4 sm:$0xff]  }
 0x14e   : > { %6782 = vmatprep.subr.bf16.mxu0 %v9677_v19  ;;  %7438 = vmatprep.subr.bf16.mxu1 %v9680_v20  ;;  %v9759_v19 = vld [vmem:[%s11147_s8 + $0x980] ss:$16 sps:$4 sm:$0xff]   ;;  %v9762_v20 = vld [vmem:[%s11147_s8 + $0x988] ss:$16 sps:$4 sm:$0xff]  }
 0x151   : > { %6783 = vmatpush1.bf16.msra.mxu0 %v9675_v22  ;;  %7439 = vmatpush1.bf16.msra.mxu1 %v9678_v23  ;;  %v9767_v22 = vld [vmem:[%s11147_s8 + $0x9a4] ss:$16 sps:$4 sm:$0xff]   ;;  %v9770_v23 = vld [vmem:[%s11147_s8 + $0x9ac] ss:$16 sps:$4 sm:$0xff]  }
 0x152   : > { %6784 = vmatprep.subr.bf16.mxu0 %v9683_v24  ;;  %7440 = vmatprep.subr.bf16.mxu1 %v9686_v26  ;;  %v9765_v24 = vld [vmem:[%s11147_s8 + $0x9a0] ss:$16 sps:$4 sm:$0xff]   ;;  %v9768_v26 = vld [vmem:[%s11147_s8 + $0x9a8] ss:$16 sps:$4 sm:$0xff]  }
 0x155   : > { %6785 = vmatpush1.bf16.msra.mxu0 %v9681_v27  ;;  %7441 = vmatpush1.bf16.msra.mxu1 %v9684_v28  ;;  %v9773_v27 = vld [vmem:[%s11147_s8 + $0x9c4] ss:$16 sps:$4 sm:$0xff]   ;;  %v9776_v28 = vld [vmem:[%s11147_s8 + $0x9cc] ss:$16 sps:$4 sm:$0xff]  }
 0x156   : > { %6795 = vmatprep.subr.bf16.mxu0 %v9689_v29  ;;  %7451 = vmatprep.subr.bf16.mxu1 %v9692_v30  ;;  %v9771_v29 = vld [vmem:[%s11147_s8 + $0x9c0] ss:$16 sps:$4 sm:$0xff]   ;;  %v9774_v30 = vld [vmem:[%s11147_s8 + $0x9c8] ss:$16 sps:$4 sm:$0xff]  }
 0x158   : > { %6787 = vmatmul.mubr.bf16.vlgmr.msra.gmra.mrb[0].mxu0 %v1329_v31  ;;  %7443 = vmatmul.mubr.bf16.vlgmr.msra.gmra.mrb[0].mxu1 %v1329_v31  ;;  %v9782_v31 = vld [vmem:[%s11147_s8 + $0x9ec] ss:$16 sps:$4 sm:$0xff]  }
 0x159   : > { %6796 = vmatpush1.bf16.msra.mxu0 %v9687_v32  ;;  %7452 = vmatpush1.bf16.msra.mxu1 %v9690_v33  ;;  %v9777_v32 = vld [vmem:[%s11147_s8 + $0x9e0] ss:$16 sps:$4 sm:$0xff]   ;;  %v9780_v33 = vld [vmem:[%s11147_s8 + $0x9e8] ss:$16 sps:$4 sm:$0xff]  }
 0x15a   : > { %6797 = vmatprep.subr.bf16.mxu0 %v9695_v25  ;;  %7453 = vmatprep.subr.bf16.mxu1 %v9698_v34  ;;  %v9785_v25 = vld [vmem:[%s11147_s8 + $0xa04] ss:$16 sps:$4 sm:$0xff]   ;;  %v9788_v34 = vld [vmem:[%s11147_s8 + $0xa0c] ss:$16 sps:$4 sm:$0xff]  }
 0x15b   : > { %6827 = vmatprep.mubr.bf16.mxu0 %v11473_v35  ;;  %7483 = vmatprep.mubr.bf16.mxu1 %v11473_v35 }
 0x15d   : > { %6798 = vmatpush1.bf16.msra.mxu0 %v9693_v13  ;;  %7454 = vmatpush1.bf16.msra.mxu1 %v9696_v36  ;;  %v11539_v13 = vrot.slane %v11454_v21, %v11208_v49  ;;  %v9783_v36 = vld [vmem:[%s11147_s8 + $0xa00] ss:$16 sps:$4 sm:$0xff]  }
 0x15e   : > { %6799 = vmatprep.subr.bf16.mxu0 %v9701_v37  ;;  %7455 = vmatprep.subr.bf16.mxu1 %v9704_v38  ;;  %v9786_v37 = vld [vmem:[%s11147_s8 + $0xa08] ss:$16 sps:$4 sm:$0xff]   ;;  %v9791_v38 = vld [vmem:[%s11147_s8 + $0xa24] ss:$16 sps:$4 sm:$0xff]   ;;  %v9789_v21 = vld [vmem:[%s11147_s8 + $0xa20] ss:$16 sps:$4 sm:$0xff]  }
 0x161   : > { %6800 = vmatpush1.bf16.msra.mxu0 %v9699_v39  ;;  %7456 = vmatpush1.bf16.msra.mxu1 %v9702_v40  ;;  %v9794_v39 = vld [vmem:[%s11147_s8 + $0xa2c] ss:$16 sps:$4 sm:$0xff]   ;;  %v1379_v40 = vcombine.high %v11473_v35, %v11473_v35  ;;  %v9795_v35 = vld [vmem:[%s11147_s8 + $0xa40] ss:$16 sps:$4 sm:$0xff]  }
 0x162   : > { %6801 = vmatprep.subr.bf16.mxu0 %v9707_v41  ;;  %7457 = vmatprep.subr.bf16.mxu1 %v9710_v43  ;;  %v9792_v41 = vld [vmem:[%s11147_s8 + $0xa28] ss:$16 sps:$4 sm:$0xff]   ;;  %v9797_v43 = vld [vmem:[%s11147_s8 + $0xa44] ss:$16 sps:$4 sm:$0xff]  }
 0x165   : > { %6802 = vmatpush1.bf16.msra.mxu0 %v9705_v44  ;;  %7458 = vmatpush1.bf16.msra.mxu1 %v9708_v45  ;;  %v9800_v44 = vld [vmem:[%s11147_s8 + $0xa4c] ss:$16 sps:$4 sm:$0xff]   ;;  %v9798_v45 = vld [vmem:[%s11147_s8 + $0xa48] ss:$16 sps:$4 sm:$0xff]  }
 0x166   : > { %6803 = vmatprep.subr.bf16.mxu0 %v9713_v46  ;;  %7459 = vmatprep.subr.bf16.mxu1 %v9716_v47  ;;  %v9803_v46 = vld [vmem:[%s11147_s8 + $0xa64] ss:$16 sps:$4 sm:$0xff]   ;;  %v9806_v47 = vld [vmem:[%s11147_s8 + $0xa6c] ss:$16 sps:$4 sm:$0xff]  }
 0x169   : > { %6804 = vmatpush1.bf16.msra.mxu0 %v9711_v48  ;;  %7460 = vmatpush1.bf16.msra.mxu1 %v9714_v50  ;;  %v9801_v48 = vld [vmem:[%s11147_s8 + $0xa60] ss:$16 sps:$4 sm:$0xff]   ;;  %v9804_v50 = vld [vmem:[%s11147_s8 + $0xa68] ss:$16 sps:$4 sm:$0xff]  }
 0x16a   : > { %6805 = vmatprep.subr.bf16.mxu0 %v9719_v51  ;;  %7461 = vmatprep.subr.bf16.mxu1 %v9722_v53  ;;  %v9809_v51 = vld [vmem:[%s11147_s8 + $0xa84] ss:$16 sps:$4 sm:$0xff]   ;;  %v9812_v53 = vld [vmem:[%s11147_s8 + $0xa8c] ss:$16 sps:$4 sm:$0xff]  }
 0x16d   : > { %6806 = vmatpush1.bf16.msra.mxu0 %v9717_v54  ;;  %7462 = vmatpush1.bf16.msra.mxu1 %v9720_v55  ;;  %v9807_v54 = vld [vmem:[%s11147_s8 + $0xa80] ss:$16 sps:$4 sm:$0xff]   ;;  %v9810_v55 = vld [vmem:[%s11147_s8 + $0xa88] ss:$16 sps:$4 sm:$0xff]  }
 0x16e   : > { %6807 = vmatprep.subr.bf16.mxu0 %v9725_v56  ;;  %7463 = vmatprep.subr.bf16.mxu1 %v9728_v57  ;;  %v9815_v56 = vld [vmem:[%s11147_s8 + $0xaa4] ss:$16 sps:$4 sm:$0xff]   ;;  %v9818_v57 = vld [vmem:[%s11147_s8 + $0xaac] ss:$16 sps:$4 sm:$0xff]  }
 0x171   : > { %6808 = vmatpush1.bf16.msra.mxu0 %v9723_v58  ;;  %7464 = vmatpush1.bf16.msra.mxu1 %v9726_v59  ;;  %v9813_v58 = vld [vmem:[%s11147_s8 + $0xaa0] ss:$16 sps:$4 sm:$0xff]   ;;  %v9816_v59 = vld [vmem:[%s11147_s8 + $0xaa8] ss:$16 sps:$4 sm:$0xff]  }
 0x172   : > { %6809 = vmatprep.subr.bf16.mxu0 %v9731_v60  ;;  %7465 = vmatprep.subr.bf16.mxu1 %v9734_v61  ;;  %v9821_v60 = vld [vmem:[%s11147_s8 + $0xac4] ss:$16 sps:$4 sm:$0xff]   ;;  %v9824_v61 = vld [vmem:[%s11147_s8 + $0xacc] ss:$16 sps:$4 sm:$0xff]  }
 0x175   : > { %6810 = vmatpush1.bf16.msra.mxu0 %v9729_v62  ;;  %7466 = vmatpush1.bf16.msra.mxu1 %v9732_v63  ;;  %v9819_v62 = vld [vmem:[%s11147_s8 + $0xac0] ss:$16 sps:$4 sm:$0xff]   ;;  %v9822_v63 = vld [vmem:[%s11147_s8 + $0xac8] ss:$16 sps:$4 sm:$0xff]  }
 0x176   : > { %6811 = vmatprep.subr.bf16.mxu0 %v9737_v0  ;;  %7467 = vmatprep.subr.bf16.mxu1 %v9740_v1  ;;  %v9827_v0 = vld [vmem:[%s11147_s8 + $0xae4] ss:$16 sps:$4 sm:$0xff]   ;;  %v9830_v1 = vld [vmem:[%s11147_s8 + $0xaec] ss:$16 sps:$4 sm:$0xff]  }
 0x179   : > { %6812 = vmatpush1.bf16.msra.mxu0 %v9735_v2  ;;  %7468 = vmatpush1.bf16.msra.mxu1 %v9738_v3  ;;  %v9825_v2 = vld [vmem:[%s11147_s8 + $0xae0] ss:$16 sps:$4 sm:$0xff]   ;;  %v9828_v3 = vld [vmem:[%s11147_s8 + $0xae8] ss:$16 sps:$4 sm:$0xff]  }
 0x17a   : > { %6813 = vmatprep.subr.bf16.mxu0 %v9743_v4  ;;  %7469 = vmatprep.subr.bf16.mxu1 %v9746_v5  ;;  %v9833_v4 = vld [vmem:[%s11147_s8 + $0xb04] ss:$16 sps:$4 sm:$0xff]   ;;  %v9836_v5 = vld [vmem:[%s11147_s8 + $0xb0c] ss:$16 sps:$4 sm:$0xff]  }
 0x17d   : > { %6814 = vmatpush1.bf16.msra.mxu0 %v9741_v6  ;;  %7470 = vmatpush1.bf16.msra.mxu1 %v9744_v7  ;;  %v9831_v6 = vld [vmem:[%s11147_s8 + $0xb00] ss:$16 sps:$4 sm:$0xff]   ;;  %v9834_v7 = vld [vmem:[%s11147_s8 + $0xb08] ss:$16 sps:$4 sm:$0xff]  }
 0x17e   : > { %6815 = vmatprep.subr.bf16.mxu0 %v9749_v8  ;;  %7471 = vmatprep.subr.bf16.mxu1 %v9752_v9  ;;  %v9839_v8 = vld [vmem:[%s11147_s8 + $0xb24] ss:$16 sps:$4 sm:$0xff]   ;;  %v9842_v9 = vld [vmem:[%s11147_s8 + $0xb2c] ss:$16 sps:$4 sm:$0xff]  }
 0x181   : > { %6816 = vmatpush1.bf16.msra.mxu0 %v9747_v10  ;;  %7472 = vmatpush1.bf16.msra.mxu1 %v9750_v11  ;;  %v9837_v10 = vld [vmem:[%s11147_s8 + $0xb20] ss:$16 sps:$4 sm:$0xff]   ;;  %v9840_v11 = vld [vmem:[%s11147_s8 + $0xb28] ss:$16 sps:$4 sm:$0xff]  }
 0x182   : > { %6817 = vmatprep.subr.bf16.mxu0 %v9755_v12  ;;  %7473 = vmatprep.subr.bf16.mxu1 %v9758_v14  ;;  %v9845_v12 = vld [vmem:[%s11147_s8 + $0xb44] ss:$16 sps:$4 sm:$0xff]   ;;  %v9848_v14 = vld [vmem:[%s11147_s8 + $0xb4c] ss:$16 sps:$4 sm:$0xff]  }
 0x185   : > { %6818 = vmatpush1.bf16.msra.mxu0 %v9753_v16  ;;  %7474 = vmatpush1.bf16.msra.mxu1 %v9756_v52  ;;  %v9843_v16 = vld [vmem:[%s11147_s8 + $0xb40] ss:$16 sps:$4 sm:$0xff]   ;;  %v9846_v52 = vld [vmem:[%s11147_s8 + $0xb48] ss:$16 sps:$4 sm:$0xff]  }
 0x186   : > { %6819 = vmatprep.subr.bf16.mxu0 %v9761_v17  ;;  %7475 = vmatprep.subr.bf16.mxu1 %v9764_v18  ;;  %v9851_v17 = vld [vmem:[%s11147_s8 + $0xb64] ss:$16 sps:$4 sm:$0xff]   ;;  %v9854_v18 = vld [vmem:[%s11147_s8 + $0xb6c] ss:$16 sps:$4 sm:$0xff]  }
 0x189   : > { %6820 = vmatpush1.bf16.msra.mxu0 %v9759_v19  ;;  %7476 = vmatpush1.bf16.msra.mxu1 %v9762_v20  ;;  %v9849_v19 = vld [vmem:[%s11147_s8 + $0xb60] ss:$16 sps:$4 sm:$0xff]   ;;  %v9852_v20 = vld [vmem:[%s11147_s8 + $0xb68] ss:$16 sps:$4 sm:$0xff]  }
 0x18a   : > { %6821 = vmatprep.subr.bf16.mxu0 %v9767_v22  ;;  %7477 = vmatprep.subr.bf16.mxu1 %v9770_v23  ;;  %v9857_v22 = vld [vmem:[%s11147_s8 + $0xb84] ss:$16 sps:$4 sm:$0xff]   ;;  %v9860_v23 = vld [vmem:[%s11147_s8 + $0xb8c] ss:$16 sps:$4 sm:$0xff]  }
 0x18d   : > { %6822 = vmatpush1.bf16.msra.mxu0 %v9765_v24  ;;  %7478 = vmatpush1.bf16.msra.mxu1 %v9768_v26  ;;  %v9855_v24 = vld [vmem:[%s11147_s8 + $0xb80] ss:$16 sps:$4 sm:$0xff]   ;;  %v9858_v26 = vld [vmem:[%s11147_s8 + $0xb88] ss:$16 sps:$4 sm:$0xff]  }
 0x18e   : > { %6823 = vmatprep.subr.bf16.mxu0 %v9773_v27  ;;  %7479 = vmatprep.subr.bf16.mxu1 %v9776_v28  ;;  %v9863_v27 = vld [vmem:[%s11147_s8 + $0xba4] ss:$16 sps:$4 sm:$0xff]   ;;  %v9866_v28 = vld [vmem:[%s11147_s8 + $0xbac] ss:$16 sps:$4 sm:$0xff]  }
 0x191   : > { %6824 = vmatpush1.bf16.msra.mxu0 %v9771_v29  ;;  %7480 = vmatpush1.bf16.msra.mxu1 %v9774_v30  ;;  %v9861_v29 = vld [vmem:[%s11147_s8 + $0xba0] ss:$16 sps:$4 sm:$0xff]   ;;  %v9864_v30 = vld [vmem:[%s11147_s8 + $0xba8] ss:$16 sps:$4 sm:$0xff]  }
 0x192   : > { %6825 = vmatprep.subr.bf16.mxu0 %v9779_v15  ;;  %7481 = vmatprep.subr.bf16.mxu1 %v9782_v31  ;;  %v9869_v15 = vld [vmem:[%s11147_s8 + $0xbc4] ss:$16 sps:$4 sm:$0xff]   ;;  %v9872_v31 = vld [vmem:[%s11147_s8 + $0xbcc] ss:$16 sps:$4 sm:$0xff]  }
 0x195   : > { %6826 = vmatpush1.bf16.msra.mxu0 %v9777_v32  ;;  %7482 = vmatpush1.bf16.msra.mxu1 %v9780_v33  ;;  %v10842_v32 = vld [vmem:[%s12423_s0 + $0x8] sm:$0xff] }
 0x196   : > { %6836 = vmatprep.subr.bf16.mxu0 %v9785_v25  ;;  %7492 = vmatprep.subr.bf16.mxu1 %v9788_v34  ;;  %v1332_v33 = vcombine.high %v10842_v32, %v10842_v32  ;;  %v9867_v25 = vld [vmem:[%s11147_s8 + $0xbc0] ss:$16 sps:$4 sm:$0xff]   ;;  %v9870_v34 = vld [vmem:[%s11147_s8 + $0xbc8] ss:$16 sps:$4 sm:$0xff]  }
 0x197   : > { %v9951_v32 = vld [vmem:[%s11147_s8 + $0xd80] ss:$16 sps:$4 sm:$0xff]  }
 0x198   : > { %6828 = vmatmul.mubr.bf16.vlgmr.msra.gmra.mrb[0].mxu0 %v11539_v13  ;;  %7484 = vmatmul.mubr.bf16.vlgmr.msra.gmra.mrb[0].mxu1 %v11539_v13 }
 0x199   : > { %6837 = vmatpush1.bf16.msra.mxu0 %v9783_v36  ;;  %7493 = vmatpush1.bf16.msra.mxu1 %v9786_v37  ;;  %v9875_v36 = vld [vmem:[%s11147_s8 + $0xbe4] ss:$16 sps:$4 sm:$0xff]   ;;  %v9878_v37 = vld [vmem:[%s11147_s8 + $0xbec] ss:$16 sps:$4 sm:$0xff]  }
 0x19a   : > { %6838 = vmatprep.subr.bf16.mxu0 %v9791_v38  ;;  %7494 = vmatprep.subr.bf16.mxu1 %v9794_v39  ;;  %v11609_v38 = vrot.slane %v1332_v33, %v11208_v49  ;;  %v9873_v39 = vld [vmem:[%s11147_s8 + $0xbe0] ss:$16 sps:$4 sm:$0xff]   ;;  %v9954_v33 = vld [vmem:[%s11147_s8 + $0xd88] ss:$16 sps:$4 sm:$0xff]  }
 0x19b   : > { %6868 = vmatprep.mubr.bf16.mxu0 %v1379_v40  ;;  %7524 = vmatprep.mubr.bf16.mxu1 %v1379_v40  ;;  %v9876_v40 = vld [vmem:[%s11147_s8 + $0xbe8] ss:$16 sps:$4 sm:$0xff]  }
 0x19d   : > { %6839 = vmatpush1.bf16.msra.mxu0 %v9789_v21  ;;  %7495 = vmatpush1.bf16.msra.mxu1 %v9792_v41  ;;  %v9881_v21 = vld [vmem:[%s11147_s8 + $0xc04] ss:$16 sps:$4 sm:$0xff]   ;;  %v9884_v41 = vld [vmem:[%s11147_s8 + $0xc0c] ss:$16 sps:$4 sm:$0xff]  }
 0x19e   : > { %6840 = vmatprep.subr.bf16.mxu0 %v9797_v43  ;;  %7496 = vmatprep.subr.bf16.mxu1 %v9800_v44  ;;  %v1348_v43 = vcombine.high %v11609_v38, %v11609_v38  ;;  %v1377_v44 = vcombine.high %v11539_v13, %v11539_v13  ;;  %v9885_v13 = vld [vmem:[%s11147_s8 + $0xc20] ss:$16 sps:$4 sm:$0xff]  }
 0x1a1   : > { %6841 = vmatpush1.bf16.msra.mxu0 %v9795_v35  ;;  %7497 = vmatpush1.bf16.msra.mxu1 %v9798_v45  ;;  %v9879_v35 = vld [vmem:[%s11147_s8 + $0xc00] ss:$16 sps:$4 sm:$0xff]   ;;  %v9882_v45 = vld [vmem:[%s11147_s8 + $0xc08] ss:$16 sps:$4 sm:$0xff]  }
 0x1a2   : > { %6842 = vmatprep.subr.bf16.mxu0 %v9803_v46  ;;  %7498 = vmatprep.subr.bf16.mxu1 %v9806_v47  ;;  %v9887_v46 = vld [vmem:[%s11147_s8 + $0xc24] ss:$16 sps:$4 sm:$0xff]   ;;  %v9890_v47 = vld [vmem:[%s11147_s8 + $0xc2c] ss:$16 sps:$4 sm:$0xff]  }
 0x1a5   : > { %6843 = vmatpush1.bf16.msra.mxu0 %v9801_v48  ;;  %7499 = vmatpush1.bf16.msra.mxu1 %v9804_v50  ;;  %v11624_v48 = vrot.slane %v1348_v43, %v11208_v49  ;;  %v9888_v50 = vld [vmem:[%s11147_s8 + $0xc28] ss:$16 sps:$4 sm:$0xff]   ;;  %v9971_v43 = vld [vmem:[%s11147_s8 + $0xde4] ss:$16 sps:$4 sm:$0xff]  }
 0x1a6   : > { %6844 = vmatprep.subr.bf16.mxu0 %v9809_v51  ;;  %7500 = vmatprep.subr.bf16.mxu1 %v9812_v53  ;;  %v9893_v51 = vld [vmem:[%s11147_s8 + $0xc44] ss:$16 sps:$4 sm:$0xff]   ;;  %v9896_v53 = vld [vmem:[%s11147_s8 + $0xc4c] ss:$16 sps:$4 sm:$0xff]  }
 0x1a9   : > { %6845 = vmatpush1.bf16.msra.mxu0 %v9807_v54  ;;  %7501 = vmatpush1.bf16.msra.mxu1 %v9810_v55  ;;  %v9891_v54 = vld [vmem:[%s11147_s8 + $0xc40] ss:$16 sps:$4 sm:$0xff]   ;;  %v9894_v55 = vld [vmem:[%s11147_s8 + $0xc48] ss:$16 sps:$4 sm:$0xff]  }
 0x1aa   : > { %6846 = vmatprep.subr.bf16.mxu0 %v9815_v56  ;;  %7502 = vmatprep.subr.bf16.mxu1 %v9818_v57  ;;  %v9899_v56 = vld [vmem:[%s11147_s8 + $0xc64] ss:$16 sps:$4 sm:$0xff]   ;;  %v9902_v57 = vld [vmem:[%s11147_s8 + $0xc6c] ss:$16 sps:$4 sm:$0xff]  }
 0x1ad   : > { %6847 = vmatpush1.bf16.msra.mxu0 %v9813_v58  ;;  %7503 = vmatpush1.bf16.msra.mxu1 %v9816_v59  ;;  %v9897_v58 = vld [vmem:[%s11147_s8 + $0xc60] ss:$16 sps:$4 sm:$0xff]   ;;  %v9900_v59 = vld [vmem:[%s11147_s8 + $0xc68] ss:$16 sps:$4 sm:$0xff]  }
 0x1ae   : > { %6848 = vmatprep.subr.bf16.mxu0 %v9821_v60  ;;  %7504 = vmatprep.subr.bf16.mxu1 %v9824_v61  ;;  %v9905_v60 = vld [vmem:[%s11147_s8 + $0xc84] ss:$16 sps:$4 sm:$0xff]   ;;  %v9908_v61 = vld [vmem:[%s11147_s8 + $0xc8c] ss:$16 sps:$4 sm:$0xff]  }
 0x1b1   : > { %6849 = vmatpush1.bf16.msra.mxu0 %v9819_v62  ;;  %7505 = vmatpush1.bf16.msra.mxu1 %v9822_v63  ;;  %v9903_v62 = vld [vmem:[%s11147_s8 + $0xc80] ss:$16 sps:$4 sm:$0xff]   ;;  %v9906_v63 = vld [vmem:[%s11147_s8 + $0xc88] ss:$16 sps:$4 sm:$0xff]  }
 0x1b2   : > { %6850 = vmatprep.subr.bf16.mxu0 %v9827_v0  ;;  %7506 = vmatprep.subr.bf16.mxu1 %v9830_v1  ;;  %v9911_v0 = vld [vmem:[%s11147_s8 + $0xca4] ss:$16 sps:$4 sm:$0xff]   ;;  %v9914_v1 = vld [vmem:[%s11147_s8 + $0xcac] ss:$16 sps:$4 sm:$0xff]  }
 0x1b5   : > { %6851 = vmatpush1.bf16.msra.mxu0 %v9825_v2  ;;  %7507 = vmatpush1.bf16.msra.mxu1 %v9828_v3  ;;  %v9909_v2 = vld [vmem:[%s11147_s8 + $0xca0] ss:$16 sps:$4 sm:$0xff]   ;;  %v9912_v3 = vld [vmem:[%s11147_s8 + $0xca8] ss:$16 sps:$4 sm:$0xff]  }
 0x1b6   : > { %6852 = vmatprep.subr.bf16.mxu0 %v9833_v4  ;;  %7508 = vmatprep.subr.bf16.mxu1 %v9836_v5  ;;  %v9917_v4 = vld [vmem:[%s11147_s8 + $0xcc4] ss:$16 sps:$4 sm:$0xff]   ;;  %v9920_v5 = vld [vmem:[%s11147_s8 + $0xccc] ss:$16 sps:$4 sm:$0xff]  }
 0x1b9   : > { %6853 = vmatpush1.bf16.msra.mxu0 %v9831_v6  ;;  %7509 = vmatpush1.bf16.msra.mxu1 %v9834_v7  ;;  %v9915_v6 = vld [vmem:[%s11147_s8 + $0xcc0] ss:$16 sps:$4 sm:$0xff]   ;;  %v9918_v7 = vld [vmem:[%s11147_s8 + $0xcc8] ss:$16 sps:$4 sm:$0xff]  }
 0x1ba   : > { %6854 = vmatprep.subr.bf16.mxu0 %v9839_v8  ;;  %7510 = vmatprep.subr.bf16.mxu1 %v9842_v9  ;;  %v9923_v8 = vld [vmem:[%s11147_s8 + $0xce4] ss:$16 sps:$4 sm:$0xff]   ;;  %v9926_v9 = vld [vmem:[%s11147_s8 + $0xcec] ss:$16 sps:$4 sm:$0xff]  }
 0x1bd   : > { %6855 = vmatpush1.bf16.msra.mxu0 %v9837_v10  ;;  %7511 = vmatpush1.bf16.msra.mxu1 %v9840_v11  ;;  %v9921_v10 = vld [vmem:[%s11147_s8 + $0xce0] ss:$16 sps:$4 sm:$0xff]   ;;  %v9924_v11 = vld [vmem:[%s11147_s8 + $0xce8] ss:$16 sps:$4 sm:$0xff]  }
 0x1be   : > { %6856 = vmatprep.subr.bf16.mxu0 %v9845_v12  ;;  %7512 = vmatprep.subr.bf16.mxu1 %v9848_v14  ;;  %v9929_v12 = vld [vmem:[%s11147_s8 + $0xd04] ss:$16 sps:$4 sm:$0xff]   ;;  %v9932_v14 = vld [vmem:[%s11147_s8 + $0xd0c] ss:$16 sps:$4 sm:$0xff]  }
 0x1c1   : > { %6857 = vmatpush1.bf16.msra.mxu0 %v9843_v16  ;;  %7513 = vmatpush1.bf16.msra.mxu1 %v9846_v52  ;;  %v9927_v16 = vld [vmem:[%s11147_s8 + $0xd00] ss:$16 sps:$4 sm:$0xff]   ;;  %v9930_v52 = vld [vmem:[%s11147_s8 + $0xd08] ss:$16 sps:$4 sm:$0xff]  }
 0x1c2   : > { %6858 = vmatprep.subr.bf16.mxu0 %v9851_v17  ;;  %7514 = vmatprep.subr.bf16.mxu1 %v9854_v18  ;;  %v9935_v17 = vld [vmem:[%s11147_s8 + $0xd24] ss:$16 sps:$4 sm:$0xff]   ;;  %v9938_v18 = vld [vmem:[%s11147_s8 + $0xd2c] ss:$16 sps:$4 sm:$0xff]  }
 0x1c5   : > { %6859 = vmatpush1.bf16.msra.mxu0 %v9849_v19  ;;  %7515 = vmatpush1.bf16.msra.mxu1 %v9852_v20  ;;  %v9933_v19 = vld [vmem:[%s11147_s8 + $0xd20] ss:$16 sps:$4 sm:$0xff]   ;;  %v9936_v20 = vld [vmem:[%s11147_s8 + $0xd28] ss:$16 sps:$4 sm:$0xff]  }
 0x1c6   : > { %6860 = vmatprep.subr.bf16.mxu0 %v9857_v22  ;;  %7516 = vmatprep.subr.bf16.mxu1 %v9860_v23  ;;  %v9941_v22 = vld [vmem:[%s11147_s8 + $0xd44] ss:$16 sps:$4 sm:$0xff]   ;;  %v9944_v23 = vld [vmem:[%s11147_s8 + $0xd4c] ss:$16 sps:$4 sm:$0xff]  }
 0x1c9   : > { %6861 = vmatpush1.bf16.msra.mxu0 %v9855_v24  ;;  %7517 = vmatpush1.bf16.msra.mxu1 %v9858_v26  ;;  %v9939_v24 = vld [vmem:[%s11147_s8 + $0xd40] ss:$16 sps:$4 sm:$0xff]   ;;  %v9942_v26 = vld [vmem:[%s11147_s8 + $0xd48] ss:$16 sps:$4 sm:$0xff]  }
 0x1ca   : > { %6862 = vmatprep.subr.bf16.mxu0 %v9863_v27  ;;  %7518 = vmatprep.subr.bf16.mxu1 %v9866_v28  ;;  %v9947_v27 = vld [vmem:[%s11147_s8 + $0xd64] ss:$16 sps:$4 sm:$0xff]   ;;  %v9950_v28 = vld [vmem:[%s11147_s8 + $0xd6c] ss:$16 sps:$4 sm:$0xff]  }
 0x1cd   : > { %6863 = vmatpush1.bf16.msra.mxu0 %v9861_v29  ;;  %7519 = vmatpush1.bf16.msra.mxu1 %v9864_v30  ;;  %v9945_v29 = vld [vmem:[%s11147_s8 + $0xd60] ss:$16 sps:$4 sm:$0xff]   ;;  %v9948_v30 = vld [vmem:[%s11147_s8 + $0xd68] ss:$16 sps:$4 sm:$0xff]  }
 0x1ce   : > { %6864 = vmatprep.subr.bf16.mxu0 %v9869_v15  ;;  %7520 = vmatprep.subr.bf16.mxu1 %v9872_v31  ;;  %v9953_v15 = vld [vmem:[%s11147_s8 + $0xd84] ss:$16 sps:$4 sm:$0xff]   ;;  %v9956_v31 = vld [vmem:[%s11147_s8 + $0xd8c] ss:$16 sps:$4 sm:$0xff]  }
 0x1d1   : > { %6865 = vmatpush1.bf16.msra.mxu0 %v9867_v25  ;;  %7521 = vmatpush1.bf16.msra.mxu1 %v9870_v34  ;;  %v9959_v25 = vld [vmem:[%s11147_s8 + $0xda4] ss:$16 sps:$4 sm:$0xff]   ;;  %v9962_v34 = vld [vmem:[%s11147_s8 + $0xdac] ss:$16 sps:$4 sm:$0xff]  }
 0x1d2   : > { %6866 = vmatprep.subr.bf16.mxu0 %v9875_v36  ;;  %7522 = vmatprep.subr.bf16.mxu1 %v9878_v37  ;;  %v9957_v36 = vld [vmem:[%s11147_s8 + $0xda0] ss:$16 sps:$4 sm:$0xff]   ;;  %v9960_v37 = vld [vmem:[%s11147_s8 + $0xda8] ss:$16 sps:$4 sm:$0xff]  }
 0x1d5   : > { %6867 = vmatpush1.bf16.msra.mxu0 %v9873_v39  ;;  %7523 = vmatpush1.bf16.msra.mxu1 %v9876_v40  ;;  %v9965_v39 = vld [vmem:[%s11147_s8 + $0xdc4] ss:$16 sps:$4 sm:$0xff]   ;;  %v9968_v40 = vld [vmem:[%s11147_s8 + $0xdcc] ss:$16 sps:$4 sm:$0xff]  }
 0x1d6   : > { %6877 = vmatprep.subr.bf16.mxu0 %v9881_v21  ;;  %7533 = vmatprep.subr.bf16.mxu1 %v9884_v41  ;;  %v9963_v21 = vld [vmem:[%s11147_s8 + $0xdc0] ss:$16 sps:$4 sm:$0xff]   ;;  %v9966_v41 = vld [vmem:[%s11147_s8 + $0xdc8] ss:$16 sps:$4 sm:$0xff]  }
 0x1d8   : > { %6869 = vmatmul.mubr.bf16.vlgmr.msra.gmra.mrb[0].mxu0 %v1377_v44  ;;  %7525 = vmatmul.mubr.bf16.vlgmr.msra.gmra.mrb[0].mxu1 %v1377_v44  ;;  %v9974_v44 = vld [vmem:[%s11147_s8 + $0xdec] ss:$16 sps:$4 sm:$0xff]  }
 0x1d9   : > { %6878 = vmatpush1.bf16.msra.mxu0 %v9879_v35  ;;  %7534 = vmatpush1.bf16.msra.mxu1 %v9882_v45  ;;  %v9969_v35 = vld [vmem:[%s11147_s8 + $0xde0] ss:$16 sps:$4 sm:$0xff]   ;;  %v9972_v45 = vld [vmem:[%s11147_s8 + $0xde8] ss:$16 sps:$4 sm:$0xff]  }
 0x1da   : > { %6879 = vmatprep.subr.bf16.mxu0 %v9887_v46  ;;  %7535 = vmatprep.subr.bf16.mxu1 %v9890_v47  ;;  %v9978_v46 = vld [vmem:[%s11147_s8 + $0xe04] ss:$16 sps:$4 sm:$0xff]   ;;  %v9981_v47 = vld [vmem:[%s11147_s8 + $0xe0c] ss:$16 sps:$4 sm:$0xff]  }
 0x1db   : > { %6909 = vmatprep.mubr.bf16.mxu0 %v11624_v48  ;;  %7565 = vmatprep.mubr.bf16.mxu1 %v11624_v48 }
 0x1dd   : > { %6880 = vmatpush1.bf16.msra.mxu0 %v9885_v13  ;;  %7536 = vmatpush1.bf16.msra.mxu1 %v9888_v50  ;;  %v11690_v13 = vrot.slane %v11609_v38, %v11208_v49  ;;  %v9976_v50 = vld [vmem:[%s11147_s8 + $0xe00] ss:$16 sps:$4 sm:$0xff]  }
 0x1de   : > { %6881 = vmatprep.subr.bf16.mxu0 %v9893_v51  ;;  %7537 = vmatprep.subr.bf16.mxu1 %v9896_v53  ;;  %v9979_v51 = vld [vmem:[%s11147_s8 + $0xe08] ss:$16 sps:$4 sm:$0xff]   ;;  %v9984_v53 = vld [vmem:[%s11147_s8 + $0xe24] ss:$16 sps:$4 sm:$0xff]   ;;  %v9982_v38 = vld [vmem:[%s11147_s8 + $0xe20] ss:$16 sps:$4 sm:$0xff]  }
 0x1e1   : > { %6882 = vmatpush1.bf16.msra.mxu0 %v9891_v54  ;;  %7538 = vmatpush1.bf16.msra.mxu1 %v9894_v55  ;;  %v9987_v54 = vld [vmem:[%s11147_s8 + $0xe2c] ss:$16 sps:$4 sm:$0xff]   ;;  %v1380_v55 = vcombine.high %v11624_v48, %v11624_v48  ;;  %v9988_v48 = vld [vmem:[%s11147_s8 + $0xe40] ss:$16 sps:$4 sm:$0xff]  }
 0x1e2   : > { %6883 = vmatprep.subr.bf16.mxu0 %v9899_v56  ;;  %7539 = vmatprep.subr.bf16.mxu1 %v9902_v57  ;;  %v9985_v56 = vld [vmem:[%s11147_s8 + $0xe28] ss:$16 sps:$4 sm:$0xff]   ;;  %v9990_v57 = vld [vmem:[%s11147_s8 + $0xe44] ss:$16 sps:$4 sm:$0xff]  }
 0x1e5   : > { %6884 = vmatpush1.bf16.msra.mxu0 %v9897_v58  ;;  %7540 = vmatpush1.bf16.msra.mxu1 %v9900_v59  ;;  %v9993_v58 = vld [vmem:[%s11147_s8 + $0xe4c] ss:$16 sps:$4 sm:$0xff]   ;;  %v9991_v59 = vld [vmem:[%s11147_s8 + $0xe48] ss:$16 sps:$4 sm:$0xff]  }
 0x1e6   : > { %6885 = vmatprep.subr.bf16.mxu0 %v9905_v60  ;;  %7541 = vmatprep.subr.bf16.mxu1 %v9908_v61  ;;  %v9996_v60 = vld [vmem:[%s11147_s8 + $0xe64] ss:$16 sps:$4 sm:$0xff]   ;;  %v9999_v61 = vld [vmem:[%s11147_s8 + $0xe6c] ss:$16 sps:$4 sm:$0xff]  }
 0x1e9   : > { %6886 = vmatpush1.bf16.msra.mxu0 %v9903_v62  ;;  %7542 = vmatpush1.bf16.msra.mxu1 %v9906_v63  ;;  %v9994_v62 = vld [vmem:[%s11147_s8 + $0xe60] ss:$16 sps:$4 sm:$0xff]   ;;  %v9997_v63 = vld [vmem:[%s11147_s8 + $0xe68] ss:$16 sps:$4 sm:$0xff]  }
 0x1ea   : > { %6887 = vmatprep.subr.bf16.mxu0 %v9911_v0  ;;  %7543 = vmatprep.subr.bf16.mxu1 %v9914_v1  ;;  %v10002_v0 = vld [vmem:[%s11147_s8 + $0xe84] ss:$16 sps:$4 sm:$0xff]   ;;  %v10005_v1 = vld [vmem:[%s11147_s8 + $0xe8c] ss:$16 sps:$4 sm:$0xff]  }
 0x1ed   : > { %6888 = vmatpush1.bf16.msra.mxu0 %v9909_v2  ;;  %7544 = vmatpush1.bf16.msra.mxu1 %v9912_v3  ;;  %v10000_v2 = vld [vmem:[%s11147_s8 + $0xe80] ss:$16 sps:$4 sm:$0xff]   ;;  %v10003_v3 = vld [vmem:[%s11147_s8 + $0xe88] ss:$16 sps:$4 sm:$0xff]  }
 0x1ee   : > { %6889 = vmatprep.subr.bf16.mxu0 %v9917_v4  ;;  %7545 = vmatprep.subr.bf16.mxu1 %v9920_v5  ;;  %v10008_v4 = vld [vmem:[%s11147_s8 + $0xea4] ss:$16 sps:$4 sm:$0xff]   ;;  %v10011_v5 = vld [vmem:[%s11147_s8 + $0xeac] ss:$16 sps:$4 sm:$0xff]  }
 0x1f1   : > { %6890 = vmatpush1.bf16.msra.mxu0 %v9915_v6  ;;  %7546 = vmatpush1.bf16.msra.mxu1 %v9918_v7  ;;  %v10006_v6 = vld [vmem:[%s11147_s8 + $0xea0] ss:$16 sps:$4 sm:$0xff]   ;;  %v10009_v7 = vld [vmem:[%s11147_s8 + $0xea8] ss:$16 sps:$4 sm:$0xff]  }
 0x1f2   : > { %6891 = vmatprep.subr.bf16.mxu0 %v9923_v8  ;;  %7547 = vmatprep.subr.bf16.mxu1 %v9926_v9  ;;  %v10014_v8 = vld [vmem:[%s11147_s8 + $0xec4] ss:$16 sps:$4 sm:$0xff]   ;;  %v10017_v9 = vld [vmem:[%s11147_s8 + $0xecc] ss:$16 sps:$4 sm:$0xff]  }
 0x1f5   : > { %6892 = vmatpush1.bf16.msra.mxu0 %v9921_v10  ;;  %7548 = vmatpush1.bf16.msra.mxu1 %v9924_v11  ;;  %v10012_v10 = vld [vmem:[%s11147_s8 + $0xec0] ss:$16 sps:$4 sm:$0xff]   ;;  %v10015_v11 = vld [vmem:[%s11147_s8 + $0xec8] ss:$16 sps:$4 sm:$0xff]  }
 0x1f6   : > { %6893 = vmatprep.subr.bf16.mxu0 %v9929_v12  ;;  %7549 = vmatprep.subr.bf16.mxu1 %v9932_v14  ;;  %v10020_v12 = vld [vmem:[%s11147_s8 + $0xee4] ss:$16 sps:$4 sm:$0xff]   ;;  %v10023_v14 = vld [vmem:[%s11147_s8 + $0xeec] ss:$16 sps:$4 sm:$0xff]  }
 0x1f9   : > { %6894 = vmatpush1.bf16.msra.mxu0 %v9927_v16  ;;  %7550 = vmatpush1.bf16.msra.mxu1 %v9930_v52  ;;  %v10018_v16 = vld [vmem:[%s11147_s8 + $0xee0] ss:$16 sps:$4 sm:$0xff]   ;;  %v10021_v52 = vld [vmem:[%s11147_s8 + $0xee8] ss:$16 sps:$4 sm:$0xff]  }
 0x1fa   : > { %6895 = vmatprep.subr.bf16.mxu0 %v9935_v17  ;;  %7551 = vmatprep.subr.bf16.mxu1 %v9938_v18  ;;  %v10026_v17 = vld [vmem:[%s11147_s8 + $0xf04] ss:$16 sps:$4 sm:$0xff]   ;;  %v10029_v18 = vld [vmem:[%s11147_s8 + $0xf0c] ss:$16 sps:$4 sm:$0xff]  }
 0x1fd   : > { %6896 = vmatpush1.bf16.msra.mxu0 %v9933_v19  ;;  %7552 = vmatpush1.bf16.msra.mxu1 %v9936_v20  ;;  %v10024_v19 = vld [vmem:[%s11147_s8 + $0xf00] ss:$16 sps:$4 sm:$0xff]   ;;  %v10027_v20 = vld [vmem:[%s11147_s8 + $0xf08] ss:$16 sps:$4 sm:$0xff]  }
 0x1fe   : > { %6897 = vmatprep.subr.bf16.mxu0 %v9941_v22  ;;  %7553 = vmatprep.subr.bf16.mxu1 %v9944_v23  ;;  %v10032_v22 = vld [vmem:[%s11147_s8 + $0xf24] ss:$16 sps:$4 sm:$0xff]   ;;  %v10035_v23 = vld [vmem:[%s11147_s8 + $0xf2c] ss:$16 sps:$4 sm:$0xff]  }
 0x201   : > { %6898 = vmatpush1.bf16.msra.mxu0 %v9939_v24  ;;  %7554 = vmatpush1.bf16.msra.mxu1 %v9942_v26  ;;  %v10030_v24 = vld [vmem:[%s11147_s8 + $0xf20] ss:$16 sps:$4 sm:$0xff]   ;;  %v10033_v26 = vld [vmem:[%s11147_s8 + $0xf28] ss:$16 sps:$4 sm:$0xff]  }
 0x202   : > { %6899 = vmatprep.subr.bf16.mxu0 %v9947_v27  ;;  %7555 = vmatprep.subr.bf16.mxu1 %v9950_v28  ;;  %v10038_v27 = vld [vmem:[%s11147_s8 + $0xf44] ss:$16 sps:$4 sm:$0xff]   ;;  %v10041_v28 = vld [vmem:[%s11147_s8 + $0xf4c] ss:$16 sps:$4 sm:$0xff]  }
 0x205   : > { %6900 = vmatpush1.bf16.msra.mxu0 %v9945_v29  ;;  %7556 = vmatpush1.bf16.msra.mxu1 %v9948_v30  ;;  %v10036_v29 = vld [vmem:[%s11147_s8 + $0xf40] ss:$16 sps:$4 sm:$0xff]   ;;  %v10039_v30 = vld [vmem:[%s11147_s8 + $0xf48] ss:$16 sps:$4 sm:$0xff]  }
 0x206   : > { %6901 = vmatprep.subr.bf16.mxu0 %v9953_v15  ;;  %7557 = vmatprep.subr.bf16.mxu1 %v9956_v31  ;;  %v10044_v15 = vld [vmem:[%s11147_s8 + $0xf64] ss:$16 sps:$4 sm:$0xff]   ;;  %v10047_v31 = vld [vmem:[%s11147_s8 + $0xf6c] ss:$16 sps:$4 sm:$0xff]  }
 0x209   : > { %6902 = vmatpush1.bf16.msra.mxu0 %v9951_v32  ;;  %7558 = vmatpush1.bf16.msra.mxu1 %v9954_v33  ;;  %v10042_v32 = vld [vmem:[%s11147_s8 + $0xf60] ss:$16 sps:$4 sm:$0xff]   ;;  %v10045_v33 = vld [vmem:[%s11147_s8 + $0xf68] ss:$16 sps:$4 sm:$0xff]  }
 0x20a   : > { %6903 = vmatprep.subr.bf16.mxu0 %v9959_v25  ;;  %7559 = vmatprep.subr.bf16.mxu1 %v9962_v34  ;;  %v10050_v25 = vld [vmem:[%s11147_s8 + $0xf84] ss:$16 sps:$4 sm:$0xff]   ;;  %v10053_v34 = vld [vmem:[%s11147_s8 + $0xf8c] ss:$16 sps:$4 sm:$0xff]  }
 0x20d   : > { %6904 = vmatpush1.bf16.msra.mxu0 %v9957_v36  ;;  %7560 = vmatpush1.bf16.msra.mxu1 %v9960_v37  ;;  %v10048_v36 = vld [vmem:[%s11147_s8 + $0xf80] ss:$16 sps:$4 sm:$0xff]   ;;  %v10051_v37 = vld [vmem:[%s11147_s8 + $0xf88] ss:$16 sps:$4 sm:$0xff]  }
 0x20e   : > { %6905 = vmatprep.subr.bf16.mxu0 %v9965_v39  ;;  %7561 = vmatprep.subr.bf16.mxu1 %v9968_v40  ;;  %v10056_v39 = vld [vmem:[%s11147_s8 + $0xfa4] ss:$16 sps:$4 sm:$0xff]   ;;  %v10059_v40 = vld [vmem:[%s11147_s8 + $0xfac] ss:$16 sps:$4 sm:$0xff]  }
 0x211   : > { %6906 = vmatpush1.bf16.msra.mxu0 %v9963_v21  ;;  %7562 = vmatpush1.bf16.msra.mxu1 %v9966_v41  ;;  %v10054_v21 = vld [vmem:[%s11147_s8 + $0xfa0] ss:$16 sps:$4 sm:$0xff]   ;;  %v10057_v41 = vld [vmem:[%s11147_s8 + $0xfa8] ss:$16 sps:$4 sm:$0xff]  }
 0x212   : > { %6907 = vmatprep.subr.bf16.mxu0 %v9971_v43  ;;  %7563 = vmatprep.subr.bf16.mxu1 %v9974_v44  ;;  %v10062_v43 = vld [vmem:[%s11147_s8 + $0xfc4] ss:$16 sps:$4 sm:$0xff]   ;;  %v10065_v44 = vld [vmem:[%s11147_s8 + $0xfcc] ss:$16 sps:$4 sm:$0xff]  }
 0x215   : > { %6908 = vmatpush1.bf16.msra.mxu0 %v9969_v35  ;;  %7564 = vmatpush1.bf16.msra.mxu1 %v9972_v45  ;;  %v11755_v35 = vld [vmem:[%s12423_s0 + $0x10] sm:$0xff] }
 0x216   : > { %6918 = vmatprep.subr.bf16.mxu0 %v9978_v46  ;;  %7574 = vmatprep.subr.bf16.mxu1 %v9981_v47  ;;  %v10060_v45 = vld [vmem:[%s11147_s8 + $0xfc0] ss:$16 sps:$4 sm:$0xff]   ;;  %v10063_v46 = vld [vmem:[%s11147_s8 + $0xfc8] ss:$16 sps:$4 sm:$0xff]   ;;  %v10068_v47 = vld [vmem:[%s11147_s8 + $0xfe4] ss:$16 sps:$4 sm:$0xff]  }
 0x218   : > { %6910 = vmatmul.mubr.bf16.vlgmr.msra.gmra.mrb[0].mxu0 %v11690_v13  ;;  %7566 = vmatmul.mubr.bf16.vlgmr.msra.gmra.mrb[0].mxu1 %v11690_v13 }
 0x219   : > { %6919 = vmatpush1.bf16.msra.mxu0 %v9976_v50  ;;  %7575 = vmatpush1.bf16.msra.mxu1 %v9979_v51  ;;  %v10071_v50 = vld [vmem:[%s11147_s8 + $0xfec] ss:$16 sps:$4 sm:$0xff]   ;;  %v11763_v51 = vrot.slane %v11755_v35, %v11208_v49 }
 0x21a   : > { %6920 = vmatprep.subr.bf16.mxu0 %v9984_v53  ;;  %7576 = vmatprep.subr.bf16.mxu1 %v9987_v54  ;;  %v10066_v53 = vld [vmem:[%s11147_s8 + $0xfe0] ss:$16 sps:$4 sm:$0xff]   ;;  %v10069_v54 = vld [vmem:[%s11147_s8 + $0xfe8] ss:$16 sps:$4 sm:$0xff]  }
 0x21b   : > { %6950 = vmatprep.mubr.bf16.mxu0 %v1380_v55  ;;  %7606 = vmatprep.mubr.bf16.mxu1 %v1380_v55  ;;  %v10074_v55 = vld [vmem:[%s11147_s8 + $0x1004] ss:$16 sps:$4 sm:$0xff]  }
 0x21d   : > { %6921 = vmatpush1.bf16.msra.mxu0 %v9982_v38  ;;  %7577 = vmatpush1.bf16.msra.mxu1 %v9985_v56  ;;  %v10077_v38 = vld [vmem:[%s11147_s8 + $0x100c] ss:$16 sps:$4 sm:$0xff]   ;;  %v1396_v56 = vcombine.high %v11763_v51, %v11763_v51 }
 0x21e   : > { %6922 = vmatprep.subr.bf16.mxu0 %v9990_v57  ;;  %7578 = vmatprep.subr.bf16.mxu1 %v9993_v58  ;;  %v1378_v57 = vcombine.high %v11690_v13, %v11690_v13  ;;  %v10072_v58 = vld [vmem:[%s11147_s8 + $0x1000] ss:$16 sps:$4 sm:$0xff]  }
 0x21f   : > { %v10078_v13 = vld [vmem:[%s11147_s8 + $0x1020] ss:$16 sps:$4 sm:$0xff]  }
 0x221   : > { %6923 = vmatpush1.bf16.msra.mxu0 %v9988_v48  ;;  %7579 = vmatpush1.bf16.msra.mxu1 %v9991_v59  ;;  %v10075_v48 = vld [vmem:[%s11147_s8 + $0x1008] ss:$16 sps:$4 sm:$0xff]   ;;  %v10080_v59 = vld [vmem:[%s11147_s8 + $0x1024] ss:$16 sps:$4 sm:$0xff]  }
 0x222   : > { %6924 = vmatprep.subr.bf16.mxu0 %v9996_v60  ;;  %7580 = vmatprep.subr.bf16.mxu1 %v9999_v61  ;;  %v10083_v60 = vld [vmem:[%s11147_s8 + $0x102c] ss:$16 sps:$4 sm:$0xff]   ;;  %v11778_v61 = vrot.slane %v1396_v56, %v11208_v49  ;;  %v10159_v56 = vld [vmem:[%s11147_s8 + $0x11c8] ss:$16 sps:$4 sm:$0xff]  }
 0x225   : > { %6925 = vmatpush1.bf16.msra.mxu0 %v9994_v62  ;;  %7581 = vmatpush1.bf16.msra.mxu1 %v9997_v63  ;;  %v10081_v62 = vld [vmem:[%s11147_s8 + $0x1028] ss:$16 sps:$4 sm:$0xff]   ;;  %v10086_v63 = vld [vmem:[%s11147_s8 + $0x1044] ss:$16 sps:$4 sm:$0xff]  }
 0x226   : > { %6926 = vmatprep.subr.bf16.mxu0 %v10002_v0  ;;  %7582 = vmatprep.subr.bf16.mxu1 %v10005_v1  ;;  %v10089_v0 = vld [vmem:[%s11147_s8 + $0x104c] ss:$16 sps:$4 sm:$0xff]   ;;  %v10084_v1 = vld [vmem:[%s11147_s8 + $0x1040] ss:$16 sps:$4 sm:$0xff]  }
 0x229   : > { %6927 = vmatpush1.bf16.msra.mxu0 %v10000_v2  ;;  %7583 = vmatpush1.bf16.msra.mxu1 %v10003_v3  ;;  %v10087_v2 = vld [vmem:[%s11147_s8 + $0x1048] ss:$16 sps:$4 sm:$0xff]   ;;  %v10092_v3 = vld [vmem:[%s11147_s8 + $0x1064] ss:$16 sps:$4 sm:$0xff]  }
 0x22a   : > { %6928 = vmatprep.subr.bf16.mxu0 %v10008_v4  ;;  %7584 = vmatprep.subr.bf16.mxu1 %v10011_v5  ;;  %v10095_v4 = vld [vmem:[%s11147_s8 + $0x106c] ss:$16 sps:$4 sm:$0xff]   ;;  %v10090_v5 = vld [vmem:[%s11147_s8 + $0x1060] ss:$16 sps:$4 sm:$0xff]  }
 0x22d   : > { %6929 = vmatpush1.bf16.msra.mxu0 %v10006_v6  ;;  %7585 = vmatpush1.bf16.msra.mxu1 %v10009_v7  ;;  %v10093_v6 = vld [vmem:[%s11147_s8 + $0x1068] ss:$16 sps:$4 sm:$0xff]   ;;  %v10098_v7 = vld [vmem:[%s11147_s8 + $0x1084] ss:$16 sps:$4 sm:$0xff]  }
 0x22e   : > { %6930 = vmatprep.subr.bf16.mxu0 %v10014_v8  ;;  %7586 = vmatprep.subr.bf16.mxu1 %v10017_v9  ;;  %v10101_v8 = vld [vmem:[%s11147_s8 + $0x108c] ss:$16 sps:$4 sm:$0xff]   ;;  %v10096_v9 = vld [vmem:[%s11147_s8 + $0x1080] ss:$16 sps:$4 sm:$0xff]  }
 0x231   : > { %6931 = vmatpush1.bf16.msra.mxu0 %v10012_v10  ;;  %7587 = vmatpush1.bf16.msra.mxu1 %v10015_v11  ;;  %v10099_v10 = vld [vmem:[%s11147_s8 + $0x1088] ss:$16 sps:$4 sm:$0xff]   ;;  %v10104_v11 = vld [vmem:[%s11147_s8 + $0x10a4] ss:$16 sps:$4 sm:$0xff]  }
 0x232   : > { %6932 = vmatprep.subr.bf16.mxu0 %v10020_v12  ;;  %7588 = vmatprep.subr.bf16.mxu1 %v10023_v14  ;;  %v10107_v12 = vld [vmem:[%s11147_s8 + $0x10ac] ss:$16 sps:$4 sm:$0xff]   ;;  %v10102_v14 = vld [vmem:[%s11147_s8 + $0x10a0] ss:$16 sps:$4 sm:$0xff]  }
 0x235   : > { %6933 = vmatpush1.bf16.msra.mxu0 %v10018_v16  ;;  %7589 = vmatpush1.bf16.msra.mxu1 %v10021_v52  ;;  %v10105_v16 = vld [vmem:[%s11147_s8 + $0x10a8] ss:$16 sps:$4 sm:$0xff]   ;;  %v10110_v52 = vld [vmem:[%s11147_s8 + $0x10c4] ss:$16 sps:$4 sm:$0xff]  }
 0x236   : > { %6934 = vmatprep.subr.bf16.mxu0 %v10026_v17  ;;  %7590 = vmatprep.subr.bf16.mxu1 %v10029_v18  ;;  %v10113_v17 = vld [vmem:[%s11147_s8 + $0x10cc] ss:$16 sps:$4 sm:$0xff]   ;;  %v10108_v18 = vld [vmem:[%s11147_s8 + $0x10c0] ss:$16 sps:$4 sm:$0xff]  }
 0x239   : > { %6935 = vmatpush1.bf16.msra.mxu0 %v10024_v19  ;;  %7591 = vmatpush1.bf16.msra.mxu1 %v10027_v20  ;;  %v10111_v19 = vld [vmem:[%s11147_s8 + $0x10c8] ss:$16 sps:$4 sm:$0xff]   ;;  %v10116_v20 = vld [vmem:[%s11147_s8 + $0x10e4] ss:$16 sps:$4 sm:$0xff]  }
 0x23a   : > { %6936 = vmatprep.subr.bf16.mxu0 %v10032_v22  ;;  %7592 = vmatprep.subr.bf16.mxu1 %v10035_v23  ;;  %v10119_v22 = vld [vmem:[%s11147_s8 + $0x10ec] ss:$16 sps:$4 sm:$0xff]   ;;  %v10114_v23 = vld [vmem:[%s11147_s8 + $0x10e0] ss:$16 sps:$4 sm:$0xff]  }
 0x23d   : > { %6937 = vmatpush1.bf16.msra.mxu0 %v10030_v24  ;;  %7593 = vmatpush1.bf16.msra.mxu1 %v10033_v26  ;;  %v10117_v24 = vld [vmem:[%s11147_s8 + $0x10e8] ss:$16 sps:$4 sm:$0xff]   ;;  %v10122_v26 = vld [vmem:[%s11147_s8 + $0x1104] ss:$16 sps:$4 sm:$0xff]  }
 0x23e   : > { %6938 = vmatprep.subr.bf16.mxu0 %v10038_v27  ;;  %7594 = vmatprep.subr.bf16.mxu1 %v10041_v28  ;;  %v10125_v27 = vld [vmem:[%s11147_s8 + $0x110c] ss:$16 sps:$4 sm:$0xff]   ;;  %v10120_v28 = vld [vmem:[%s11147_s8 + $0x1100] ss:$16 sps:$4 sm:$0xff]  }
 0x241   : > { %6939 = vmatpush1.bf16.msra.mxu0 %v10036_v29  ;;  %7595 = vmatpush1.bf16.msra.mxu1 %v10039_v30  ;;  %v10123_v29 = vld [vmem:[%s11147_s8 + $0x1108] ss:$16 sps:$4 sm:$0xff]   ;;  %v10128_v30 = vld [vmem:[%s11147_s8 + $0x1124] ss:$16 sps:$4 sm:$0xff]  }
 0x242   : > { %6940 = vmatprep.subr.bf16.mxu0 %v10044_v15  ;;  %7596 = vmatprep.subr.bf16.mxu1 %v10047_v31  ;;  %v10131_v15 = vld [vmem:[%s11147_s8 + $0x112c] ss:$16 sps:$4 sm:$0xff]   ;;  %v10126_v31 = vld [vmem:[%s11147_s8 + $0x1120] ss:$16 sps:$4 sm:$0xff]  }
 0x245   : > { %6941 = vmatpush1.bf16.msra.mxu0 %v10042_v32  ;;  %7597 = vmatpush1.bf16.msra.mxu1 %v10045_v33  ;;  %v10129_v32 = vld [vmem:[%s11147_s8 + $0x1128] ss:$16 sps:$4 sm:$0xff]   ;;  %v10134_v33 = vld [vmem:[%s11147_s8 + $0x1144] ss:$16 sps:$4 sm:$0xff]  }
 0x246   : > { %6942 = vmatprep.subr.bf16.mxu0 %v10050_v25  ;;  %7598 = vmatprep.subr.bf16.mxu1 %v10053_v34  ;;  %v10137_v25 = vld [vmem:[%s11147_s8 + $0x114c] ss:$16 sps:$4 sm:$0xff]   ;;  %v10132_v34 = vld [vmem:[%s11147_s8 + $0x1140] ss:$16 sps:$4 sm:$0xff]  }
 0x249   : > { %6943 = vmatpush1.bf16.msra.mxu0 %v10048_v36  ;;  %7599 = vmatpush1.bf16.msra.mxu1 %v10051_v37  ;;  %v10135_v36 = vld [vmem:[%s11147_s8 + $0x1148] ss:$16 sps:$4 sm:$0xff]   ;;  %v10140_v37 = vld [vmem:[%s11147_s8 + $0x1164] ss:$16 sps:$4 sm:$0xff]  }
 0x24a   : > { %6944 = vmatprep.subr.bf16.mxu0 %v10056_v39  ;;  %7600 = vmatprep.subr.bf16.mxu1 %v10059_v40  ;;  %v10143_v39 = vld [vmem:[%s11147_s8 + $0x116c] ss:$16 sps:$4 sm:$0xff]   ;;  %v10138_v40 = vld [vmem:[%s11147_s8 + $0x1160] ss:$16 sps:$4 sm:$0xff]  }
 0x24d   : > { %6945 = vmatpush1.bf16.msra.mxu0 %v10054_v21  ;;  %7601 = vmatpush1.bf16.msra.mxu1 %v10057_v41  ;;  %v10141_v21 = vld [vmem:[%s11147_s8 + $0x1168] ss:$16 sps:$4 sm:$0xff]   ;;  %v10146_v41 = vld [vmem:[%s11147_s8 + $0x1184] ss:$16 sps:$4 sm:$0xff]  }
 0x24e   : > { %6946 = vmatprep.subr.bf16.mxu0 %v10062_v43  ;;  %7602 = vmatprep.subr.bf16.mxu1 %v10065_v44  ;;  %v10149_v43 = vld [vmem:[%s11147_s8 + $0x118c] ss:$16 sps:$4 sm:$0xff]   ;;  %v10144_v44 = vld [vmem:[%s11147_s8 + $0x1180] ss:$16 sps:$4 sm:$0xff]  }
 0x251   : > { %6947 = vmatpush1.bf16.msra.mxu0 %v10060_v45  ;;  %7603 = vmatpush1.bf16.msra.mxu1 %v10063_v46  ;;  %v10147_v45 = vld [vmem:[%s11147_s8 + $0x1188] ss:$16 sps:$4 sm:$0xff]   ;;  %v10152_v46 = vld [vmem:[%s11147_s8 + $0x11a4] ss:$16 sps:$4 sm:$0xff]  }
 0x252   : > { %6948 = vmatprep.subr.bf16.mxu0 %v10068_v47  ;;  %7604 = vmatprep.subr.bf16.mxu1 %v10071_v50  ;;  %v10155_v47 = vld [vmem:[%s11147_s8 + $0x11ac] ss:$16 sps:$4 sm:$0xff]   ;;  %v10150_v50 = vld [vmem:[%s11147_s8 + $0x11a0] ss:$16 sps:$4 sm:$0xff]  }
 0x255   : > { %6949 = vmatpush1.bf16.msra.mxu0 %v10066_v53  ;;  %7605 = vmatpush1.bf16.msra.mxu1 %v10069_v54  ;;  %v10153_v53 = vld [vmem:[%s11147_s8 + $0x11a8] ss:$16 sps:$4 sm:$0xff]   ;;  %v10158_v54 = vld [vmem:[%s11147_s8 + $0x11c4] ss:$16 sps:$4 sm:$0xff]  }
 0x256   : > { %6959 = vmatprep.subr.bf16.mxu0 %v10074_v55  ;;  %7615 = vmatprep.subr.bf16.mxu1 %v10077_v38  ;;  %v10161_v55 = vld [vmem:[%s11147_s8 + $0x11cc] ss:$16 sps:$4 sm:$0xff]   ;;  %v10156_v38 = vld [vmem:[%s11147_s8 + $0x11c0] ss:$16 sps:$4 sm:$0xff]  }
 0x258   : > { %6951 = vmatmul.mubr.bf16.vlgmr.msra.gmra.mrb[0].mxu0 %v1378_v57  ;;  %7607 = vmatmul.mubr.bf16.vlgmr.msra.gmra.mrb[0].mxu1 %v1378_v57  ;;  %v10164_v57 = vld [vmem:[%s11147_s8 + $0x11e4] ss:$16 sps:$4 sm:$0xff]  }
 0x259   : > { %6960 = vmatpush1.bf16.msra.mxu0 %v10072_v58  ;;  %7616 = vmatpush1.bf16.msra.mxu1 %v10075_v48  ;;  %v10167_v58 = vld [vmem:[%s11147_s8 + $0x11ec] ss:$16 sps:$4 sm:$0xff]   ;;  %v10162_v48 = vld [vmem:[%s11147_s8 + $0x11e0] ss:$16 sps:$4 sm:$0xff]  }
 0x25a   : > { %6961 = vmatprep.subr.bf16.mxu0 %v10080_v59  ;;  %7617 = vmatprep.subr.bf16.mxu1 %v10083_v60  ;;  %v10165_v59 = vld [vmem:[%s11147_s8 + $0x11e8] ss:$16 sps:$4 sm:$0xff]   ;;  %v10170_v60 = vld [vmem:[%s11147_s8 + $0x1204] ss:$16 sps:$4 sm:$0xff]  }
 0x25b   : > { %6991 = vmatprep.mubr.bf16.mxu0 %v11778_v61  ;;  %7647 = vmatprep.mubr.bf16.mxu1 %v11778_v61 }
 0x25d   : > { %6962 = vmatpush1.bf16.msra.mxu0 %v10078_v13  ;;  %7618 = vmatpush1.bf16.msra.mxu1 %v10081_v62  ;;  %v10173_v13 = vld [vmem:[%s11147_s8 + $0x120c] ss:$16 sps:$4 sm:$0xff]   ;;  %v11844_v62 = vrot.slane %v11763_v51, %v11208_v49  ;;  %v10174_v51 = vld [vmem:[%s11147_s8 + $0x1220] ss:$16 sps:$4 sm:$0xff]  }
 0x25e   : > { %6963 = vmatprep.subr.bf16.mxu0 %v10086_v63  ;;  %7619 = vmatprep.subr.bf16.mxu1 %v10089_v0  ;;  %v10168_v63 = vld [vmem:[%s11147_s8 + $0x1200] ss:$16 sps:$4 sm:$0xff]   ;;  %v10171_v0 = vld [vmem:[%s11147_s8 + $0x1208] ss:$16 sps:$4 sm:$0xff]  }
 0x261   : > { %6964 = vmatpush1.bf16.msra.mxu0 %v10084_v1  ;;  %7620 = vmatpush1.bf16.msra.mxu1 %v10087_v2  ;;  %v10176_v1 = vld [vmem:[%s11147_s8 + $0x1224] ss:$16 sps:$4 sm:$0xff]   ;;  %v10179_v2 = vld [vmem:[%s11147_s8 + $0x122c] ss:$16 sps:$4 sm:$0xff]  }
 0x262   : > { %6965 = vmatprep.subr.bf16.mxu0 %v10092_v3  ;;  %7621 = vmatprep.subr.bf16.mxu1 %v10095_v4  ;;  %v1428_v3 = vcombine.high %v11778_v61, %v11778_v61  ;;  %v10177_v4 = vld [vmem:[%s11147_s8 + $0x1228] ss:$16 sps:$4 sm:$0xff]   ;;  %v10180_v61 = vld [vmem:[%s11147_s8 + $0x1240] ss:$16 sps:$4 sm:$0xff]  }
 0x265   : > { %6966 = vmatpush1.bf16.msra.mxu0 %v10090_v5  ;;  %7622 = vmatpush1.bf16.msra.mxu1 %v10093_v6  ;;  %v10182_v5 = vld [vmem:[%s11147_s8 + $0x1244] ss:$16 sps:$4 sm:$0xff]   ;;  %v10185_v6 = vld [vmem:[%s11147_s8 + $0x124c] ss:$16 sps:$4 sm:$0xff]  }
 0x266   : > { %6967 = vmatprep.subr.bf16.mxu0 %v10098_v7  ;;  %7623 = vmatprep.subr.bf16.mxu1 %v10101_v8  ;;  %v10183_v7 = vld [vmem:[%s11147_s8 + $0x1248] ss:$16 sps:$4 sm:$0xff]   ;;  %v10188_v8 = vld [vmem:[%s11147_s8 + $0x1264] ss:$16 sps:$4 sm:$0xff]  }
 0x269   : > { %6968 = vmatpush1.bf16.msra.mxu0 %v10096_v9  ;;  %7624 = vmatpush1.bf16.msra.mxu1 %v10099_v10  ;;  %v10191_v9 = vld [vmem:[%s11147_s8 + $0x126c] ss:$16 sps:$4 sm:$0xff]   ;;  %v10186_v10 = vld [vmem:[%s11147_s8 + $0x1260] ss:$16 sps:$4 sm:$0xff]  }
 0x26a   : > { %6969 = vmatprep.subr.bf16.mxu0 %v10104_v11  ;;  %7625 = vmatprep.subr.bf16.mxu1 %v10107_v12  ;;  %v10189_v11 = vld [vmem:[%s11147_s8 + $0x1268] ss:$16 sps:$4 sm:$0xff]   ;;  %v10194_v12 = vld [vmem:[%s11147_s8 + $0x1284] ss:$16 sps:$4 sm:$0xff]  }
 0x26d   : > { %6970 = vmatpush1.bf16.msra.mxu0 %v10102_v14  ;;  %7626 = vmatpush1.bf16.msra.mxu1 %v10105_v16  ;;  %v10197_v14 = vld [vmem:[%s11147_s8 + $0x128c] ss:$16 sps:$4 sm:$0xff]   ;;  %v10192_v16 = vld [vmem:[%s11147_s8 + $0x1280] ss:$16 sps:$4 sm:$0xff]  }
 0x26e   : > { %6971 = vmatprep.subr.bf16.mxu0 %v10110_v52  ;;  %7627 = vmatprep.subr.bf16.mxu1 %v10113_v17  ;;  %v10195_v52 = vld [vmem:[%s11147_s8 + $0x1288] ss:$16 sps:$4 sm:$0xff]   ;;  %v10200_v17 = vld [vmem:[%s11147_s8 + $0x12a4] ss:$16 sps:$4 sm:$0xff]  }
 0x271   : > { %6972 = vmatpush1.bf16.msra.mxu0 %v10108_v18  ;;  %7628 = vmatpush1.bf16.msra.mxu1 %v10111_v19  ;;  %v10203_v18 = vld [vmem:[%s11147_s8 + $0x12ac] ss:$16 sps:$4 sm:$0xff]   ;;  %v10198_v19 = vld [vmem:[%s11147_s8 + $0x12a0] ss:$16 sps:$4 sm:$0xff]  }
 0x272   : > { %6973 = vmatprep.subr.bf16.mxu0 %v10116_v20  ;;  %7629 = vmatprep.subr.bf16.mxu1 %v10119_v22  ;;  %v10201_v20 = vld [vmem:[%s11147_s8 + $0x12a8] ss:$16 sps:$4 sm:$0xff]   ;;  %v10206_v22 = vld [vmem:[%s11147_s8 + $0x12c4] ss:$16 sps:$4 sm:$0xff]  }
 0x275   : > { %6974 = vmatpush1.bf16.msra.mxu0 %v10114_v23  ;;  %7630 = vmatpush1.bf16.msra.mxu1 %v10117_v24  ;;  %v10209_v23 = vld [vmem:[%s11147_s8 + $0x12cc] ss:$16 sps:$4 sm:$0xff]   ;;  %v10204_v24 = vld [vmem:[%s11147_s8 + $0x12c0] ss:$16 sps:$4 sm:$0xff]  }
 0x276   : > { %6975 = vmatprep.subr.bf16.mxu0 %v10122_v26  ;;  %7631 = vmatprep.subr.bf16.mxu1 %v10125_v27  ;;  %v10207_v26 = vld [vmem:[%s11147_s8 + $0x12c8] ss:$16 sps:$4 sm:$0xff]   ;;  %v10212_v27 = vld [vmem:[%s11147_s8 + $0x12e4] ss:$16 sps:$4 sm:$0xff]  }
 0x279   : > { %6976 = vmatpush1.bf16.msra.mxu0 %v10120_v28  ;;  %7632 = vmatpush1.bf16.msra.mxu1 %v10123_v29  ;;  %v10215_v28 = vld [vmem:[%s11147_s8 + $0x12ec] ss:$16 sps:$4 sm:$0xff]   ;;  %v10210_v29 = vld [vmem:[%s11147_s8 + $0x12e0] ss:$16 sps:$4 sm:$0xff]  }
 0x27a   : > { %6977 = vmatprep.subr.bf16.mxu0 %v10128_v30  ;;  %7633 = vmatprep.subr.bf16.mxu1 %v10131_v15  ;;  %v10213_v30 = vld [vmem:[%s11147_s8 + $0x12e8] ss:$16 sps:$4 sm:$0xff]   ;;  %v10218_v15 = vld [vmem:[%s11147_s8 + $0x1304] ss:$16 sps:$4 sm:$0xff]  }
 0x27d   : > { %6978 = vmatpush1.bf16.msra.mxu0 %v10126_v31  ;;  %7634 = vmatpush1.bf16.msra.mxu1 %v10129_v32  ;;  %v10221_v31 = vld [vmem:[%s11147_s8 + $0x130c] ss:$16 sps:$4 sm:$0xff]   ;;  %v10216_v32 = vld [vmem:[%s11147_s8 + $0x1300] ss:$16 sps:$4 sm:$0xff]  }
 0x27e   : > { %6979 = vmatprep.subr.bf16.mxu0 %v10134_v33  ;;  %7635 = vmatprep.subr.bf16.mxu1 %v10137_v25  ;;  %v10219_v33 = vld [vmem:[%s11147_s8 + $0x1308] ss:$16 sps:$4 sm:$0xff]   ;;  %v10224_v25 = vld [vmem:[%s11147_s8 + $0x1324] ss:$16 sps:$4 sm:$0xff]  }
 0x281   : > { %6980 = vmatpush1.bf16.msra.mxu0 %v10132_v34  ;;  %7636 = vmatpush1.bf16.msra.mxu1 %v10135_v36  ;;  %v10227_v34 = vld [vmem:[%s11147_s8 + $0x132c] ss:$16 sps:$4 sm:$0xff]   ;;  %v10222_v36 = vld [vmem:[%s11147_s8 + $0x1320] ss:$16 sps:$4 sm:$0xff]  }
 0x282   : > { %6981 = vmatprep.subr.bf16.mxu0 %v10140_v37  ;;  %7637 = vmatprep.subr.bf16.mxu1 %v10143_v39  ;;  %v10225_v37 = vld [vmem:[%s11147_s8 + $0x1328] ss:$16 sps:$4 sm:$0xff]   ;;  %v10230_v39 = vld [vmem:[%s11147_s8 + $0x1344] ss:$16 sps:$4 sm:$0xff]  }
 0x285   : > { %6982 = vmatpush1.bf16.msra.mxu0 %v10138_v40  ;;  %7638 = vmatpush1.bf16.msra.mxu1 %v10141_v21  ;;  %v10233_v40 = vld [vmem:[%s11147_s8 + $0x134c] ss:$16 sps:$4 sm:$0xff]   ;;  %v10228_v21 = vld [vmem:[%s11147_s8 + $0x1340] ss:$16 sps:$4 sm:$0xff]  }
 0x286   : > { %6983 = vmatprep.subr.bf16.mxu0 %v10146_v41  ;;  %7639 = vmatprep.subr.bf16.mxu1 %v10149_v43  ;;  %v10231_v41 = vld [vmem:[%s11147_s8 + $0x1348] ss:$16 sps:$4 sm:$0xff]   ;;  %v10236_v43 = vld [vmem:[%s11147_s8 + $0x1364] ss:$16 sps:$4 sm:$0xff]  }
 0x289   : > { %6984 = vmatpush1.bf16.msra.mxu0 %v10144_v44  ;;  %7640 = vmatpush1.bf16.msra.mxu1 %v10147_v45  ;;  %v10239_v44 = vld [vmem:[%s11147_s8 + $0x136c] ss:$16 sps:$4 sm:$0xff]   ;;  %v10234_v45 = vld [vmem:[%s11147_s8 + $0x1360] ss:$16 sps:$4 sm:$0xff]  }
 0x28a   : > { %6985 = vmatprep.subr.bf16.mxu0 %v10152_v46  ;;  %7641 = vmatprep.subr.bf16.mxu1 %v10155_v47  ;;  %v10237_v46 = vld [vmem:[%s11147_s8 + $0x1368] ss:$16 sps:$4 sm:$0xff]   ;;  %v10242_v47 = vld [vmem:[%s11147_s8 + $0x1384] ss:$16 sps:$4 sm:$0xff]  }
 0x28d   : > { %6986 = vmatpush1.bf16.msra.mxu0 %v10150_v50  ;;  %7642 = vmatpush1.bf16.msra.mxu1 %v10153_v53  ;;  %v10245_v50 = vld [vmem:[%s11147_s8 + $0x138c] ss:$16 sps:$4 sm:$0xff]   ;;  %v10240_v53 = vld [vmem:[%s11147_s8 + $0x1380] ss:$16 sps:$4 sm:$0xff]  }
 0x28e   : > { %6987 = vmatprep.subr.bf16.mxu0 %v10158_v54  ;;  %7643 = vmatprep.subr.bf16.mxu1 %v10161_v55  ;;  %v10243_v54 = vld [vmem:[%s11147_s8 + $0x1388] ss:$16 sps:$4 sm:$0xff]   ;;  %v10248_v55 = vld [vmem:[%s11147_s8 + $0x13a4] ss:$16 sps:$4 sm:$0xff]  }
 0x291   : > { %6988 = vmatpush1.bf16.msra.mxu0 %v10156_v38  ;;  %7644 = vmatpush1.bf16.msra.mxu1 %v10159_v56  ;;  %v10251_v38 = vld [vmem:[%s11147_s8 + $0x13ac] ss:$16 sps:$4 sm:$0xff]   ;;  %v10246_v56 = vld [vmem:[%s11147_s8 + $0x13a0] ss:$16 sps:$4 sm:$0xff]  }
 0x292   : > { %6989 = vmatprep.subr.bf16.mxu0 %v10164_v57  ;;  %7645 = vmatprep.subr.bf16.mxu1 %v10167_v58  ;;  %v10249_v57 = vld [vmem:[%s11147_s8 + $0x13a8] ss:$16 sps:$4 sm:$0xff]   ;;  %v10254_v58 = vld [vmem:[%s11147_s8 + $0x13c4] ss:$16 sps:$4 sm:$0xff]  }
 0x295   : > { %6990 = vmatpush1.bf16.msra.mxu0 %v10162_v48  ;;  %7646 = vmatpush1.bf16.msra.mxu1 %v10165_v59  ;;  %v10257_v48 = vld [vmem:[%s11147_s8 + $0x13cc] ss:$16 sps:$4 sm:$0xff]   ;;  %v1381_v59 = vcombine.high %v11755_v35, %v11755_v35  ;;  %v10258_v35 = vld [vmem:[%s11147_s8 + $0x13e0] ss:$16 sps:$4 sm:$0xff]  }
 0x296   : > { %7000 = vmatprep.subr.bf16.mxu0 %v10170_v60  ;;  %7656 = vmatprep.subr.bf16.mxu1 %v10173_v13  ;;  %v10252_v60 = vld [vmem:[%s11147_s8 + $0x13c0] ss:$16 sps:$4 sm:$0xff]   ;;  %v10255_v13 = vld [vmem:[%s11147_s8 + $0x13c8] ss:$16 sps:$4 sm:$0xff]  }
 0x298   : > { %6992 = vmatmul.mubr.bf16.vlgmr.msra.gmra.mrb[0].mxu0 %v11844_v62  ;;  %7648 = vmatmul.mubr.bf16.vlgmr.msra.gmra.mrb[0].mxu1 %v11844_v62 }
 0x299   : > { %7001 = vmatpush1.bf16.msra.mxu0 %v10168_v63  ;;  %7657 = vmatpush1.bf16.msra.mxu1 %v10171_v0  ;;  %v10260_v63 = vld [vmem:[%s11147_s8 + $0x13e4] ss:$16 sps:$4 sm:$0xff]   ;;  %v10263_v0 = vld [vmem:[%s11147_s8 + $0x13ec] ss:$16 sps:$4 sm:$0xff]  }
 0x29a   : > { %7002 = vmatprep.subr.bf16.mxu0 %v10176_v1  ;;  %7658 = vmatprep.subr.bf16.mxu1 %v10179_v2  ;;  %v11913_v1 = vrot.slane %v1381_v59, %v11208_v49  ;;  %v10261_v2 = vld [vmem:[%s11147_s8 + $0x13e8] ss:$16 sps:$4 sm:$0xff]  }
 0x29b   : > { %7032 = vmatprep.mubr.bf16.mxu0 %v1428_v3  ;;  %7688 = vmatprep.mubr.bf16.mxu1 %v1428_v3  ;;  %v10266_v3 = vld [vmem:[%s11147_s8 + $0x1404] ss:$16 sps:$4 sm:$0xff]   ;;  %v10339_v59 = vld [vmem:[%s11147_s8 + $0x1588] ss:$16 sps:$4 sm:$0xff]  }
 0x29d   : > { %7003 = vmatpush1.bf16.msra.mxu0 %v10174_v51  ;;  %7659 = vmatpush1.bf16.msra.mxu1 %v10177_v4  ;;  %v10269_v51 = vld [vmem:[%s11147_s8 + $0x140c] ss:$16 sps:$4 sm:$0xff]   ;;  %v1397_v4 = vcombine.high %v11913_v1, %v11913_v1 }
 0x29e   : > { %7004 = vmatprep.subr.bf16.mxu0 %v10182_v5  ;;  %7660 = vmatprep.subr.bf16.mxu1 %v10185_v6  ;;  %v1426_v5 = vcombine.high %v11844_v62, %v11844_v62  ;;  %v10264_v6 = vld [vmem:[%s11147_s8 + $0x1400] ss:$16 sps:$4 sm:$0xff]  }
 0x29f   : > { %v10270_v62 = vld [vmem:[%s11147_s8 + $0x1420] ss:$16 sps:$4 sm:$0xff]  }
 0x2a1   : > { %7005 = vmatpush1.bf16.msra.mxu0 %v10180_v61  ;;  %7661 = vmatpush1.bf16.msra.mxu1 %v10183_v7  ;;  %v10267_v61 = vld [vmem:[%s11147_s8 + $0x1408] ss:$16 sps:$4 sm:$0xff]   ;;  %v10272_v7 = vld [vmem:[%s11147_s8 + $0x1424] ss:$16 sps:$4 sm:$0xff]  }
 0x2a2   : > { %7006 = vmatprep.subr.bf16.mxu0 %v10188_v8  ;;  %7662 = vmatprep.subr.bf16.mxu1 %v10191_v9  ;;  %v10275_v8 = vld [vmem:[%s11147_s8 + $0x142c] ss:$16 sps:$4 sm:$0xff]   ;;  %v11928_v9 = vrot.slane %v1397_v4, %v11208_v49  ;;  %v10356_v4 = vld [vmem:[%s11147_s8 + $0x15e4] ss:$16 sps:$4 sm:$0xff]  }
 0x2a5   : > { %7007 = vmatpush1.bf16.msra.mxu0 %v10186_v10  ;;  %7663 = vmatpush1.bf16.msra.mxu1 %v10189_v11  ;;  %v10273_v10 = vld [vmem:[%s11147_s8 + $0x1428] ss:$16 sps:$4 sm:$0xff]   ;;  %v10278_v11 = vld [vmem:[%s11147_s8 + $0x1444] ss:$16 sps:$4 sm:$0xff]  }
 0x2a6   : > { %7008 = vmatprep.subr.bf16.mxu0 %v10194_v12  ;;  %7664 = vmatprep.subr.bf16.mxu1 %v10197_v14  ;;  %v10281_v12 = vld [vmem:[%s11147_s8 + $0x144c] ss:$16 sps:$4 sm:$0xff]   ;;  %v10276_v14 = vld [vmem:[%s11147_s8 + $0x1440] ss:$16 sps:$4 sm:$0xff]  }
 0x2a9   : > { %7009 = vmatpush1.bf16.msra.mxu0 %v10192_v16  ;;  %7665 = vmatpush1.bf16.msra.mxu1 %v10195_v52  ;;  %v10279_v16 = vld [vmem:[%s11147_s8 + $0x1448] ss:$16 sps:$4 sm:$0xff]   ;;  %v10284_v52 = vld [vmem:[%s11147_s8 + $0x1464] ss:$16 sps:$4 sm:$0xff]  }
 0x2aa   : > { %7010 = vmatprep.subr.bf16.mxu0 %v10200_v17  ;;  %7666 = vmatprep.subr.bf16.mxu1 %v10203_v18  ;;  %v10287_v17 = vld [vmem:[%s11147_s8 + $0x146c] ss:$16 sps:$4 sm:$0xff]   ;;  %v10282_v18 = vld [vmem:[%s11147_s8 + $0x1460] ss:$16 sps:$4 sm:$0xff]  }
 0x2ad   : > { %7011 = vmatpush1.bf16.msra.mxu0 %v10198_v19  ;;  %7667 = vmatpush1.bf16.msra.mxu1 %v10201_v20  ;;  %v10285_v19 = vld [vmem:[%s11147_s8 + $0x1468] ss:$16 sps:$4 sm:$0xff]   ;;  %v10290_v20 = vld [vmem:[%s11147_s8 + $0x1484] ss:$16 sps:$4 sm:$0xff]  }
 0x2ae   : > { %7012 = vmatprep.subr.bf16.mxu0 %v10206_v22  ;;  %7668 = vmatprep.subr.bf16.mxu1 %v10209_v23  ;;  %v10293_v22 = vld [vmem:[%s11147_s8 + $0x148c] ss:$16 sps:$4 sm:$0xff]   ;;  %v10288_v23 = vld [vmem:[%s11147_s8 + $0x1480] ss:$16 sps:$4 sm:$0xff]  }
 0x2b1   : > { %7013 = vmatpush1.bf16.msra.mxu0 %v10204_v24  ;;  %7669 = vmatpush1.bf16.msra.mxu1 %v10207_v26  ;;  %v10291_v24 = vld [vmem:[%s11147_s8 + $0x1488] ss:$16 sps:$4 sm:$0xff]   ;;  %v10296_v26 = vld [vmem:[%s11147_s8 + $0x14a4] ss:$16 sps:$4 sm:$0xff]  }
 0x2b2   : > { %7014 = vmatprep.subr.bf16.mxu0 %v10212_v27  ;;  %7670 = vmatprep.subr.bf16.mxu1 %v10215_v28  ;;  %v10299_v27 = vld [vmem:[%s11147_s8 + $0x14ac] ss:$16 sps:$4 sm:$0xff]   ;;  %v10294_v28 = vld [vmem:[%s11147_s8 + $0x14a0] ss:$16 sps:$4 sm:$0xff]  }
 0x2b5   : > { %7015 = vmatpush1.bf16.msra.mxu0 %v10210_v29  ;;  %7671 = vmatpush1.bf16.msra.mxu1 %v10213_v30  ;;  %v10297_v29 = vld [vmem:[%s11147_s8 + $0x14a8] ss:$16 sps:$4 sm:$0xff]   ;;  %v10302_v30 = vld [vmem:[%s11147_s8 + $0x14c4] ss:$16 sps:$4 sm:$0xff]  }
 0x2b6   : > { %7016 = vmatprep.subr.bf16.mxu0 %v10218_v15  ;;  %7672 = vmatprep.subr.bf16.mxu1 %v10221_v31  ;;  %v10305_v15 = vld [vmem:[%s11147_s8 + $0x14cc] ss:$16 sps:$4 sm:$0xff]   ;;  %v10300_v31 = vld [vmem:[%s11147_s8 + $0x14c0] ss:$16 sps:$4 sm:$0xff]  }
 0x2b9   : > { %7017 = vmatpush1.bf16.msra.mxu0 %v10216_v32  ;;  %7673 = vmatpush1.bf16.msra.mxu1 %v10219_v33  ;;  %v10303_v32 = vld [vmem:[%s11147_s8 + $0x14c8] ss:$16 sps:$4 sm:$0xff]   ;;  %v10308_v33 = vld [vmem:[%s11147_s8 + $0x14e4] ss:$16 sps:$4 sm:$0xff]  }
 0x2ba   : > { %7018 = vmatprep.subr.bf16.mxu0 %v10224_v25  ;;  %7674 = vmatprep.subr.bf16.mxu1 %v10227_v34  ;;  %v10311_v25 = vld [vmem:[%s11147_s8 + $0x14ec] ss:$16 sps:$4 sm:$0xff]   ;;  %v10306_v34 = vld [vmem:[%s11147_s8 + $0x14e0] ss:$16 sps:$4 sm:$0xff]  }
 0x2bd   : > { %7019 = vmatpush1.bf16.msra.mxu0 %v10222_v36  ;;  %7675 = vmatpush1.bf16.msra.mxu1 %v10225_v37  ;;  %v10309_v36 = vld [vmem:[%s11147_s8 + $0x14e8] ss:$16 sps:$4 sm:$0xff]   ;;  %v10314_v37 = vld [vmem:[%s11147_s8 + $0x1504] ss:$16 sps:$4 sm:$0xff]  }
 0x2be   : > { %7020 = vmatprep.subr.bf16.mxu0 %v10230_v39  ;;  %7676 = vmatprep.subr.bf16.mxu1 %v10233_v40  ;;  %v10317_v39 = vld [vmem:[%s11147_s8 + $0x150c] ss:$16 sps:$4 sm:$0xff]   ;;  %v10312_v40 = vld [vmem:[%s11147_s8 + $0x1500] ss:$16 sps:$4 sm:$0xff]  }
 0x2c1   : > { %7021 = vmatpush1.bf16.msra.mxu0 %v10228_v21  ;;  %7677 = vmatpush1.bf16.msra.mxu1 %v10231_v41  ;;  %v10315_v21 = vld [vmem:[%s11147_s8 + $0x1508] ss:$16 sps:$4 sm:$0xff]   ;;  %v10320_v41 = vld [vmem:[%s11147_s8 + $0x1524] ss:$16 sps:$4 sm:$0xff]  }
 0x2c2   : > { %7022 = vmatprep.subr.bf16.mxu0 %v10236_v43  ;;  %7678 = vmatprep.subr.bf16.mxu1 %v10239_v44  ;;  %v10323_v43 = vld [vmem:[%s11147_s8 + $0x152c] ss:$16 sps:$4 sm:$0xff]   ;;  %v10318_v44 = vld [vmem:[%s11147_s8 + $0x1520] ss:$16 sps:$4 sm:$0xff]  }
 0x2c5   : > { %7023 = vmatpush1.bf16.msra.mxu0 %v10234_v45  ;;  %7679 = vmatpush1.bf16.msra.mxu1 %v10237_v46  ;;  %v10321_v45 = vld [vmem:[%s11147_s8 + $0x1528] ss:$16 sps:$4 sm:$0xff]   ;;  %v10326_v46 = vld [vmem:[%s11147_s8 + $0x1544] ss:$16 sps:$4 sm:$0xff]  }
 0x2c6   : > { %7024 = vmatprep.subr.bf16.mxu0 %v10242_v47  ;;  %7680 = vmatprep.subr.bf16.mxu1 %v10245_v50  ;;  %v10329_v47 = vld [vmem:[%s11147_s8 + $0x154c] ss:$16 sps:$4 sm:$0xff]   ;;  %v10324_v50 = vld [vmem:[%s11147_s8 + $0x1540] ss:$16 sps:$4 sm:$0xff]  }
 0x2c9   : > { %7025 = vmatpush1.bf16.msra.mxu0 %v10240_v53  ;;  %7681 = vmatpush1.bf16.msra.mxu1 %v10243_v54  ;;  %v10327_v53 = vld [vmem:[%s11147_s8 + $0x1548] ss:$16 sps:$4 sm:$0xff]   ;;  %v10332_v54 = vld [vmem:[%s11147_s8 + $0x1564] ss:$16 sps:$4 sm:$0xff]  }
 0x2ca   : > { %7026 = vmatprep.subr.bf16.mxu0 %v10248_v55  ;;  %7682 = vmatprep.subr.bf16.mxu1 %v10251_v38  ;;  %v10335_v55 = vld [vmem:[%s11147_s8 + $0x156c] ss:$16 sps:$4 sm:$0xff]   ;;  %v10330_v38 = vld [vmem:[%s11147_s8 + $0x1560] ss:$16 sps:$4 sm:$0xff]  }
 0x2cd   : > { %7027 = vmatpush1.bf16.msra.mxu0 %v10246_v56  ;;  %7683 = vmatpush1.bf16.msra.mxu1 %v10249_v57  ;;  %v10333_v56 = vld [vmem:[%s11147_s8 + $0x1568] ss:$16 sps:$4 sm:$0xff]   ;;  %v10338_v57 = vld [vmem:[%s11147_s8 + $0x1584] ss:$16 sps:$4 sm:$0xff]  }
 0x2ce   : > { %7028 = vmatprep.subr.bf16.mxu0 %v10254_v58  ;;  %7684 = vmatprep.subr.bf16.mxu1 %v10257_v48  ;;  %v10341_v58 = vld [vmem:[%s11147_s8 + $0x158c] ss:$16 sps:$4 sm:$0xff]   ;;  %v10336_v48 = vld [vmem:[%s11147_s8 + $0x1580] ss:$16 sps:$4 sm:$0xff]  }
 0x2d1   : > { %7029 = vmatpush1.bf16.msra.mxu0 %v10252_v60  ;;  %7685 = vmatpush1.bf16.msra.mxu1 %v10255_v13  ;;  %v10344_v60 = vld [vmem:[%s11147_s8 + $0x15a4] ss:$16 sps:$4 sm:$0xff]   ;;  %v10347_v13 = vld [vmem:[%s11147_s8 + $0x15ac] ss:$16 sps:$4 sm:$0xff]  }
 0x2d2   : > { %7030 = vmatprep.subr.bf16.mxu0 %v10260_v63  ;;  %7686 = vmatprep.subr.bf16.mxu1 %v10263_v0  ;;  %v10342_v63 = vld [vmem:[%s11147_s8 + $0x15a0] ss:$16 sps:$4 sm:$0xff]   ;;  %v10345_v0 = vld [vmem:[%s11147_s8 + $0x15a8] ss:$16 sps:$4 sm:$0xff]  }
 0x2d5   : > { %7031 = vmatpush1.bf16.msra.mxu0 %v10258_v35  ;;  %7687 = vmatpush1.bf16.msra.mxu1 %v10261_v2  ;;  %v10350_v35 = vld [vmem:[%s11147_s8 + $0x15c4] ss:$16 sps:$4 sm:$0xff]   ;;  %v10353_v2 = vld [vmem:[%s11147_s8 + $0x15cc] ss:$16 sps:$4 sm:$0xff]  }
 0x2d6   : > { %7041 = vmatprep.subr.bf16.mxu0 %v10266_v3  ;;  %7697 = vmatprep.subr.bf16.mxu1 %v10269_v51  ;;  %v10348_v3 = vld [vmem:[%s11147_s8 + $0x15c0] ss:$16 sps:$4 sm:$0xff]   ;;  %v10351_v51 = vld [vmem:[%s11147_s8 + $0x15c8] ss:$16 sps:$4 sm:$0xff]  }
 0x2d8   : > { %7033 = vmatmul.mubr.bf16.vlgmr.msra.gmra.mrb[0].mxu0 %v1426_v5  ;;  %7689 = vmatmul.mubr.bf16.vlgmr.msra.gmra.mrb[0].mxu1 %v1426_v5  ;;  %v10359_v5 = vld [vmem:[%s11147_s8 + $0x15ec] ss:$16 sps:$4 sm:$0xff]  }
 0x2d9   : > { %7042 = vmatpush1.bf16.msra.mxu0 %v10264_v6  ;;  %7698 = vmatpush1.bf16.msra.mxu1 %v10267_v61  ;;  %v10354_v6 = vld [vmem:[%s11147_s8 + $0x15e0] ss:$16 sps:$4 sm:$0xff]   ;;  %v10357_v61 = vld [vmem:[%s11147_s8 + $0x15e8] ss:$16 sps:$4 sm:$0xff]  }
 0x2da   : > { %7043 = vmatprep.subr.bf16.mxu0 %v10272_v7  ;;  %7699 = vmatprep.subr.bf16.mxu1 %v10275_v8  ;;  %v10363_v7 = vld [vmem:[%s11147_s8 + $0x1604] ss:$16 sps:$4 sm:$0xff]   ;;  %v10366_v8 = vld [vmem:[%s11147_s8 + $0x160c] ss:$16 sps:$4 sm:$0xff]  }
 0x2db   : > { %7073 = vmatprep.mubr.bf16.mxu0 %v11928_v9  ;;  %7729 = vmatprep.mubr.bf16.mxu1 %v11928_v9 }
 0x2dd   : > { %7044 = vmatpush1.bf16.msra.mxu0 %v10270_v62  ;;  %7700 = vmatpush1.bf16.msra.mxu1 %v10273_v10  ;;  %v11994_v62 = vrot.slane %v11913_v1, %v11208_v49  ;;  %v10361_v10 = vld [vmem:[%s11147_s8 + $0x1600] ss:$16 sps:$4 sm:$0xff]  }
 0x2de   : > { %7045 = vmatprep.subr.bf16.mxu0 %v10278_v11  ;;  %7701 = vmatprep.subr.bf16.mxu1 %v10281_v12  ;;  %v10364_v11 = vld [vmem:[%s11147_s8 + $0x1608] ss:$16 sps:$4 sm:$0xff]   ;;  %v10369_v12 = vld [vmem:[%s11147_s8 + $0x1624] ss:$16 sps:$4 sm:$0xff]   ;;  %v10367_v1 = vld [vmem:[%s11147_s8 + $0x1620] ss:$16 sps:$4 sm:$0xff]  }
 0x2e1   : > { %7046 = vmatpush1.bf16.msra.mxu0 %v10276_v14  ;;  %7702 = vmatpush1.bf16.msra.mxu1 %v10279_v16  ;;  %v10372_v14 = vld [vmem:[%s11147_s8 + $0x162c] ss:$16 sps:$4 sm:$0xff]   ;;  %v1429_v16 = vcombine.high %v11928_v9, %v11928_v9  ;;  %v10373_v9 = vld [vmem:[%s11147_s8 + $0x1640] ss:$16 sps:$4 sm:$0xff]  }
 0x2e2   : > { %7047 = vmatprep.subr.bf16.mxu0 %v10284_v52  ;;  %7703 = vmatprep.subr.bf16.mxu1 %v10287_v17  ;;  %v10370_v52 = vld [vmem:[%s11147_s8 + $0x1628] ss:$16 sps:$4 sm:$0xff]   ;;  %v10375_v17 = vld [vmem:[%s11147_s8 + $0x1644] ss:$16 sps:$4 sm:$0xff]  }
 0x2e5   : > { %7048 = vmatpush1.bf16.msra.mxu0 %v10282_v18  ;;  %7704 = vmatpush1.bf16.msra.mxu1 %v10285_v19  ;;  %v10378_v18 = vld [vmem:[%s11147_s8 + $0x164c] ss:$16 sps:$4 sm:$0xff]   ;;  %v10376_v19 = vld [vmem:[%s11147_s8 + $0x1648] ss:$16 sps:$4 sm:$0xff]  }
 0x2e6   : > { %7049 = vmatprep.subr.bf16.mxu0 %v10290_v20  ;;  %7705 = vmatprep.subr.bf16.mxu1 %v10293_v22  ;;  %v10381_v20 = vld [vmem:[%s11147_s8 + $0x1664] ss:$16 sps:$4 sm:$0xff]   ;;  %v10384_v22 = vld [vmem:[%s11147_s8 + $0x166c] ss:$16 sps:$4 sm:$0xff]  }
 0x2e9   : > { %7050 = vmatpush1.bf16.msra.mxu0 %v10288_v23  ;;  %7706 = vmatpush1.bf16.msra.mxu1 %v10291_v24  ;;  %v10379_v23 = vld [vmem:[%s11147_s8 + $0x1660] ss:$16 sps:$4 sm:$0xff]   ;;  %v10382_v24 = vld [vmem:[%s11147_s8 + $0x1668] ss:$16 sps:$4 sm:$0xff]  }
 0x2ea   : > { %7051 = vmatprep.subr.bf16.mxu0 %v10296_v26  ;;  %7707 = vmatprep.subr.bf16.mxu1 %v10299_v27  ;;  %v10387_v26 = vld [vmem:[%s11147_s8 + $0x1684] ss:$16 sps:$4 sm:$0xff]   ;;  %v10390_v27 = vld [vmem:[%s11147_s8 + $0x168c] ss:$16 sps:$4 sm:$0xff]  }
 0x2ed   : > { %7052 = vmatpush1.bf16.msra.mxu0 %v10294_v28  ;;  %7708 = vmatpush1.bf16.msra.mxu1 %v10297_v29  ;;  %v10385_v28 = vld [vmem:[%s11147_s8 + $0x1680] ss:$16 sps:$4 sm:$0xff]   ;;  %v10388_v29 = vld [vmem:[%s11147_s8 + $0x1688] ss:$16 sps:$4 sm:$0xff]  }
 0x2ee   : > { %7053 = vmatprep.subr.bf16.mxu0 %v10302_v30  ;;  %7709 = vmatprep.subr.bf16.mxu1 %v10305_v15  ;;  %v10393_v30 = vld [vmem:[%s11147_s8 + $0x16a4] ss:$16 sps:$4 sm:$0xff]   ;;  %v10396_v15 = vld [vmem:[%s11147_s8 + $0x16ac] ss:$16 sps:$4 sm:$0xff]  }
 0x2f1   : > { %7054 = vmatpush1.bf16.msra.mxu0 %v10300_v31  ;;  %7710 = vmatpush1.bf16.msra.mxu1 %v10303_v32  ;;  %v10391_v31 = vld [vmem:[%s11147_s8 + $0x16a0] ss:$16 sps:$4 sm:$0xff]   ;;  %v10394_v32 = vld [vmem:[%s11147_s8 + $0x16a8] ss:$16 sps:$4 sm:$0xff]  }
 0x2f2   : > { %7055 = vmatprep.subr.bf16.mxu0 %v10308_v33  ;;  %7711 = vmatprep.subr.bf16.mxu1 %v10311_v25  ;;  %v10399_v33 = vld [vmem:[%s11147_s8 + $0x16c4] ss:$16 sps:$4 sm:$0xff]   ;;  %v10402_v25 = vld [vmem:[%s11147_s8 + $0x16cc] ss:$16 sps:$4 sm:$0xff]  }
 0x2f5   : > { %7056 = vmatpush1.bf16.msra.mxu0 %v10306_v34  ;;  %7712 = vmatpush1.bf16.msra.mxu1 %v10309_v36  ;;  %v10397_v34 = vld [vmem:[%s11147_s8 + $0x16c0] ss:$16 sps:$4 sm:$0xff]   ;;  %v10400_v36 = vld [vmem:[%s11147_s8 + $0x16c8] ss:$16 sps:$4 sm:$0xff]  }
 0x2f6   : > { %7057 = vmatprep.subr.bf16.mxu0 %v10314_v37  ;;  %7713 = vmatprep.subr.bf16.mxu1 %v10317_v39  ;;  %v10405_v37 = vld [vmem:[%s11147_s8 + $0x16e4] ss:$16 sps:$4 sm:$0xff]   ;;  %v10408_v39 = vld [vmem:[%s11147_s8 + $0x16ec] ss:$16 sps:$4 sm:$0xff]  }
 0x2f9   : > { %7058 = vmatpush1.bf16.msra.mxu0 %v10312_v40  ;;  %7714 = vmatpush1.bf16.msra.mxu1 %v10315_v21  ;;  %v10403_v40 = vld [vmem:[%s11147_s8 + $0x16e0] ss:$16 sps:$4 sm:$0xff]   ;;  %v10406_v21 = vld [vmem:[%s11147_s8 + $0x16e8] ss:$16 sps:$4 sm:$0xff]  }
 0x2fa   : > { %7059 = vmatprep.subr.bf16.mxu0 %v10320_v41  ;;  %7715 = vmatprep.subr.bf16.mxu1 %v10323_v43  ;;  %v10411_v41 = vld [vmem:[%s11147_s8 + $0x1704] ss:$16 sps:$4 sm:$0xff]   ;;  %v10414_v43 = vld [vmem:[%s11147_s8 + $0x170c] ss:$16 sps:$4 sm:$0xff]  }
 0x2fd   : > { %7060 = vmatpush1.bf16.msra.mxu0 %v10318_v44  ;;  %7716 = vmatpush1.bf16.msra.mxu1 %v10321_v45  ;;  %v10409_v44 = vld [vmem:[%s11147_s8 + $0x1700] ss:$16 sps:$4 sm:$0xff]   ;;  %v10412_v45 = vld [vmem:[%s11147_s8 + $0x1708] ss:$16 sps:$4 sm:$0xff]  }
 0x2fe   : > { %7061 = vmatprep.subr.bf16.mxu0 %v10326_v46  ;;  %7717 = vmatprep.subr.bf16.mxu1 %v10329_v47  ;;  %v10417_v46 = vld [vmem:[%s11147_s8 + $0x1724] ss:$16 sps:$4 sm:$0xff]   ;;  %v10420_v47 = vld [vmem:[%s11147_s8 + $0x172c] ss:$16 sps:$4 sm:$0xff]  }
 0x301   : > { %7062 = vmatpush1.bf16.msra.mxu0 %v10324_v50  ;;  %7718 = vmatpush1.bf16.msra.mxu1 %v10327_v53  ;;  %v10415_v50 = vld [vmem:[%s11147_s8 + $0x1720] ss:$16 sps:$4 sm:$0xff]   ;;  %v10418_v53 = vld [vmem:[%s11147_s8 + $0x1728] ss:$16 sps:$4 sm:$0xff]  }
 0x302   : > { %7063 = vmatprep.subr.bf16.mxu0 %v10332_v54  ;;  %7719 = vmatprep.subr.bf16.mxu1 %v10335_v55  ;;  %v10423_v54 = vld [vmem:[%s11147_s8 + $0x1744] ss:$16 sps:$4 sm:$0xff]   ;;  %v10426_v55 = vld [vmem:[%s11147_s8 + $0x174c] ss:$16 sps:$4 sm:$0xff]  }
 0x305   : > { %7064 = vmatpush1.bf16.msra.mxu0 %v10330_v38  ;;  %7720 = vmatpush1.bf16.msra.mxu1 %v10333_v56  ;;  %v10421_v38 = vld [vmem:[%s11147_s8 + $0x1740] ss:$16 sps:$4 sm:$0xff]   ;;  %v10424_v56 = vld [vmem:[%s11147_s8 + $0x1748] ss:$16 sps:$4 sm:$0xff]  }
 0x306   : > { %7065 = vmatprep.subr.bf16.mxu0 %v10338_v57  ;;  %7721 = vmatprep.subr.bf16.mxu1 %v10341_v58  ;;  %v10429_v57 = vld [vmem:[%s11147_s8 + $0x1764] ss:$16 sps:$4 sm:$0xff]   ;;  %v10432_v58 = vld [vmem:[%s11147_s8 + $0x176c] ss:$16 sps:$4 sm:$0xff]  }
 0x309   : > { %7066 = vmatpush1.bf16.msra.mxu0 %v10336_v48  ;;  %7722 = vmatpush1.bf16.msra.mxu1 %v10339_v59  ;;  %v10427_v48 = vld [vmem:[%s11147_s8 + $0x1760] ss:$16 sps:$4 sm:$0xff]   ;;  %v10430_v59 = vld [vmem:[%s11147_s8 + $0x1768] ss:$16 sps:$4 sm:$0xff]  }
 0x30a   : > { %7067 = vmatprep.subr.bf16.mxu0 %v10344_v60  ;;  %7723 = vmatprep.subr.bf16.mxu1 %v10347_v13  ;;  %v10435_v60 = vld [vmem:[%s11147_s8 + $0x1784] ss:$16 sps:$4 sm:$0xff]   ;;  %v10438_v13 = vld [vmem:[%s11147_s8 + $0x178c] ss:$16 sps:$4 sm:$0xff]  }
 0x30d   : > { %7068 = vmatpush1.bf16.msra.mxu0 %v10342_v63  ;;  %7724 = vmatpush1.bf16.msra.mxu1 %v10345_v0  ;;  %v10433_v63 = vld [vmem:[%s11147_s8 + $0x1780] ss:$16 sps:$4 sm:$0xff]   ;;  %v10436_v0 = vld [vmem:[%s11147_s8 + $0x1788] ss:$16 sps:$4 sm:$0xff]  }
 0x30e   : > { %7069 = vmatprep.subr.bf16.mxu0 %v10350_v35  ;;  %7725 = vmatprep.subr.bf16.mxu1 %v10353_v2  ;;  %v10441_v35 = vld [vmem:[%s11147_s8 + $0x17a4] ss:$16 sps:$4 sm:$0xff]   ;;  %v10444_v2 = vld [vmem:[%s11147_s8 + $0x17ac] ss:$16 sps:$4 sm:$0xff]  }
 0x311   : > { %7070 = vmatpush1.bf16.msra.mxu0 %v10348_v3  ;;  %7726 = vmatpush1.bf16.msra.mxu1 %v10351_v51  ;;  %v10439_v3 = vld [vmem:[%s11147_s8 + $0x17a0] ss:$16 sps:$4 sm:$0xff]   ;;  %v10442_v51 = vld [vmem:[%s11147_s8 + $0x17a8] ss:$16 sps:$4 sm:$0xff]  }
 0x312   : > { %7071 = vmatprep.subr.bf16.mxu0 %v10356_v4  ;;  %7727 = vmatprep.subr.bf16.mxu1 %v10359_v5  ;;  %v10447_v4 = vld [vmem:[%s11147_s8 + $0x17c4] ss:$16 sps:$4 sm:$0xff]   ;;  %v10450_v5 = vld [vmem:[%s11147_s8 + $0x17cc] ss:$16 sps:$4 sm:$0xff]  }
 0x315   : > { %7072 = vmatpush1.bf16.msra.mxu0 %v10354_v6  ;;  %7728 = vmatpush1.bf16.msra.mxu1 %v10357_v61  ;;  %v12059_v6 = vld [vmem:[%s12423_s0 + $0x18] sm:$0xff]  ;;  %v10445_v61 = vld [vmem:[%s11147_s8 + $0x17c0] ss:$16 sps:$4 sm:$0xff]  }
 0x316   : > { %7082 = vmatprep.subr.bf16.mxu0 %v10363_v7  ;;  %7738 = vmatprep.subr.bf16.mxu1 %v10366_v8  ;;  %v10448_v7 = vld [vmem:[%s11147_s8 + $0x17c8] ss:$16 sps:$4 sm:$0xff]   ;;  %v10453_v8 = vld [vmem:[%s11147_s8 + $0x17e4] ss:$16 sps:$4 sm:$0xff]  }
 0x318   : > { %7074 = vmatmul.mubr.bf16.vlgmr.msra.gmra.mrb[0].mxu0 %v11994_v62  ;;  %7730 = vmatmul.mubr.bf16.vlgmr.msra.gmra.mrb[0].mxu1 %v11994_v62 }
 0x319   : > { %7083 = vmatpush1.bf16.msra.mxu0 %v10361_v10  ;;  %7739 = vmatpush1.bf16.msra.mxu1 %v10364_v11  ;;  %v10456_v10 = vld [vmem:[%s11147_s8 + $0x17ec] ss:$16 sps:$4 sm:$0xff]   ;;  %v12067_v11 = vrot.slane %v12059_v6, %v11208_v49 }
 0x31a   : > { %7084 = vmatprep.subr.bf16.mxu0 %v10369_v12  ;;  %7740 = vmatprep.subr.bf16.mxu1 %v10372_v14  ;;  %v10451_v12 = vld [vmem:[%s11147_s8 + $0x17e0] ss:$16 sps:$4 sm:$0xff]   ;;  %v10454_v14 = vld [vmem:[%s11147_s8 + $0x17e8] ss:$16 sps:$4 sm:$0xff]  }
 0x31b   : > { %7114 = vmatprep.mubr.bf16.mxu0 %v1429_v16  ;;  %7770 = vmatprep.mubr.bf16.mxu1 %v1429_v16  ;;  %v10459_v16 = vld [vmem:[%s11147_s8 + $0x1804] ss:$16 sps:$4 sm:$0xff]  }
 0x31d   : > { %7085 = vmatpush1.bf16.msra.mxu0 %v10367_v1  ;;  %7741 = vmatpush1.bf16.msra.mxu1 %v10370_v52  ;;  %v10462_v1 = vld [vmem:[%s11147_s8 + $0x180c] ss:$16 sps:$4 sm:$0xff]   ;;  %v1445_v52 = vcombine.high %v12067_v11, %v12067_v11 }
 0x31e   : > { %7086 = vmatprep.subr.bf16.mxu0 %v10375_v17  ;;  %7742 = vmatprep.subr.bf16.mxu1 %v10378_v18  ;;  %v1427_v17 = vcombine.high %v11994_v62, %v11994_v62  ;;  %v10457_v18 = vld [vmem:[%s11147_s8 + $0x1800] ss:$16 sps:$4 sm:$0xff]  }
 0x31f   : > { %v10463_v62 = vld [vmem:[%s11147_s8 + $0x1820] ss:$16 sps:$4 sm:$0xff]  }
 0x321   : > { %7087 = vmatpush1.bf16.msra.mxu0 %v10373_v9  ;;  %7743 = vmatpush1.bf16.msra.mxu1 %v10376_v19  ;;  %v10460_v9 = vld [vmem:[%s11147_s8 + $0x1808] ss:$16 sps:$4 sm:$0xff]   ;;  %v10465_v19 = vld [vmem:[%s11147_s8 + $0x1824] ss:$16 sps:$4 sm:$0xff]  }
 0x322   : > { %7088 = vmatprep.subr.bf16.mxu0 %v10381_v20  ;;  %7744 = vmatprep.subr.bf16.mxu1 %v10384_v22  ;;  %v10468_v20 = vld [vmem:[%s11147_s8 + $0x182c] ss:$16 sps:$4 sm:$0xff]   ;;  %v12082_v22 = vrot.slane %v1445_v52, %v11208_v49  ;;  %v10544_v52 = vld [vmem:[%s11147_s8 + $0x19c8] ss:$16 sps:$4 sm:$0xff]  }
 0x325   : > { %7089 = vmatpush1.bf16.msra.mxu0 %v10379_v23  ;;  %7745 = vmatpush1.bf16.msra.mxu1 %v10382_v24  ;;  %v10466_v23 = vld [vmem:[%s11147_s8 + $0x1828] ss:$16 sps:$4 sm:$0xff]   ;;  %v10471_v24 = vld [vmem:[%s11147_s8 + $0x1844] ss:$16 sps:$4 sm:$0xff]  }
 0x326   : > { %7090 = vmatprep.subr.bf16.mxu0 %v10387_v26  ;;  %7746 = vmatprep.subr.bf16.mxu1 %v10390_v27  ;;  %v10474_v26 = vld [vmem:[%s11147_s8 + $0x184c] ss:$16 sps:$4 sm:$0xff]   ;;  %v10469_v27 = vld [vmem:[%s11147_s8 + $0x1840] ss:$16 sps:$4 sm:$0xff]  }
 0x329   : > { %7091 = vmatpush1.bf16.msra.mxu0 %v10385_v28  ;;  %7747 = vmatpush1.bf16.msra.mxu1 %v10388_v29  ;;  %v10472_v28 = vld [vmem:[%s11147_s8 + $0x1848] ss:$16 sps:$4 sm:$0xff]   ;;  %v10477_v29 = vld [vmem:[%s11147_s8 + $0x1864] ss:$16 sps:$4 sm:$0xff]  }
 0x32a   : > { %7092 = vmatprep.subr.bf16.mxu0 %v10393_v30  ;;  %7748 = vmatprep.subr.bf16.mxu1 %v10396_v15  ;;  %v10480_v30 = vld [vmem:[%s11147_s8 + $0x186c] ss:$16 sps:$4 sm:$0xff]   ;;  %v10475_v15 = vld [vmem:[%s11147_s8 + $0x1860] ss:$16 sps:$4 sm:$0xff]  }
 0x32d   : > { %7093 = vmatpush1.bf16.msra.mxu0 %v10391_v31  ;;  %7749 = vmatpush1.bf16.msra.mxu1 %v10394_v32  ;;  %v10478_v31 = vld [vmem:[%s11147_s8 + $0x1868] ss:$16 sps:$4 sm:$0xff]   ;;  %v10483_v32 = vld [vmem:[%s11147_s8 + $0x1884] ss:$16 sps:$4 sm:$0xff]  }
 0x32e   : > { %7094 = vmatprep.subr.bf16.mxu0 %v10399_v33  ;;  %7750 = vmatprep.subr.bf16.mxu1 %v10402_v25  ;;  %v10486_v33 = vld [vmem:[%s11147_s8 + $0x188c] ss:$16 sps:$4 sm:$0xff]   ;;  %v10481_v25 = vld [vmem:[%s11147_s8 + $0x1880] ss:$16 sps:$4 sm:$0xff]  }
 0x331   : > { %7095 = vmatpush1.bf16.msra.mxu0 %v10397_v34  ;;  %7751 = vmatpush1.bf16.msra.mxu1 %v10400_v36  ;;  %v10484_v34 = vld [vmem:[%s11147_s8 + $0x1888] ss:$16 sps:$4 sm:$0xff]   ;;  %v10489_v36 = vld [vmem:[%s11147_s8 + $0x18a4] ss:$16 sps:$4 sm:$0xff]  }
 0x332   : > { %7096 = vmatprep.subr.bf16.mxu0 %v10405_v37  ;;  %7752 = vmatprep.subr.bf16.mxu1 %v10408_v39  ;;  %v10492_v37 = vld [vmem:[%s11147_s8 + $0x18ac] ss:$16 sps:$4 sm:$0xff]   ;;  %v10487_v39 = vld [vmem:[%s11147_s8 + $0x18a0] ss:$16 sps:$4 sm:$0xff]  }
 0x335   : > { %7097 = vmatpush1.bf16.msra.mxu0 %v10403_v40  ;;  %7753 = vmatpush1.bf16.msra.mxu1 %v10406_v21  ;;  %v10490_v40 = vld [vmem:[%s11147_s8 + $0x18a8] ss:$16 sps:$4 sm:$0xff]   ;;  %v10495_v21 = vld [vmem:[%s11147_s8 + $0x18c4] ss:$16 sps:$4 sm:$0xff]  }
 0x336   : > { %7098 = vmatprep.subr.bf16.mxu0 %v10411_v41  ;;  %7754 = vmatprep.subr.bf16.mxu1 %v10414_v43  ;;  %v10498_v41 = vld [vmem:[%s11147_s8 + $0x18cc] ss:$16 sps:$4 sm:$0xff]   ;;  %v10493_v43 = vld [vmem:[%s11147_s8 + $0x18c0] ss:$16 sps:$4 sm:$0xff]  }
 0x339   : > { %7099 = vmatpush1.bf16.msra.mxu0 %v10409_v44  ;;  %7755 = vmatpush1.bf16.msra.mxu1 %v10412_v45  ;;  %v10496_v44 = vld [vmem:[%s11147_s8 + $0x18c8] ss:$16 sps:$4 sm:$0xff]   ;;  %v10501_v45 = vld [vmem:[%s11147_s8 + $0x18e4] ss:$16 sps:$4 sm:$0xff]  }
 0x33a   : > { %7100 = vmatprep.subr.bf16.mxu0 %v10417_v46  ;;  %7756 = vmatprep.subr.bf16.mxu1 %v10420_v47  ;;  %v10504_v46 = vld [vmem:[%s11147_s8 + $0x18ec] ss:$16 sps:$4 sm:$0xff]   ;;  %v10499_v47 = vld [vmem:[%s11147_s8 + $0x18e0] ss:$16 sps:$4 sm:$0xff]  }
 0x33d   : > { %7101 = vmatpush1.bf16.msra.mxu0 %v10415_v50  ;;  %7757 = vmatpush1.bf16.msra.mxu1 %v10418_v53  ;;  %v10502_v50 = vld [vmem:[%s11147_s8 + $0x18e8] ss:$16 sps:$4 sm:$0xff]   ;;  %v10507_v53 = vld [vmem:[%s11147_s8 + $0x1904] ss:$16 sps:$4 sm:$0xff]  }
 0x33e   : > { %7102 = vmatprep.subr.bf16.mxu0 %v10423_v54  ;;  %7758 = vmatprep.subr.bf16.mxu1 %v10426_v55  ;;  %v10510_v54 = vld [vmem:[%s11147_s8 + $0x190c] ss:$16 sps:$4 sm:$0xff]   ;;  %v10505_v55 = vld [vmem:[%s11147_s8 + $0x1900] ss:$16 sps:$4 sm:$0xff]  }
 0x341   : > { %7103 = vmatpush1.bf16.msra.mxu0 %v10421_v38  ;;  %7759 = vmatpush1.bf16.msra.mxu1 %v10424_v56  ;;  %v10508_v38 = vld [vmem:[%s11147_s8 + $0x1908] ss:$16 sps:$4 sm:$0xff]   ;;  %v10513_v56 = vld [vmem:[%s11147_s8 + $0x1924] ss:$16 sps:$4 sm:$0xff]  }
 0x342   : > { %7104 = vmatprep.subr.bf16.mxu0 %v10429_v57  ;;  %7760 = vmatprep.subr.bf16.mxu1 %v10432_v58  ;;  %v10516_v57 = vld [vmem:[%s11147_s8 + $0x192c] ss:$16 sps:$4 sm:$0xff]   ;;  %v10511_v58 = vld [vmem:[%s11147_s8 + $0x1920] ss:$16 sps:$4 sm:$0xff]  }
 0x345   : > { %7105 = vmatpush1.bf16.msra.mxu0 %v10427_v48  ;;  %7761 = vmatpush1.bf16.msra.mxu1 %v10430_v59  ;;  %v10514_v48 = vld [vmem:[%s11147_s8 + $0x1928] ss:$16 sps:$4 sm:$0xff]   ;;  %v10519_v59 = vld [vmem:[%s11147_s8 + $0x1944] ss:$16 sps:$4 sm:$0xff]  }
 0x346   : > { %7106 = vmatprep.subr.bf16.mxu0 %v10435_v60  ;;  %7762 = vmatprep.subr.bf16.mxu1 %v10438_v13  ;;  %v10522_v60 = vld [vmem:[%s11147_s8 + $0x194c] ss:$16 sps:$4 sm:$0xff]   ;;  %v10517_v13 = vld [vmem:[%s11147_s8 + $0x1940] ss:$16 sps:$4 sm:$0xff]  }
 0x349   : > { %7107 = vmatpush1.bf16.msra.mxu0 %v10433_v63  ;;  %7763 = vmatpush1.bf16.msra.mxu1 %v10436_v0  ;;  %v10520_v63 = vld [vmem:[%s11147_s8 + $0x1948] ss:$16 sps:$4 sm:$0xff]   ;;  %v10525_v0 = vld [vmem:[%s11147_s8 + $0x1964] ss:$16 sps:$4 sm:$0xff]  }
 0x34a   : > { %7108 = vmatprep.subr.bf16.mxu0 %v10441_v35  ;;  %7764 = vmatprep.subr.bf16.mxu1 %v10444_v2  ;;  %v10528_v35 = vld [vmem:[%s11147_s8 + $0x196c] ss:$16 sps:$4 sm:$0xff]   ;;  %v10523_v2 = vld [vmem:[%s11147_s8 + $0x1960] ss:$16 sps:$4 sm:$0xff]  }
 0x34d   : > { %7109 = vmatpush1.bf16.msra.mxu0 %v10439_v3  ;;  %7765 = vmatpush1.bf16.msra.mxu1 %v10442_v51  ;;  %v10526_v3 = vld [vmem:[%s11147_s8 + $0x1968] ss:$16 sps:$4 sm:$0xff]   ;;  %v10531_v51 = vld [vmem:[%s11147_s8 + $0x1984] ss:$16 sps:$4 sm:$0xff]  }
 0x34e   : > { %7110 = vmatprep.subr.bf16.mxu0 %v10447_v4  ;;  %7766 = vmatprep.subr.bf16.mxu1 %v10450_v5  ;;  %v10534_v4 = vld [vmem:[%s11147_s8 + $0x198c] ss:$16 sps:$4 sm:$0xff]   ;;  %v10529_v5 = vld [vmem:[%s11147_s8 + $0x1980] ss:$16 sps:$4 sm:$0xff]  }
 0x351   : > { %7111 = vmatpush1.bf16.msra.mxu0 %v10445_v61  ;;  %7767 = vmatpush1.bf16.msra.mxu1 %v10448_v7  ;;  %v10532_v61 = vld [vmem:[%s11147_s8 + $0x1988] ss:$16 sps:$4 sm:$0xff]   ;;  %v10537_v7 = vld [vmem:[%s11147_s8 + $0x19a4] ss:$16 sps:$4 sm:$0xff]  }
 0x352   : > { %7112 = vmatprep.subr.bf16.mxu0 %v10453_v8  ;;  %7768 = vmatprep.subr.bf16.mxu1 %v10456_v10  ;;  %v10540_v8 = vld [vmem:[%s11147_s8 + $0x19ac] ss:$16 sps:$4 sm:$0xff]   ;;  %v10535_v10 = vld [vmem:[%s11147_s8 + $0x19a0] ss:$16 sps:$4 sm:$0xff]  }
 0x355   : > { %7113 = vmatpush1.bf16.msra.mxu0 %v10451_v12  ;;  %7769 = vmatpush1.bf16.msra.mxu1 %v10454_v14  ;;  %v10538_v12 = vld [vmem:[%s11147_s8 + $0x19a8] ss:$16 sps:$4 sm:$0xff]   ;;  %v10543_v14 = vld [vmem:[%s11147_s8 + $0x19c4] ss:$16 sps:$4 sm:$0xff]  }
 0x356   : > { %7123 = vmatprep.subr.bf16.mxu0 %v10459_v16  ;;  %7779 = vmatprep.subr.bf16.mxu1 %v10462_v1  ;;  %v10546_v16 = vld [vmem:[%s11147_s8 + $0x19cc] ss:$16 sps:$4 sm:$0xff]   ;;  %v10541_v1 = vld [vmem:[%s11147_s8 + $0x19c0] ss:$16 sps:$4 sm:$0xff]  }
 0x358   : > { %7115 = vmatmul.mubr.bf16.vlgmr.msra.gmra.mrb[0].mxu0 %v1427_v17  ;;  %7771 = vmatmul.mubr.bf16.vlgmr.msra.gmra.mrb[0].mxu1 %v1427_v17  ;;  %v10549_v17 = vld [vmem:[%s11147_s8 + $0x19e4] ss:$16 sps:$4 sm:$0xff]  }
 0x359   : > { %7124 = vmatpush1.bf16.msra.mxu0 %v10457_v18  ;;  %7780 = vmatpush1.bf16.msra.mxu1 %v10460_v9  ;;  %v10552_v18 = vld [vmem:[%s11147_s8 + $0x19ec] ss:$16 sps:$4 sm:$0xff]   ;;  %v10547_v9 = vld [vmem:[%s11147_s8 + $0x19e0] ss:$16 sps:$4 sm:$0xff]  }
 0x35a   : > { %7125 = vmatprep.subr.bf16.mxu0 %v10465_v19  ;;  %7781 = vmatprep.subr.bf16.mxu1 %v10468_v20  ;;  %v10550_v19 = vld [vmem:[%s11147_s8 + $0x19e8] ss:$16 sps:$4 sm:$0xff]   ;;  %v10555_v20 = vld [vmem:[%s11147_s8 + $0x1a04] ss:$16 sps:$4 sm:$0xff]  }
 0x35b   : > { %7155 = vmatprep.mubr.bf16.mxu0 %v12082_v22  ;;  %7811 = vmatprep.mubr.bf16.mxu1 %v12082_v22 }
 0x35d   : > { %7126 = vmatpush1.bf16.msra.mxu0 %v10463_v62  ;;  %7782 = vmatpush1.bf16.msra.mxu1 %v10466_v23  ;;  %v10558_v62 = vld [vmem:[%s11147_s8 + $0x1a0c] ss:$16 sps:$4 sm:$0xff]   ;;  %v12148_v23 = vrot.slane %v12067_v11, %v11208_v49  ;;  %v10559_v11 = vld [vmem:[%s11147_s8 + $0x1a20] ss:$16 sps:$4 sm:$0xff]  }
 0x35e   : > { %7127 = vmatprep.subr.bf16.mxu0 %v10471_v24  ;;  %7783 = vmatprep.subr.bf16.mxu1 %v10474_v26  ;;  %v10553_v24 = vld [vmem:[%s11147_s8 + $0x1a00] ss:$16 sps:$4 sm:$0xff]   ;;  %v10556_v26 = vld [vmem:[%s11147_s8 + $0x1a08] ss:$16 sps:$4 sm:$0xff]  }
 0x361   : > { %7128 = vmatpush1.bf16.msra.mxu0 %v10469_v27  ;;  %7784 = vmatpush1.bf16.msra.mxu1 %v10472_v28  ;;  %v10561_v27 = vld [vmem:[%s11147_s8 + $0x1a24] ss:$16 sps:$4 sm:$0xff]   ;;  %v10564_v28 = vld [vmem:[%s11147_s8 + $0x1a2c] ss:$16 sps:$4 sm:$0xff]  }
 0x362   : > { %7129 = vmatprep.subr.bf16.mxu0 %v10477_v29  ;;  %7785 = vmatprep.subr.bf16.mxu1 %v10480_v30  ;;  %v1477_v29 = vcombine.high %v12082_v22, %v12082_v22  ;;  %v10562_v30 = vld [vmem:[%s11147_s8 + $0x1a28] ss:$16 sps:$4 sm:$0xff]   ;;  %v10565_v22 = vld [vmem:[%s11147_s8 + $0x1a40] ss:$16 sps:$4 sm:$0xff]  }
 0x365   : > { %7130 = vmatpush1.bf16.msra.mxu0 %v10475_v15  ;;  %7786 = vmatpush1.bf16.msra.mxu1 %v10478_v31  ;;  %v10567_v15 = vld [vmem:[%s11147_s8 + $0x1a44] ss:$16 sps:$4 sm:$0xff]   ;;  %v10570_v31 = vld [vmem:[%s11147_s8 + $0x1a4c] ss:$16 sps:$4 sm:$0xff]  }
 0x366   : > { %7131 = vmatprep.subr.bf16.mxu0 %v10483_v32  ;;  %7787 = vmatprep.subr.bf16.mxu1 %v10486_v33  ;;  %v10568_v32 = vld [vmem:[%s11147_s8 + $0x1a48] ss:$16 sps:$4 sm:$0xff]   ;;  %v10573_v33 = vld [vmem:[%s11147_s8 + $0x1a64] ss:$16 sps:$4 sm:$0xff]  }
 0x369   : > { %7132 = vmatpush1.bf16.msra.mxu0 %v10481_v25  ;;  %7788 = vmatpush1.bf16.msra.mxu1 %v10484_v34  ;;  %v10576_v25 = vld [vmem:[%s11147_s8 + $0x1a6c] ss:$16 sps:$4 sm:$0xff]   ;;  %v10571_v34 = vld [vmem:[%s11147_s8 + $0x1a60] ss:$16 sps:$4 sm:$0xff]  }
 0x36a   : > { %7133 = vmatprep.subr.bf16.mxu0 %v10489_v36  ;;  %7789 = vmatprep.subr.bf16.mxu1 %v10492_v37  ;;  %v10574_v36 = vld [vmem:[%s11147_s8 + $0x1a68] ss:$16 sps:$4 sm:$0xff]   ;;  %v10579_v37 = vld [vmem:[%s11147_s8 + $0x1a84] ss:$16 sps:$4 sm:$0xff]  }
 0x36d   : > { %7134 = vmatpush1.bf16.msra.mxu0 %v10487_v39  ;;  %7790 = vmatpush1.bf16.msra.mxu1 %v10490_v40  ;;  %v10582_v39 = vld [vmem:[%s11147_s8 + $0x1a8c] ss:$16 sps:$4 sm:$0xff]   ;;  %v10577_v40 = vld [vmem:[%s11147_s8 + $0x1a80] ss:$16 sps:$4 sm:$0xff]  }
 0x36e   : > { %7135 = vmatprep.subr.bf16.mxu0 %v10495_v21  ;;  %7791 = vmatprep.subr.bf16.mxu1 %v10498_v41  ;;  %v10580_v21 = vld [vmem:[%s11147_s8 + $0x1a88] ss:$16 sps:$4 sm:$0xff]   ;;  %v10585_v41 = vld [vmem:[%s11147_s8 + $0x1aa4] ss:$16 sps:$4 sm:$0xff]  }
 0x371   : > { %7136 = vmatpush1.bf16.msra.mxu0 %v10493_v43  ;;  %7792 = vmatpush1.bf16.msra.mxu1 %v10496_v44  ;;  %v10588_v43 = vld [vmem:[%s11147_s8 + $0x1aac] ss:$16 sps:$4 sm:$0xff]   ;;  %v10583_v44 = vld [vmem:[%s11147_s8 + $0x1aa0] ss:$16 sps:$4 sm:$0xff]  }
 0x372   : > { %7137 = vmatprep.subr.bf16.mxu0 %v10501_v45  ;;  %7793 = vmatprep.subr.bf16.mxu1 %v10504_v46  ;;  %v10586_v45 = vld [vmem:[%s11147_s8 + $0x1aa8] ss:$16 sps:$4 sm:$0xff]   ;;  %v10591_v46 = vld [vmem:[%s11147_s8 + $0x1ac4] ss:$16 sps:$4 sm:$0xff]  }
 0x375   : > { %7138 = vmatpush1.bf16.msra.mxu0 %v10499_v47  ;;  %7794 = vmatpush1.bf16.msra.mxu1 %v10502_v50  ;;  %v10594_v47 = vld [vmem:[%s11147_s8 + $0x1acc] ss:$16 sps:$4 sm:$0xff]   ;;  %v10589_v50 = vld [vmem:[%s11147_s8 + $0x1ac0] ss:$16 sps:$4 sm:$0xff]  }
 0x376   : > { %7139 = vmatprep.subr.bf16.mxu0 %v10507_v53  ;;  %7795 = vmatprep.subr.bf16.mxu1 %v10510_v54  ;;  %v10592_v53 = vld [vmem:[%s11147_s8 + $0x1ac8] ss:$16 sps:$4 sm:$0xff]   ;;  %v10597_v54 = vld [vmem:[%s11147_s8 + $0x1ae4] ss:$16 sps:$4 sm:$0xff]  }
 0x379   : > { %7140 = vmatpush1.bf16.msra.mxu0 %v10505_v55  ;;  %7796 = vmatpush1.bf16.msra.mxu1 %v10508_v38  ;;  %v10600_v55 = vld [vmem:[%s11147_s8 + $0x1aec] ss:$16 sps:$4 sm:$0xff]   ;;  %v10595_v38 = vld [vmem:[%s11147_s8 + $0x1ae0] ss:$16 sps:$4 sm:$0xff]  }
 0x37a   : > { %7141 = vmatprep.subr.bf16.mxu0 %v10513_v56  ;;  %7797 = vmatprep.subr.bf16.mxu1 %v10516_v57  ;;  %v10598_v56 = vld [vmem:[%s11147_s8 + $0x1ae8] ss:$16 sps:$4 sm:$0xff]   ;;  %v10603_v57 = vld [vmem:[%s11147_s8 + $0x1b04] ss:$16 sps:$4 sm:$0xff]  }
 0x37d   : > { %7142 = vmatpush1.bf16.msra.mxu0 %v10511_v58  ;;  %7798 = vmatpush1.bf16.msra.mxu1 %v10514_v48  ;;  %v10606_v58 = vld [vmem:[%s11147_s8 + $0x1b0c] ss:$16 sps:$4 sm:$0xff]   ;;  %v10601_v48 = vld [vmem:[%s11147_s8 + $0x1b00] ss:$16 sps:$4 sm:$0xff]  }
 0x37e   : > { %7143 = vmatprep.subr.bf16.mxu0 %v10519_v59  ;;  %7799 = vmatprep.subr.bf16.mxu1 %v10522_v60  ;;  %v10604_v59 = vld [vmem:[%s11147_s8 + $0x1b08] ss:$16 sps:$4 sm:$0xff]   ;;  %v10609_v60 = vld [vmem:[%s11147_s8 + $0x1b24] ss:$16 sps:$4 sm:$0xff]  }
 0x381   : > { %7144 = vmatpush1.bf16.msra.mxu0 %v10517_v13  ;;  %7800 = vmatpush1.bf16.msra.mxu1 %v10520_v63  ;;  %v10612_v13 = vld [vmem:[%s11147_s8 + $0x1b2c] ss:$16 sps:$4 sm:$0xff]   ;;  %v10607_v63 = vld [vmem:[%s11147_s8 + $0x1b20] ss:$16 sps:$4 sm:$0xff]  }
 0x382   : > { %7145 = vmatprep.subr.bf16.mxu0 %v10525_v0  ;;  %7801 = vmatprep.subr.bf16.mxu1 %v10528_v35  ;;  %v10610_v0 = vld [vmem:[%s11147_s8 + $0x1b28] ss:$16 sps:$4 sm:$0xff]   ;;  %v10615_v35 = vld [vmem:[%s11147_s8 + $0x1b44] ss:$16 sps:$4 sm:$0xff]  }
 0x385   : > { %7146 = vmatpush1.bf16.msra.mxu0 %v10523_v2  ;;  %7802 = vmatpush1.bf16.msra.mxu1 %v10526_v3  ;;  %v10618_v2 = vld [vmem:[%s11147_s8 + $0x1b4c] ss:$16 sps:$4 sm:$0xff]   ;;  %v10613_v3 = vld [vmem:[%s11147_s8 + $0x1b40] ss:$16 sps:$4 sm:$0xff]  }
 0x386   : > { %7147 = vmatprep.subr.bf16.mxu0 %v10531_v51  ;;  %7803 = vmatprep.subr.bf16.mxu1 %v10534_v4  ;;  %v10616_v51 = vld [vmem:[%s11147_s8 + $0x1b48] ss:$16 sps:$4 sm:$0xff]   ;;  %v10621_v4 = vld [vmem:[%s11147_s8 + $0x1b64] ss:$16 sps:$4 sm:$0xff]  }
 0x389   : > { %7148 = vmatpush1.bf16.msra.mxu0 %v10529_v5  ;;  %7804 = vmatpush1.bf16.msra.mxu1 %v10532_v61  ;;  %v10624_v5 = vld [vmem:[%s11147_s8 + $0x1b6c] ss:$16 sps:$4 sm:$0xff]   ;;  %v10619_v61 = vld [vmem:[%s11147_s8 + $0x1b60] ss:$16 sps:$4 sm:$0xff]  }
 0x38a   : > { %7149 = vmatprep.subr.bf16.mxu0 %v10537_v7  ;;  %7805 = vmatprep.subr.bf16.mxu1 %v10540_v8  ;;  %v10622_v7 = vld [vmem:[%s11147_s8 + $0x1b68] ss:$16 sps:$4 sm:$0xff]   ;;  %v10627_v8 = vld [vmem:[%s11147_s8 + $0x1b84] ss:$16 sps:$4 sm:$0xff]  }
 0x38d   : > { %7150 = vmatpush1.bf16.msra.mxu0 %v10535_v10  ;;  %7806 = vmatpush1.bf16.msra.mxu1 %v10538_v12  ;;  %v10630_v10 = vld [vmem:[%s11147_s8 + $0x1b8c] ss:$16 sps:$4 sm:$0xff]   ;;  %v10625_v12 = vld [vmem:[%s11147_s8 + $0x1b80] ss:$16 sps:$4 sm:$0xff]  }
 0x38e   : > { %7151 = vmatprep.subr.bf16.mxu0 %v10543_v14  ;;  %7807 = vmatprep.subr.bf16.mxu1 %v10546_v16  ;;  %v10628_v14 = vld [vmem:[%s11147_s8 + $0x1b88] ss:$16 sps:$4 sm:$0xff]   ;;  %v10633_v16 = vld [vmem:[%s11147_s8 + $0x1ba4] ss:$16 sps:$4 sm:$0xff]  }
 0x391   : > { %7152 = vmatpush1.bf16.msra.mxu0 %v10541_v1  ;;  %7808 = vmatpush1.bf16.msra.mxu1 %v10544_v52  ;;  %v10636_v1 = vld [vmem:[%s11147_s8 + $0x1bac] ss:$16 sps:$4 sm:$0xff]   ;;  %v10631_v52 = vld [vmem:[%s11147_s8 + $0x1ba0] ss:$16 sps:$4 sm:$0xff]  }
 0x392   : > { %7153 = vmatprep.subr.bf16.mxu0 %v10549_v17  ;;  %7809 = vmatprep.subr.bf16.mxu1 %v10552_v18  ;;  %v10634_v17 = vld [vmem:[%s11147_s8 + $0x1ba8] ss:$16 sps:$4 sm:$0xff]   ;;  %v10639_v18 = vld [vmem:[%s11147_s8 + $0x1bc4] ss:$16 sps:$4 sm:$0xff]  }
 0x395   : > { %7154 = vmatpush1.bf16.msra.mxu0 %v10547_v9  ;;  %7810 = vmatpush1.bf16.msra.mxu1 %v10550_v19  ;;  %v10642_v9 = vld [vmem:[%s11147_s8 + $0x1bcc] ss:$16 sps:$4 sm:$0xff]   ;;  %v1430_v19 = vcombine.high %v12059_v6, %v12059_v6  ;;  %v10643_v6 = vld [vmem:[%s11147_s8 + $0x1be0] ss:$16 sps:$4 sm:$0xff]  }
 0x396   : > { %7164 = vmatprep.subr.bf16.mxu0 %v10555_v20  ;;  %7820 = vmatprep.subr.bf16.mxu1 %v10558_v62  ;;  %v10637_v20 = vld [vmem:[%s11147_s8 + $0x1bc0] ss:$16 sps:$4 sm:$0xff]   ;;  %v10640_v62 = vld [vmem:[%s11147_s8 + $0x1bc8] ss:$16 sps:$4 sm:$0xff]  }
 0x398   : > { %7156 = vmatmul.mubr.bf16.vlgmr.msra.gmra.mrb[0].mxu0 %v12148_v23  ;;  %7812 = vmatmul.mubr.bf16.vlgmr.msra.gmra.mrb[0].mxu1 %v12148_v23 }
 0x399   : > { %7165 = vmatpush1.bf16.msra.mxu0 %v10553_v24  ;;  %7821 = vmatpush1.bf16.msra.mxu1 %v10556_v26  ;;  %v10645_v24 = vld [vmem:[%s11147_s8 + $0x1be4] ss:$16 sps:$4 sm:$0xff]   ;;  %v10648_v26 = vld [vmem:[%s11147_s8 + $0x1bec] ss:$16 sps:$4 sm:$0xff]  }
 0x39a   : > { %7166 = vmatprep.subr.bf16.mxu0 %v10561_v27  ;;  %7822 = vmatprep.subr.bf16.mxu1 %v10564_v28  ;;  %v12217_v27 = vrot.slane %v1430_v19, %v11208_v49  ;;  %v10646_v28 = vld [vmem:[%s11147_s8 + $0x1be8] ss:$16 sps:$4 sm:$0xff]  }
 0x39b   : > { %7196 = vmatprep.mubr.bf16.mxu0 %v1477_v29  ;;  %7852 = vmatprep.mubr.bf16.mxu1 %v1477_v29  ;;  %v10651_v29 = vld [vmem:[%s11147_s8 + $0x1c04] ss:$16 sps:$4 sm:$0xff]   ;;  %v10724_v19 = vld [vmem:[%s11147_s8 + $0x1d88] ss:$16 sps:$4 sm:$0xff]  }
 0x39d   : > { %7167 = vmatpush1.bf16.msra.mxu0 %v10559_v11  ;;  %7823 = vmatpush1.bf16.msra.mxu1 %v10562_v30  ;;  %v10654_v11 = vld [vmem:[%s11147_s8 + $0x1c0c] ss:$16 sps:$4 sm:$0xff]   ;;  %v1446_v30 = vcombine.high %v12217_v27, %v12217_v27 }
 0x39e   : > { %7168 = vmatprep.subr.bf16.mxu0 %v10567_v15  ;;  %7824 = vmatprep.subr.bf16.mxu1 %v10570_v31  ;;  %v1475_v15 = vcombine.high %v12148_v23, %v12148_v23  ;;  %v10649_v31 = vld [vmem:[%s11147_s8 + $0x1c00] ss:$16 sps:$4 sm:$0xff]  }
 0x39f   : > { %v10655_v23 = vld [vmem:[%s11147_s8 + $0x1c20] ss:$16 sps:$4 sm:$0xff]  }
 0x3a1   : > { %7169 = vmatpush1.bf16.msra.mxu0 %v10565_v22  ;;  %7825 = vmatpush1.bf16.msra.mxu1 %v10568_v32  ;;  %v10652_v22 = vld [vmem:[%s11147_s8 + $0x1c08] ss:$16 sps:$4 sm:$0xff]   ;;  %v10657_v32 = vld [vmem:[%s11147_s8 + $0x1c24] ss:$16 sps:$4 sm:$0xff]  }
 0x3a2   : > { %7170 = vmatprep.subr.bf16.mxu0 %v10573_v33  ;;  %7826 = vmatprep.subr.bf16.mxu1 %v10576_v25  ;;  %v10660_v33 = vld [vmem:[%s11147_s8 + $0x1c2c] ss:$16 sps:$4 sm:$0xff]   ;;  %v12232_v25 = vrot.slane %v1446_v30, %v11208_v49  ;;  %v10741_v30 = vld [vmem:[%s11147_s8 + $0x1de4] ss:$16 sps:$4 sm:$0xff]  }
 0x3a5   : > { %7171 = vmatpush1.bf16.msra.mxu0 %v10571_v34  ;;  %7827 = vmatpush1.bf16.msra.mxu1 %v10574_v36  ;;  %v10658_v34 = vld [vmem:[%s11147_s8 + $0x1c28] ss:$16 sps:$4 sm:$0xff]   ;;  %v10663_v36 = vld [vmem:[%s11147_s8 + $0x1c44] ss:$16 sps:$4 sm:$0xff]  }
 0x3a6   : > { %7172 = vmatprep.subr.bf16.mxu0 %v10579_v37  ;;  %7828 = vmatprep.subr.bf16.mxu1 %v10582_v39  ;;  %v10666_v37 = vld [vmem:[%s11147_s8 + $0x1c4c] ss:$16 sps:$4 sm:$0xff]   ;;  %v10661_v39 = vld [vmem:[%s11147_s8 + $0x1c40] ss:$16 sps:$4 sm:$0xff]  }
 0x3a9   : > { %7173 = vmatpush1.bf16.msra.mxu0 %v10577_v40  ;;  %7829 = vmatpush1.bf16.msra.mxu1 %v10580_v21  ;;  %v10664_v40 = vld [vmem:[%s11147_s8 + $0x1c48] ss:$16 sps:$4 sm:$0xff]   ;;  %v10669_v21 = vld [vmem:[%s11147_s8 + $0x1c64] ss:$16 sps:$4 sm:$0xff]  }
 0x3aa   : > { %7174 = vmatprep.subr.bf16.mxu0 %v10585_v41  ;;  %7830 = vmatprep.subr.bf16.mxu1 %v10588_v43  ;;  %v10672_v41 = vld [vmem:[%s11147_s8 + $0x1c6c] ss:$16 sps:$4 sm:$0xff]   ;;  %v10667_v43 = vld [vmem:[%s11147_s8 + $0x1c60] ss:$16 sps:$4 sm:$0xff]  }
 0x3ad   : > { %7175 = vmatpush1.bf16.msra.mxu0 %v10583_v44  ;;  %7831 = vmatpush1.bf16.msra.mxu1 %v10586_v45  ;;  %v10670_v44 = vld [vmem:[%s11147_s8 + $0x1c68] ss:$16 sps:$4 sm:$0xff]   ;;  %v10675_v45 = vld [vmem:[%s11147_s8 + $0x1c84] ss:$16 sps:$4 sm:$0xff]  }
 0x3ae   : > { %7176 = vmatprep.subr.bf16.mxu0 %v10591_v46  ;;  %7832 = vmatprep.subr.bf16.mxu1 %v10594_v47  ;;  %v10678_v46 = vld [vmem:[%s11147_s8 + $0x1c8c] ss:$16 sps:$4 sm:$0xff]   ;;  %v10673_v47 = vld [vmem:[%s11147_s8 + $0x1c80] ss:$16 sps:$4 sm:$0xff]  }
 0x3b1   : > { %7177 = vmatpush1.bf16.msra.mxu0 %v10589_v50  ;;  %7833 = vmatpush1.bf16.msra.mxu1 %v10592_v53  ;;  %v10676_v50 = vld [vmem:[%s11147_s8 + $0x1c88] ss:$16 sps:$4 sm:$0xff]   ;;  %v10681_v53 = vld [vmem:[%s11147_s8 + $0x1ca4] ss:$16 sps:$4 sm:$0xff]  }
 0x3b2   : > { %7178 = vmatprep.subr.bf16.mxu0 %v10597_v54  ;;  %7834 = vmatprep.subr.bf16.mxu1 %v10600_v55  ;;  %v10684_v54 = vld [vmem:[%s11147_s8 + $0x1cac] ss:$16 sps:$4 sm:$0xff]   ;;  %v10679_v55 = vld [vmem:[%s11147_s8 + $0x1ca0] ss:$16 sps:$4 sm:$0xff]  }
 0x3b5   : > { %7179 = vmatpush1.bf16.msra.mxu0 %v10595_v38  ;;  %7835 = vmatpush1.bf16.msra.mxu1 %v10598_v56  ;;  %v10682_v38 = vld [vmem:[%s11147_s8 + $0x1ca8] ss:$16 sps:$4 sm:$0xff]   ;;  %v10687_v56 = vld [vmem:[%s11147_s8 + $0x1cc4] ss:$16 sps:$4 sm:$0xff]  }
 0x3b6   : > { %7180 = vmatprep.subr.bf16.mxu0 %v10603_v57  ;;  %7836 = vmatprep.subr.bf16.mxu1 %v10606_v58  ;;  %v10690_v57 = vld [vmem:[%s11147_s8 + $0x1ccc] ss:$16 sps:$4 sm:$0xff]   ;;  %v10685_v58 = vld [vmem:[%s11147_s8 + $0x1cc0] ss:$16 sps:$4 sm:$0xff]  }
 0x3b9   : > { %7181 = vmatpush1.bf16.msra.mxu0 %v10601_v48  ;;  %7837 = vmatpush1.bf16.msra.mxu1 %v10604_v59  ;;  %v10688_v48 = vld [vmem:[%s11147_s8 + $0x1cc8] ss:$16 sps:$4 sm:$0xff]   ;;  %v10693_v59 = vld [vmem:[%s11147_s8 + $0x1ce4] ss:$16 sps:$4 sm:$0xff]  }
 0x3ba   : > { %7182 = vmatprep.subr.bf16.mxu0 %v10609_v60  ;;  %7838 = vmatprep.subr.bf16.mxu1 %v10612_v13  ;;  %v10696_v60 = vld [vmem:[%s11147_s8 + $0x1cec] ss:$16 sps:$4 sm:$0xff]   ;;  %v10691_v13 = vld [vmem:[%s11147_s8 + $0x1ce0] ss:$16 sps:$4 sm:$0xff]  }
 0x3bd   : > { %7183 = vmatpush1.bf16.msra.mxu0 %v10607_v63  ;;  %7839 = vmatpush1.bf16.msra.mxu1 %v10610_v0  ;;  %v10694_v63 = vld [vmem:[%s11147_s8 + $0x1ce8] ss:$16 sps:$4 sm:$0xff]   ;;  %v10699_v0 = vld [vmem:[%s11147_s8 + $0x1d04] ss:$16 sps:$4 sm:$0xff]  }
 0x3be   : > { %7184 = vmatprep.subr.bf16.mxu0 %v10615_v35  ;;  %7840 = vmatprep.subr.bf16.mxu1 %v10618_v2  ;;  %v10702_v35 = vld [vmem:[%s11147_s8 + $0x1d0c] ss:$16 sps:$4 sm:$0xff]   ;;  %v10697_v2 = vld [vmem:[%s11147_s8 + $0x1d00] ss:$16 sps:$4 sm:$0xff]  }
 0x3c1   : > { %7185 = vmatpush1.bf16.msra.mxu0 %v10613_v3  ;;  %7841 = vmatpush1.bf16.msra.mxu1 %v10616_v51  ;;  %v10700_v3 = vld [vmem:[%s11147_s8 + $0x1d08] ss:$16 sps:$4 sm:$0xff]   ;;  %v10705_v51 = vld [vmem:[%s11147_s8 + $0x1d24] ss:$16 sps:$4 sm:$0xff]  }
 0x3c2   : > { %7186 = vmatprep.subr.bf16.mxu0 %v10621_v4  ;;  %7842 = vmatprep.subr.bf16.mxu1 %v10624_v5  ;;  %v10708_v4 = vld [vmem:[%s11147_s8 + $0x1d2c] ss:$16 sps:$4 sm:$0xff]   ;;  %v10703_v5 = vld [vmem:[%s11147_s8 + $0x1d20] ss:$16 sps:$4 sm:$0xff]  }
 0x3c5   : > { %7187 = vmatpush1.bf16.msra.mxu0 %v10619_v61  ;;  %7843 = vmatpush1.bf16.msra.mxu1 %v10622_v7  ;;  %v10706_v61 = vld [vmem:[%s11147_s8 + $0x1d28] ss:$16 sps:$4 sm:$0xff]   ;;  %v10711_v7 = vld [vmem:[%s11147_s8 + $0x1d44] ss:$16 sps:$4 sm:$0xff]  }
 0x3c6   : > { %7188 = vmatprep.subr.bf16.mxu0 %v10627_v8  ;;  %7844 = vmatprep.subr.bf16.mxu1 %v10630_v10  ;;  %v10714_v8 = vld [vmem:[%s11147_s8 + $0x1d4c] ss:$16 sps:$4 sm:$0xff]   ;;  %v10709_v10 = vld [vmem:[%s11147_s8 + $0x1d40] ss:$16 sps:$4 sm:$0xff]  }
 0x3c9   : > { %7189 = vmatpush1.bf16.msra.mxu0 %v10625_v12  ;;  %7845 = vmatpush1.bf16.msra.mxu1 %v10628_v14  ;;  %v10712_v12 = vld [vmem:[%s11147_s8 + $0x1d48] ss:$16 sps:$4 sm:$0xff]   ;;  %v10717_v14 = vld [vmem:[%s11147_s8 + $0x1d64] ss:$16 sps:$4 sm:$0xff]  }
 0x3ca   : > { %7190 = vmatprep.subr.bf16.mxu0 %v10633_v16  ;;  %7846 = vmatprep.subr.bf16.mxu1 %v10636_v1  ;;  %v10720_v16 = vld [vmem:[%s11147_s8 + $0x1d6c] ss:$16 sps:$4 sm:$0xff]   ;;  %v10715_v1 = vld [vmem:[%s11147_s8 + $0x1d60] ss:$16 sps:$4 sm:$0xff]  }
 0x3cd   : > { %7191 = vmatpush1.bf16.msra.mxu0 %v10631_v52  ;;  %7847 = vmatpush1.bf16.msra.mxu1 %v10634_v17  ;;  %v10718_v52 = vld [vmem:[%s11147_s8 + $0x1d68] ss:$16 sps:$4 sm:$0xff]   ;;  %v10723_v17 = vld [vmem:[%s11147_s8 + $0x1d84] ss:$16 sps:$4 sm:$0xff]  }
 0x3ce   : > { %7192 = vmatprep.subr.bf16.mxu0 %v10639_v18  ;;  %7848 = vmatprep.subr.bf16.mxu1 %v10642_v9  ;;  %v10726_v18 = vld [vmem:[%s11147_s8 + $0x1d8c] ss:$16 sps:$4 sm:$0xff]   ;;  %v10721_v9 = vld [vmem:[%s11147_s8 + $0x1d80] ss:$16 sps:$4 sm:$0xff]  }
 0x3d1   : > { %7193 = vmatpush1.bf16.msra.mxu0 %v10637_v20  ;;  %7849 = vmatpush1.bf16.msra.mxu1 %v10640_v62  ;;  %v10729_v20 = vld [vmem:[%s11147_s8 + $0x1da4] ss:$16 sps:$4 sm:$0xff]   ;;  %v10732_v62 = vld [vmem:[%s11147_s8 + $0x1dac] ss:$16 sps:$4 sm:$0xff]  }
 0x3d2   : > { %7194 = vmatprep.subr.bf16.mxu0 %v10645_v24  ;;  %7850 = vmatprep.subr.bf16.mxu1 %v10648_v26  ;;  %v10727_v24 = vld [vmem:[%s11147_s8 + $0x1da0] ss:$16 sps:$4 sm:$0xff]   ;;  %v10730_v26 = vld [vmem:[%s11147_s8 + $0x1da8] ss:$16 sps:$4 sm:$0xff]  }
 0x3d5   : > { %7195 = vmatpush1.bf16.msra.mxu0 %v10643_v6  ;;  %7851 = vmatpush1.bf16.msra.mxu1 %v10646_v28  ;;  %v10735_v6 = vld [vmem:[%s11147_s8 + $0x1dc4] ss:$16 sps:$4 sm:$0xff]   ;;  %v10738_v28 = vld [vmem:[%s11147_s8 + $0x1dcc] ss:$16 sps:$4 sm:$0xff]  }
 0x3d6   : > { %7205 = vmatprep.subr.bf16.mxu0 %v10651_v29  ;;  %7861 = vmatprep.subr.bf16.mxu1 %v10654_v11  ;;  %v10733_v29 = vld [vmem:[%s11147_s8 + $0x1dc0] ss:$16 sps:$4 sm:$0xff]   ;;  %v10736_v11 = vld [vmem:[%s11147_s8 + $0x1dc8] ss:$16 sps:$4 sm:$0xff]  }
 0x3d8   : > { %7197 = vmatmul.mubr.bf16.vlgmr.msra.gmra.mrb[0].mxu0 %v1475_v15  ;;  %7853 = vmatmul.mubr.bf16.vlgmr.msra.gmra.mrb[0].mxu1 %v1475_v15  ;;  %v10744_v15 = vld [vmem:[%s11147_s8 + $0x1dec] ss:$16 sps:$4 sm:$0xff]  }
 0x3d9   : > { %7206 = vmatpush1.bf16.msra.mxu0 %v10649_v31  ;;  %7862 = vmatpush1.bf16.msra.mxu1 %v10652_v22  ;;  %v10739_v31 = vld [vmem:[%s11147_s8 + $0x1de0] ss:$16 sps:$4 sm:$0xff]   ;;  %v10742_v22 = vld [vmem:[%s11147_s8 + $0x1de8] ss:$16 sps:$4 sm:$0xff]  }
 0x3da   : > { %7207 = vmatprep.subr.bf16.mxu0 %v10657_v32  ;;  %7863 = vmatprep.subr.bf16.mxu1 %v10660_v33  ;;  %v10748_v32 = vld [vmem:[%s11147_s8 + $0x1e04] ss:$16 sps:$4 sm:$0xff]   ;;  %v10751_v33 = vld [vmem:[%s11147_s8 + $0x1e0c] ss:$16 sps:$4 sm:$0xff]  }
 0x3db   : > { %7237 = vmatprep.mubr.bf16.mxu0 %v12232_v25  ;;  %7893 = vmatprep.mubr.bf16.mxu1 %v12232_v25 }
 0x3dd   : > { %7208 = vmatpush1.bf16.msra.mxu0 %v10655_v23  ;;  %7864 = vmatpush1.bf16.msra.mxu1 %v10658_v34  ;;  %v12298_v23 = vrot.slane %v12217_v27, %v11208_v49  ;;  %v10746_v34 = vld [vmem:[%s11147_s8 + $0x1e00] ss:$16 sps:$4 sm:$0xff]   ;;  %v10755_v27 = vld [vmem:[%s11147_s8 + $0x1e28] ss:$16 sps:$4 sm:$0xff]  }
 0x3de   : > { %7209 = vmatprep.subr.bf16.mxu0 %v10663_v36  ;;  %7865 = vmatprep.subr.bf16.mxu1 %v10666_v37  ;;  %v10749_v36 = vld [vmem:[%s11147_s8 + $0x1e08] ss:$16 sps:$4 sm:$0xff]   ;;  %v10754_v37 = vld [vmem:[%s11147_s8 + $0x1e24] ss:$16 sps:$4 sm:$0xff]   ;;  %v10752_v49 = vld [vmem:[%s11147_s8 + $0x1e20] ss:$16 sps:$4 sm:$0xff]  }
 0x3e1   : > { %7210 = vmatpush1.bf16.msra.mxu0 %v10661_v39  ;;  %7866 = vmatpush1.bf16.msra.mxu1 %v10664_v40  ;;  %v10757_v39 = vld [vmem:[%s11147_s8 + $0x1e2c] ss:$16 sps:$4 sm:$0xff]   ;;  %v1478_v40 = vcombine.high %v12232_v25, %v12232_v25  ;;  %v10758_v25 = vld [vmem:[%s11147_s8 + $0x1e40] ss:$16 sps:$4 sm:$0xff]  }
 0x3e2   : > { %7211 = vmatprep.subr.bf16.mxu0 %v10669_v21  ;;  %7867 = vmatprep.subr.bf16.mxu1 %v10672_v41  ;;  %v10760_v21 = vld [vmem:[%s11147_s8 + $0x1e44] ss:$16 sps:$4 sm:$0xff]   ;;  %v10763_v41 = vld [vmem:[%s11147_s8 + $0x1e4c] ss:$16 sps:$4 sm:$0xff]  }
 0x3e5   : > { %7212 = vmatpush1.bf16.msra.mxu0 %v10667_v43  ;;  %7868 = vmatpush1.bf16.msra.mxu1 %v10670_v44  ;;  %v10761_v43 = vld [vmem:[%s11147_s8 + $0x1e48] ss:$16 sps:$4 sm:$0xff]   ;;  %v10766_v44 = vld [vmem:[%s11147_s8 + $0x1e64] ss:$16 sps:$4 sm:$0xff]  }
 0x3e6   : > { %7213 = vmatprep.subr.bf16.mxu0 %v10675_v45  ;;  %7869 = vmatprep.subr.bf16.mxu1 %v10678_v46  ;;  %v10769_v45 = vld [vmem:[%s11147_s8 + $0x1e6c] ss:$16 sps:$4 sm:$0xff]   ;;  %v10764_v46 = vld [vmem:[%s11147_s8 + $0x1e60] ss:$16 sps:$4 sm:$0xff]  }
 0x3e9   : > { %7214 = vmatpush1.bf16.msra.mxu0 %v10673_v47  ;;  %7870 = vmatpush1.bf16.msra.mxu1 %v10676_v50  ;;  %v10767_v47 = vld [vmem:[%s11147_s8 + $0x1e68] ss:$16 sps:$4 sm:$0xff]   ;;  %v10772_v50 = vld [vmem:[%s11147_s8 + $0x1e84] ss:$16 sps:$4 sm:$0xff]  }
 0x3ea   : > { %7215 = vmatprep.subr.bf16.mxu0 %v10681_v53  ;;  %7871 = vmatprep.subr.bf16.mxu1 %v10684_v54  ;;  %v10775_v53 = vld [vmem:[%s11147_s8 + $0x1e8c] ss:$16 sps:$4 sm:$0xff]   ;;  %v10770_v54 = vld [vmem:[%s11147_s8 + $0x1e80] ss:$16 sps:$4 sm:$0xff]  }
 0x3ed   : > { %7216 = vmatpush1.bf16.msra.mxu0 %v10679_v55  ;;  %7872 = vmatpush1.bf16.msra.mxu1 %v10682_v38  ;;  %v10773_v55 = vld [vmem:[%s11147_s8 + $0x1e88] ss:$16 sps:$4 sm:$0xff]   ;;  %v10778_v38 = vld [vmem:[%s11147_s8 + $0x1ea4] ss:$16 sps:$4 sm:$0xff]  }
 0x3ee   : > { %7217 = vmatprep.subr.bf16.mxu0 %v10687_v56  ;;  %7873 = vmatprep.subr.bf16.mxu1 %v10690_v57  ;;  %v10781_v56 = vld [vmem:[%s11147_s8 + $0x1eac] ss:$16 sps:$4 sm:$0xff]   ;;  %v10776_v57 = vld [vmem:[%s11147_s8 + $0x1ea0] ss:$16 sps:$4 sm:$0xff]  }
 0x3f1   : > { %7218 = vmatpush1.bf16.msra.mxu0 %v10685_v58  ;;  %7874 = vmatpush1.bf16.msra.mxu1 %v10688_v48  ;;  %v10779_v58 = vld [vmem:[%s11147_s8 + $0x1ea8] ss:$16 sps:$4 sm:$0xff]   ;;  %v10784_v48 = vld [vmem:[%s11147_s8 + $0x1ec4] ss:$16 sps:$4 sm:$0xff]  }
 0x3f2   : > { %7219 = vmatprep.subr.bf16.mxu0 %v10693_v59  ;;  %7875 = vmatprep.subr.bf16.mxu1 %v10696_v60  ;;  %v10787_v59 = vld [vmem:[%s11147_s8 + $0x1ecc] ss:$16 sps:$4 sm:$0xff]   ;;  %v10782_v60 = vld [vmem:[%s11147_s8 + $0x1ec0] ss:$16 sps:$4 sm:$0xff]  }
 0x3f5   : > { %7220 = vmatpush1.bf16.msra.mxu0 %v10691_v13  ;;  %7876 = vmatpush1.bf16.msra.mxu1 %v10694_v63  ;;  %v10785_v13 = vld [vmem:[%s11147_s8 + $0x1ec8] ss:$16 sps:$4 sm:$0xff]   ;;  %v10790_v63 = vld [vmem:[%s11147_s8 + $0x1ee4] ss:$16 sps:$4 sm:$0xff]  }
 0x3f6   : > { %7221 = vmatprep.subr.bf16.mxu0 %v10699_v0  ;;  %7877 = vmatprep.subr.bf16.mxu1 %v10702_v35  ;;  %v10793_v0 = vld [vmem:[%s11147_s8 + $0x1eec] ss:$16 sps:$4 sm:$0xff]   ;;  %v10788_v35 = vld [vmem:[%s11147_s8 + $0x1ee0] ss:$16 sps:$4 sm:$0xff]  }
 0x3f9   : > { %7222 = vmatpush1.bf16.msra.mxu0 %v10697_v2  ;;  %7878 = vmatpush1.bf16.msra.mxu1 %v10700_v3  ;;  %v10791_v2 = vld [vmem:[%s11147_s8 + $0x1ee8] ss:$16 sps:$4 sm:$0xff]   ;;  %v10796_v3 = vld [vmem:[%s11147_s8 + $0x1f04] ss:$16 sps:$4 sm:$0xff]  }
 0x3fa   : > { %7223 = vmatprep.subr.bf16.mxu0 %v10705_v51  ;;  %7879 = vmatprep.subr.bf16.mxu1 %v10708_v4  ;;  %v10799_v51 = vld [vmem:[%s11147_s8 + $0x1f0c] ss:$16 sps:$4 sm:$0xff]   ;;  %v10794_v4 = vld [vmem:[%s11147_s8 + $0x1f00] ss:$16 sps:$4 sm:$0xff]  }
 0x3fd   : > { %7224 = vmatpush1.bf16.msra.mxu0 %v10703_v5  ;;  %7880 = vmatpush1.bf16.msra.mxu1 %v10706_v61  ;;  %v10797_v5 = vld [vmem:[%s11147_s8 + $0x1f08] ss:$16 sps:$4 sm:$0xff]   ;;  %v10802_v61 = vld [vmem:[%s11147_s8 + $0x1f24] ss:$16 sps:$4 sm:$0xff]  }
 0x3fe   : > { %7225 = vmatprep.subr.bf16.mxu0 %v10711_v7  ;;  %7881 = vmatprep.subr.bf16.mxu1 %v10714_v8  ;;  %v10805_v7 = vld [vmem:[%s11147_s8 + $0x1f2c] ss:$16 sps:$4 sm:$0xff]   ;;  %v10800_v8 = vld [vmem:[%s11147_s8 + $0x1f20] ss:$16 sps:$4 sm:$0xff]  }
 0x401   : > { %7226 = vmatpush1.bf16.msra.mxu0 %v10709_v10  ;;  %7882 = vmatpush1.bf16.msra.mxu1 %v10712_v12  ;;  %v10803_v10 = vld [vmem:[%s11147_s8 + $0x1f28] ss:$16 sps:$4 sm:$0xff]   ;;  %v10808_v12 = vld [vmem:[%s11147_s8 + $0x1f44] ss:$16 sps:$4 sm:$0xff]  }
 0x402   : > { %7227 = vmatprep.subr.bf16.mxu0 %v10717_v14  ;;  %7883 = vmatprep.subr.bf16.mxu1 %v10720_v16  ;;  %v10811_v14 = vld [vmem:[%s11147_s8 + $0x1f4c] ss:$16 sps:$4 sm:$0xff]   ;;  %v10806_v16 = vld [vmem:[%s11147_s8 + $0x1f40] ss:$16 sps:$4 sm:$0xff]  }
 0x405   : > { %7228 = vmatpush1.bf16.msra.mxu0 %v10715_v1  ;;  %7884 = vmatpush1.bf16.msra.mxu1 %v10718_v52  ;;  %v10809_v1 = vld [vmem:[%s11147_s8 + $0x1f48] ss:$16 sps:$4 sm:$0xff]   ;;  %v10814_v52 = vld [vmem:[%s11147_s8 + $0x1f64] ss:$16 sps:$4 sm:$0xff]  }
 0x406   : > { %7229 = vmatprep.subr.bf16.mxu0 %v10723_v17  ;;  %7885 = vmatprep.subr.bf16.mxu1 %v10726_v18  ;;  %v10817_v17 = vld [vmem:[%s11147_s8 + $0x1f6c] ss:$16 sps:$4 sm:$0xff]   ;;  %v10812_v18 = vld [vmem:[%s11147_s8 + $0x1f60] ss:$16 sps:$4 sm:$0xff]  }
 0x409   : > { %7230 = vmatpush1.bf16.msra.mxu0 %v10721_v9  ;;  %7886 = vmatpush1.bf16.msra.mxu1 %v10724_v19  ;;  %v10815_v9 = vld [vmem:[%s11147_s8 + $0x1f68] ss:$16 sps:$4 sm:$0xff]   ;;  %v10820_v19 = vld [vmem:[%s11147_s8 + $0x1f84] ss:$16 sps:$4 sm:$0xff]  }
 0x40a   : > { %7231 = vmatprep.subr.bf16.mxu0 %v10729_v20  ;;  %7887 = vmatprep.subr.bf16.mxu1 %v10732_v62  ;;  %v10823_v20 = vld [vmem:[%s11147_s8 + $0x1f8c] ss:$16 sps:$4 sm:$0xff]   ;;  %v10818_v62 = vld [vmem:[%s11147_s8 + $0x1f80] ss:$16 sps:$4 sm:$0xff]  }
 0x40d   : > { %7232 = vmatpush1.bf16.msra.mxu0 %v10727_v24  ;;  %7888 = vmatpush1.bf16.msra.mxu1 %v10730_v26  ;;  %v10821_v24 = vld [vmem:[%s11147_s8 + $0x1f88] ss:$16 sps:$4 sm:$0xff]   ;;  %v10826_v26 = vld [vmem:[%s11147_s8 + $0x1fa4] ss:$16 sps:$4 sm:$0xff]  }
 0x40e   : > { %7233 = vmatprep.subr.bf16.mxu0 %v10735_v6  ;;  %7889 = vmatprep.subr.bf16.mxu1 %v10738_v28  ;;  %v10829_v6 = vld [vmem:[%s11147_s8 + $0x1fac] ss:$16 sps:$4 sm:$0xff]   ;;  %v10824_v28 = vld [vmem:[%s11147_s8 + $0x1fa0] ss:$16 sps:$4 sm:$0xff]  }
 0x411   : > { %7234 = vmatpush1.bf16.msra.mxu0 %v10733_v29  ;;  %7890 = vmatpush1.bf16.msra.mxu1 %v10736_v11  ;;  %v10827_v29 = vld [vmem:[%s11147_s8 + $0x1fa8] ss:$16 sps:$4 sm:$0xff]   ;;  %v10832_v11 = vld [vmem:[%s11147_s8 + $0x1fc4] ss:$16 sps:$4 sm:$0xff]  }
 0x412   : > { %7235 = vmatprep.subr.bf16.mxu0 %v10741_v30  ;;  %7891 = vmatprep.subr.bf16.mxu1 %v10744_v15  ;;  %v10835_v30 = vld [vmem:[%s11147_s8 + $0x1fcc] ss:$16 sps:$4 sm:$0xff]   ;;  %v10830_v15 = vld [vmem:[%s11147_s8 + $0x1fc0] ss:$16 sps:$4 sm:$0xff]  }
 0x415   : > { %7236 = vmatpush1.bf16.msra.mxu0 %v10739_v31  ;;  %7892 = vmatpush1.bf16.msra.mxu1 %v10742_v22  ;;  %v10833_v31 = vld [vmem:[%s11147_s8 + $0x1fc8] ss:$16 sps:$4 sm:$0xff]   ;;  %v10838_v22 = vld [vmem:[%s11147_s8 + $0x1fe4] ss:$16 sps:$4 sm:$0xff]  }
 0x416   : > { %7246 = vmatprep.subr.bf16.mxu0 %v10748_v32  ;;  %7902 = vmatprep.subr.bf16.mxu1 %v10751_v33  ;;  %v10841_v32 = vld [vmem:[%s11147_s8 + $0x1fec] ss:$16 sps:$4 sm:$0xff]   ;;  %v10836_v33 = vld [vmem:[%s11147_s8 + $0x1fe0] ss:$16 sps:$4 sm:$0xff]  }
 0x418   : > { %7238 = vmatmul.mubr.bf16.vlgmr.msra.gmra.mrb[0].mxu0 %v12298_v23  ;;  %7894 = vmatmul.mubr.bf16.vlgmr.msra.gmra.mrb[0].mxu1 %v12298_v23 }
 0x419   : > { %7247 = vmatpush1.bf16.msra.mxu0 %v10746_v34  ;;  %7903 = vmatpush1.bf16.msra.mxu1 %v10749_v36  ;;  %v10839_v34 = vld [vmem:[%s11147_s8 + $0x1fe8] ss:$16 sps:$4 sm:$0xff]   ;;  %v1476_v36 = vcombine.high %v12298_v23, %v12298_v23  ;;  %s7985_s8 = sshll.u32 %s226_s6, 4  ;;  %s12381_s8 = int_to_ptr.vmem [resolvable:$true] %s7985_s8 }
 0x41a   : > { %7248 = vmatprep.subr.bf16.mxu0 %v10754_v37  ;;  %7904 = vmatprep.subr.bf16.mxu1 %v10757_v39  ;;  %v1261_v37 = vsub.s32 0, %v11200_v42  ;;  %v1269_v39 = vsub.s32 2, %v11200_v42  ;;  %s10904_s27 = scalar_lea.vmem %s12381_s8, 128  ;;  %p10911_p5 = scmp.lt.s32.totalorder %s12381_s8, %s10909_s4 }
 0x41b   : > { %7278 = vmatprep.mubr.bf16.mxu0 %v1478_v40  ;;  %7934 = vmatprep.mubr.bf16.mxu1 %v1478_v40  ;;  %v1257_v40 = vld [vmem:[%s11155_s19] sm:$0xf]  ;;  %s12379_s19 = scalar_lea.hbm %s12426_s3, %s9122_s22  ;;  %p10905_p13 = scmp.ne.s32.totalorder %s12381_s8, %s10904_s27 }
 0x41c   : > { %p10912_p7 = scmp.lt.s32.totalorder %s10910_s28, %s10904_s27 }
 0x41d   : > { %7249 = vmatpush1.bf16.msra.mxu0 %v10752_v49  ;;  %7905 = vmatpush1.bf16.msra.mxu1 %v10755_v27  ;;  %v1265_v49 = vsub.s32 1, %v11200_v42  ;;  %v1273_v27 = vsub.s32 3, %v11200_v42  ;;  %p10906_p11 = pnand %p10905_p13, %p12437_p1 }
 0x41e   : > { %7250 = vmatprep.subr.bf16.mxu0 %v10760_v21  ;;  %7906 = vmatprep.subr.bf16.mxu1 %v10763_v41  ;;  %v10981_v21 = vmov 1983009808   ;;  %p10913_p9 = por %p10912_p7, %p10911_p5 }
 0x41f   : > { %v7954_v41 = vunpack.c.l.s4 %v10981_v21  ;;  %v1274_v23 = vrot.slane %v1257_v40, %v1273_v27  ;;  %p10907_p4 = pneg %p10906_p11 }
 0x421   : > { %7251 = vmatpush1.bf16.msra.mxu0 %v10758_v25  ;;  %7907 = vmatpush1.bf16.msra.mxu1 %v10761_v43  ;;  %v1262_v25 = vrot.slane %v1257_v40, %v1261_v37  ;;  %v1270_v43 = vrot.slane %v1257_v40, %v1269_v39  ;;  %p10914_p3 = pnand %p10913_p9, %p10907_p4 }
 0x422   : > { %7252 = vmatprep.subr.bf16.mxu0 %v10766_v44  ;;  %7908 = vmatprep.subr.bf16.mxu1 %v10769_v45  ;;  %v1266_v44 = vrot.slane %v1257_v40, %v1265_v49 }
 0x425   : > { %7253 = vmatpush1.bf16.msra.mxu0 %v10764_v46  ;;  %7909 = vmatpush1.bf16.msra.mxu1 %v10767_v47  ;;  %v7955_v47 = vunpack.c.0.s8 %v7954_v41 }
 0x426   : > { %7254 = vmatprep.subr.bf16.mxu0 %v10772_v50  ;;  %7910 = vmatprep.subr.bf16.mxu1 %v10775_v53 }
 0x429   : > { %7255 = vmatpush1.bf16.msra.mxu0 %v10770_v54  ;;  %7911 = vmatpush1.bf16.msra.mxu1 %v10773_v55 }
 0x42a   : > { %7256 = vmatprep.subr.bf16.mxu0 %v10778_v38  ;;  %7912 = vmatprep.subr.bf16.mxu1 %v10781_v56 }
 0x42d   : > { %7257 = vmatpush1.bf16.msra.mxu0 %v10776_v57  ;;  %7913 = vmatpush1.bf16.msra.mxu1 %v10779_v58 }
 0x42e   : > { %7258 = vmatprep.subr.bf16.mxu0 %v10784_v48  ;;  %7914 = vmatprep.subr.bf16.mxu1 %v10787_v59 }
 0x431   : > { %7259 = vmatpush1.bf16.msra.mxu0 %v10782_v60  ;;  %7915 = vmatpush1.bf16.msra.mxu1 %v10785_v13 }
 0x432   : > { %7260 = vmatprep.subr.bf16.mxu0 %v10790_v63  ;;  %7916 = vmatprep.subr.bf16.mxu1 %v10793_v0  ;;  %v7958_v0 = vsub.s32 %v7955_v47, %v11200_v42 }
 0x435   : > { %7261 = vmatpush1.bf16.msra.mxu0 %v10788_v35  ;;  %7917 = vmatpush1.bf16.msra.mxu1 %v10791_v2 }
 0x436   : > { %7262 = vmatprep.subr.bf16.mxu0 %v10796_v3  ;;  %7918 = vmatprep.subr.bf16.mxu1 %v10799_v51 }
 0x439   : > { %7263 = vmatpush1.bf16.msra.mxu0 %v10794_v4  ;;  %7919 = vmatpush1.bf16.msra.mxu1 %v10797_v5 }
 0x43a   : > { %7264 = vmatprep.subr.bf16.mxu0 %v10802_v61  ;;  %7920 = vmatprep.subr.bf16.mxu1 %v10805_v7 }
 0x43d   : > { %7265 = vmatpush1.bf16.msra.mxu0 %v10800_v8  ;;  %7921 = vmatpush1.bf16.msra.mxu1 %v10803_v10 }
 0x43e   : > { %7266 = vmatprep.subr.bf16.mxu0 %v10808_v12  ;;  %7922 = vmatprep.subr.bf16.mxu1 %v10811_v14 }
 0x441   : > { %7267 = vmatpush1.bf16.msra.mxu0 %v10806_v16  ;;  %7923 = vmatpush1.bf16.msra.mxu1 %v10809_v1 }
 0x442   : > { %7268 = vmatprep.subr.bf16.mxu0 %v10814_v52  ;;  %7924 = vmatprep.subr.bf16.mxu1 %v10817_v17 }
 0x445   : > { %7269 = vmatpush1.bf16.msra.mxu0 %v10812_v18  ;;  %7925 = vmatpush1.bf16.msra.mxu1 %v10815_v9 }
 0x446   : > { %7270 = vmatprep.subr.bf16.mxu0 %v10820_v19  ;;  %7926 = vmatprep.subr.bf16.mxu1 %v10823_v20 }
 0x449   : > { %7271 = vmatpush1.bf16.msra.mxu0 %v10818_v62  ;;  %7927 = vmatpush1.bf16.msra.mxu1 %v10821_v24 }
 0x44a   : > { %7272 = vmatprep.subr.bf16.mxu0 %v10826_v26  ;;  %7928 = vmatprep.subr.bf16.mxu1 %v10829_v6 }
 0x44d   : > { %7273 = vmatpush1.bf16.msra.mxu0 %v10824_v28  ;;  %7929 = vmatpush1.bf16.msra.mxu1 %v10827_v29 }
 0x44e   : > { %7274 = vmatprep.subr.bf16.mxu0 %v10832_v11  ;;  %7930 = vmatprep.subr.bf16.mxu1 %v10835_v30 }
 0x451   : > { %7275 = vmatpush1.bf16.msra.mxu0 %v10830_v15  ;;  %7931 = vmatpush1.bf16.msra.mxu1 %v10833_v31 }
 0x452   : > { %7276 = vmatprep.subr.bf16.mxu0 %v10838_v22  ;;  %7932 = vmatprep.subr.bf16.mxu1 %v10841_v32 }
 0x455   : > { %7277 = vmatpush1.bf16.msra.mxu0 %v10836_v33  ;;  %7933 = vmatpush1.bf16.msra.mxu1 %v10839_v34 }
 0x458   : > { %7279 = vmatmul.mubr.bf16.vlgmr.msra.gmra.mrb[0].mxu0 %v1476_v36  ;;  %7935 = vmatmul.mubr.bf16.vlgmr.msra.gmra.mrb[0].mxu1 %v1476_v36 }
 0x52b   : > { %v7280_v45 = vpop.f32.mrb[0].mxu0  ;;  %v7936_v46 = vpop.f32.mrb[0].mxu1 }
 0x52c   : > { %v9123_v50 = vadd.f32 %v7280_v45, %v1262_v25  ;;  %v9125_v53 = vadd.f32 %v7936_v46, %v1270_v43  ;;  %v7282_v54 = vpop.f32.mrb[1].mxu0  ;;  %v7938_v55 = vpop.f32.mrb[1].mxu1 }
 0x52d   : > { %v9124_v38 = vadd.f32 %v7282_v54, %v1266_v44  ;;  %v9126_v56 = vadd.f32 %v7938_v55, %v1274_v23  ;;  %v7284_v57 = vpop.f32.mrb[2].mxu0  ;;  %v7940_v58 = vpop.f32.mrb[2].mxu1 }
 0x52e   : > { %v7943_v48 = vmax.f32 %v9123_v50, 0.0  ;;  %v7945_v59 = vmax.f32 %v9125_v53, 0.0  ;;  %v7285_v60 = vpop.f32.mrb[3].mxu0  ;;  %v7941_v13 = vpop.f32.mrb[3].mxu1 }
 0x52f   : > { %v7944_v63 = vmax.f32 %v9124_v38, 0.0  ;;  %v7946_v35 = vmax.f32 %v9126_v56, 0.0 }
 0x531   : > { %v7951_v2 = vcombine.low %v7943_v48, %v7944_v63  ;;  %v7952_v3 = vcombine.low %v7945_v59, %v7946_v35 }
 0x533   : > { %v7959_v51 = vrot.slane %v7951_v2, %v7958_v0  ;;  %v7966_v4 = vrot.slane %v7952_v3, %v7958_v0 }
 0x535   : > { %v7967_v5 = vcombine.low %v7959_v51, %v7966_v4 }
 0x537   : > { %7969 = vst [vmem:[%s226_s6] sm:$0xff] %v7967_v5 }
 0x538   : > { %10917 = shalt.err (!%p10914_p3)
}
 0x539   : > { %s10918_s20 = scalar_lea.hbm %s12379_s19, 128  ;;  %s10922_s5 = scalar_lea.hbm %s12426_s3, 256 }
 0x53a   : > { %p10919_p12 = scmp.ne.s32.totalorder %s12379_s19, %s10918_s20  ;;  %p10923_p2 = scmp.lt.u32.totalorder %s12379_s19, %s12426_s3 }
 0x53b   : > { %p10924_p10 = scmp.lt.u32.totalorder %s10922_s5, %s10918_s20  ;;  %p10926_p13 = scmp.lt.u32.totalorder %s10918_s20, %s12379_s19 }
 0x53c   : > { %p10920_p8 = pnand %p10919_p12, %p12437_p1 }
 0x53d   : > { %p10925_p6 = por %p10924_p10, %p10923_p2 }
 0x53e   : > { %p10921_p0 = pneg %p10920_p8 }
 0x53f   : > { %p10927_p11 = por %p10926_p13, %p10925_p6 }
 0x541   : > { %p10928_p4 = pnand %p10927_p11, %p10921_p0 }
 0x543   : > { %10931 = shalt.err (!%p10928_p4)
}
 0x544   : > { %9251 = dma.vmem_to_hbm [thread:$0]  (%p12437_p1), %s12381_s8, 128, %s12379_s19, %s7971_s23  }
 0x545 PF: > { %s7997_s11 = sand.u32 1, %s10962_s12   ;;  %p12438_p5 = scmp.ne.s32.totalorder %s12432_s25, 0 }
 0x546   : > { %p12439_p7 = scmp.ge.s32.totalorder %s10974_s15, 2  ;;  %s7998_s17 = scalar_lea.sflag [#allocation4], %s7997_s11 }
 0x548   : > { %p9261_p9 = pnand %p12439_p7, %p12438_p5 }
 0x54a   : > { %10957 = dma.done.wait (!%p9261_p9), %s7998_s17, 128  }
 0x54b   : > { %10959 = vsyncadd (!%p9261_p9), %s7998_s17, 4294967168  ;;  %p19_p3 = scmp.ge.s32.totalorder %s11028_s18, 4   ;;  %s12440_s12 = smov %s10966_s13 }
 0x54c   : > { %s12441_s13 = smov %s10970_s14  ;;  %s12442_s14 = smov %s11040_s21 }
 0x54d   : > { %s12443_s15 = smov %s11028_s18  ;;  %21 = sbr.rel (!%p19_p3) target bundleno = 7 (0x7), region = 90 }
 0x554   :  { %8003 = vsyncpa [#allocation3], 1 }
 0x555   :  { %8005 = vsyncpa [#allocation3 + $0x1], 1 }
 0x556   :  { %8006 = vsyncpa [#allocation6], 1 }
 0x557   :  { %8008 = vsyncpa [#allocation6 + $0x1], 1 }
 0x558   :  { %8009 = vsyncpa [#allocation4], 1 }
 0x559   :  { %8011 = vsyncpa [#allocation4 + $0x1], 1 }

</bundles_post_ra>
